<compile_context>
chip_gen: v7x
topology: tpu7x:2x2x1
jax: 0.10.0
libtpu: 0.0.40
codegen_flags: <defaults>
</compile_context>

<pallas_src>
import numpy as np
import jax
import jax.numpy as jnp
from jax import lax
from jax.experimental import pallas as pl
from jax.experimental.pallas import tpu as pltpu

# ----------------------------- config (small) --------------------------------
B = 2                 # batch
H = W = 16            # input spatial
C_IN = 3              # RGB
C_MID = 64            # stem hidden channels (logical)
C_MID_PAD = 128       # lane-dense padding of stem hidden channels
C_FEAT = 512          # backbone feature channels (id_head in_features=512)
NUM_CLASSES = 8       # config['num_classes'] (synthetic)
NUM_ATTR_CLASSES = 2  # TODO(synk): AttributesDetectModule() default class count unknown; using 2.

KH = KW = 3
STRIDE = 2
PAD = 1
H1 = W1 = H // 2          # 8  (after conv1)
H2 = W2 = H1 // 2         # 4  (after conv2)
N1 = B * H1 * W1          # 128 rows of conv1 output
N2 = B * H2 * W2          # 32  rows of conv2 output (feature map rows)
HW2 = H2 * W2             # 16  spatial positions per image for GAP
K1 = KH * KW * C_IN       # 27
K1_PAD = 32               # padded contraction dim for conv1
K2 = KH * KW * C_MID_PAD  # 1152 — long-K conv2 contraction

BRANCHES = ("spectacles", "facial_hair", "emotion", "pose", "gender")
NUM_BRANCH = len(BRANCHES)
NUM_STAGE = NUM_BRANCH + 1             # 5 AFD branches + 1 id/classifier stage
LOGIT_LANES = 128                      # lane-dense packed logits slab
EMB_ROWS = NUM_STAGE * B               # 12 rows: 5 attr embeddings + id embedding
STACK_ROWS = NUM_STAGE * N2            # 192 rows of stacked per-branch feature maps


# ----------------------------- fused Pallas kernel ----------------------------
def _fused_kernel(cols1_ref, w1_ref, b1_ref, sel_ref, w2_ref, b2_ref,
                  wab_ref, bab_ref, pool_ref, wcls_ref, bcls_ref,
                  emb_ref, log_ref,
                  cols2_scr, cur_scr, stk_scr):
  """Whole model forward, pipelined over NUM_STAGE grid steps.

  Step 0      : conv stem (conv1 + long-K conv2) -> cur_scr
  Steps 0..4  : AFD branch i (uses wab block i, prefetched behind step i-1)
  Step 5      : id FC (wab block 5 == we), block-diag GAP, packed classifier
  """
  step = pl.program_id(0)

  # ---- step 0: conv stem -----------------------------------------------------
  @pl.when(step == 0)
  def _stem():
    # conv1 (3x3/s2 as matmul over host-side im2col), bias, ReLU
    h = jnp.dot(cols1_ref[...], w1_ref[...], preferred_element_type=jnp.float32)
    h = jnp.maximum(h + b1_ref[...], 0.0)              # [N1, C_MID_PAD] f32
    h_bf = h.astype(jnp.bfloat16)
    # conv2 gather: 9 row-selection matmuls -> lane-aligned column blocks of
    # a cols2 scratch, then ONE K=1152 matmul (no per-tap f32 accumulator).
    for k in range(KH * KW):
      tap = jnp.dot(sel_ref[k], h_bf, preferred_element_type=jnp.float32)
      cols2_scr[:, k * C_MID_PAD:(k + 1) * C_MID_PAD] = tap.astype(jnp.bfloat16)
    feat = jnp.dot(cols2_scr[...], w2_ref[...], preferred_element_type=jnp.float32)
    cur_scr[...] = jnp.maximum(feat + b2_ref[...], 0.0)  # [N2, C_FEAT] f32

  # ---- steps 0..4: cascaded attention feature decomposition -------------------
  @pl.when(step < NUM_BRANCH)
  def _branch():
    cur = cur_scr[...]                                   # [N2, C_FEAT] f32
    att = jnp.dot(cur.astype(jnp.bfloat16), wab_ref[0],
                  preferred_element_type=jnp.float32) + bab_ref[0]
    # sigmoid via exp + EUP reciprocal (keeps VPU slots free between MXU pushes)
    gate = pl.reciprocal(1.0 + jnp.exp(-att), approx=True)
    off = pl.multiple_of(step * N2, N2)
    stk_scr[pl.ds(off, N2), :] = gate * cur              # x_attr, 32-row aligned store
    cur_scr[...] = (1.0 - gate) * cur                    # x_non; x_attr not kept live

  # ---- step 5: id head, block-diagonal GAP, packed classifier -----------------
  @pl.when(step == NUM_BRANCH)
  def _final():
    stk_scr[NUM_BRANCH * N2:NUM_STAGE * N2, :] = cur_scr[...]   # id branch feature map
    # one block-diagonal pooling matmul -> all 6 GAP embeddings at once (f32)
    pooled = jnp.dot(pool_ref[...], stk_scr[...],
                     preferred_element_type=jnp.float32)        # [EMB_ROWS, C_FEAT]
    # id FC (wab block 5 == we, bab block 5 == be); applied to all rows then
    # row-selected so no unaligned sublane slice/concat is needed.
    fc_all = jnp.dot(pooled.astype(jnp.bfloat16), wab_ref[0],
                     preferred_element_type=jnp.float32) + bab_ref[0]
    row_ids = lax.broadcasted_iota(jnp.int32, (EMB_ROWS, 1), 0)
    e_all = jnp.where(row_ids >= NUM_BRANCH * B, fc_all, pooled)
    emb_ref[...] = e_all
    # all 6 heads' logits in one lane-dense packed matmul
    log_ref[...] = (jnp.dot(e_all.astype(jnp.bfloat16), wcls_ref[...],
                            preferred_element_type=jnp.float32) + bcls_ref[...])


def fused_forward_call(inputs):
  def const_spec(shape):
    nd = len(shape)
    return pl.BlockSpec(shape, lambda i: (0,) * nd)

  (cols1, w1, b1, sel, w2, b2, wab, bab, pool, wcls, bcls) = inputs
  in_specs = [
      const_spec(cols1.shape),                         # cols1
      const_spec(w1.shape),                            # w1
      const_spec(b1.shape),                            # b1
      const_spec(sel.shape),                           # sel
      const_spec(w2.shape),                            # w2_flat (long-K)
      const_spec(b2.shape),                            # b2
      pl.BlockSpec((1, C_FEAT, C_FEAT), lambda i: (i, 0, 0)),   # wa[0..4] + we, pipelined
      pl.BlockSpec((1, 1, C_FEAT), lambda i: (i, 0, 0)),        # ba[0..4] + be, pipelined
      const_spec(pool.shape),                          # block-diag GAP matrix
      const_spec(wcls.shape),                          # packed classifier
      const_spec(bcls.shape),
  ]
  return pl.pallas_call(
      _fused_kernel,
      grid=(NUM_STAGE,),
      in_specs=in_specs,
      out_specs=(const_spec((EMB_ROWS, C_FEAT)),
                 const_spec((EMB_ROWS, LOGIT_LANES))),
      out_shape=(jax.ShapeDtypeStruct((EMB_ROWS, C_FEAT), jnp.float32),
                 jax.ShapeDtypeStruct((EMB_ROWS, LOGIT_LANES), jnp.float32)),
      scratch_shapes=[pltpu.VMEM((N2, K2), jnp.bfloat16),          # cols2
                      pltpu.VMEM((N2, C_FEAT), jnp.float32),       # cur (carried)
                      pltpu.VMEM((STACK_ROWS, C_FEAT), jnp.float32)],  # stacked x_attr
      compiler_params=pltpu.CompilerParams(
          dimension_semantics=("arbitrary",),
          vmem_limit_bytes=32 * 1024 * 1024),
  )(*inputs)


# ----------------------------- JAX glue ---------------------------------------
def im2col(x_nhwc, kh, kw, stride, pad):
  """Extract conv patches from the *kernel input* (cheap glue; tiny array)."""
  x = jnp.pad(x_nhwc, ((0, 0), (pad, pad), (pad, pad), (0, 0)))
  bsz, hp, wp, c = x.shape
  ho = (hp - kh) // stride + 1
  wo = (wp - kw) // stride + 1
  patches = []
  for i in range(kh):
    for j in range(kw):
      patches.append(x[:, i:i + stride * ho:stride, j:j + stride * wo:stride, :])
  cols = jnp.concatenate(patches, axis=-1)          # [B, Ho, Wo, kh*kw*C]
  return cols.reshape(bsz * ho * wo, kh * kw * c), ho, wo


def _build_conv2_selection():
  """0/1 row-selection matrices implementing conv2's im2col gather in-kernel."""
  sel = np.zeros((KH * KW, N2, N1), np.float32)
  for b in range(B):
    for oh in range(H2):
      for ow in range(W2):
        r_out = b * H2 * W2 + oh * W2 + ow
        for ki in range(KH):
          for kj in range(KW):
            ih = oh * STRIDE - PAD + ki
            iw = ow * STRIDE - PAD + kj
            if 0 <= ih < H1 and 0 <= iw < W1:
              r_in = b * H1 * W1 + ih * W1 + iw
              sel[ki * KW + kj, r_out, r_in] = 1.0
  return jnp.asarray(sel, jnp.bfloat16)


def _build_block_pool():
  """Block-diagonal GAP matrix [EMB_ROWS, STACK_ROWS]: one matmul pools all 6 branches."""
  pool = np.zeros((EMB_ROWS, STACK_ROWS), np.float32)
  for br in range(NUM_STAGE):
    for b in range(B):
      r = br * B + b
      c0 = br * N2 + b * HW2
      pool[r, c0:c0 + HW2] = 1.0 / HW2
  return jnp.asarray(pool)


def init_packed_params(key):
  """Synthetic weights, packed into the fused-kernel layout (bf16 MXU operands)."""
  def dense(k, fan_in, fan_out, scale=0.05):
    kw_, kb_ = jax.random.split(k)
    return (scale * jax.random.normal(kw_, (fan_in, fan_out), jnp.float32),
            scale * jax.random.normal(kb_, (1, fan_out), jnp.float32))

  keys = iter(jax.random.split(key, 32))
  w1, b1 = dense(next(keys), K1, C_MID)                       # conv1 (im2col layout)
  w2, b2 = dense(next(keys), KH * KW * C_MID, C_FEAT)         # conv2 (im2col layout)
  wa, ba, wh, bh = [], [], [], []
  for _ in BRANCHES:                                          # AFD 1x1 attention convs
    w_, b_ = dense(next(keys), C_FEAT, C_FEAT)
    wa.append(w_); ba.append(b_)
  for _ in BRANCHES:                                          # attribute head FCs
    w_, b_ = dense(next(keys), C_FEAT, NUM_ATTR_CLASSES)
    wh.append(w_); bh.append(b_)
  we, be = dense(next(keys), C_FEAT, C_FEAT)                  # id embedding FC
  wc, bc = dense(next(keys), C_FEAT, NUM_CLASSES)             # id classifier FC

  p = {}
  # conv1: pad K 27->32 and out-channels 64->128 (lane-dense intermediate)
  w1p = jnp.zeros((K1_PAD, C_MID_PAD), jnp.float32).at[:K1, :C_MID].set(w1)
  b1p = jnp.zeros((1, C_MID_PAD), jnp.float32).at[:, :C_MID].set(b1)
  p["w1"], p["b1"] = w1p.astype(jnp.bfloat16), b1p

  # conv2: single long-K operand [9*C_MID_PAD, C_FEAT]; tap k occupies rows
  # [k*128, k*128+64) (zero rows match the zero-padded hidden channels).
  w2flat = jnp.zeros((K2, C_FEAT), jnp.float32)
  for k in range(KH * KW):
    w2flat = w2flat.at[k * C_MID_PAD:k * C_MID_PAD + C_MID, :].set(
        w2[k * C_MID:(k + 1) * C_MID, :])
  p["w2"], p["b2"] = w2flat.astype(jnp.bfloat16), b2

  # AFD attention weights + id-embedding FC stacked so the id FC rides the same
  # per-step BlockSpec pipeline (block i fetched behind step i-1's compute).
  p["wab"] = jnp.stack(wa + [we]).astype(jnp.bfloat16)        # [6, 512, 512]
  p["bab"] = jnp.stack(ba + [be])                             # [6, 1, 512] f32

  # packed lane-dense classifier slab: attr head i at cols [2i,2i+2), id at cols [10,18)
  wcls = jnp.zeros((C_FEAT, LOGIT_LANES), jnp.float32)
  bcls = jnp.zeros((1, LOGIT_LANES), jnp.float32)
  for i in range(NUM_BRANCH):
    c0 = i * NUM_ATTR_CLASSES
    wcls = wcls.at[:, c0:c0 + NUM_ATTR_CLASSES].set(wh[i])
    bcls = bcls.at[:, c0:c0 + NUM_ATTR_CLASSES].set(bh[i])
  c0 = NUM_BRANCH * NUM_ATTR_CLASSES
  wcls = wcls.at[:, c0:c0 + NUM_CLASSES].set(wc)
  bcls = bcls.at[:, c0:c0 + NUM_CLASSES].set(bc)
  p["wcls"], p["bcls"] = wcls.astype(jnp.bfloat16), bcls

  # constant gather / pooling matrices
  p["sel"] = _build_conv2_selection()
  p["pool"] = _build_block_pool()
  return p


def mtlface_forward(pp, x_nchw):
  """Forward pass of MTLFaceRecognitionForConcat (synthetic weights), 1 kernel."""
  x = jnp.transpose(x_nchw, (0, 2, 3, 1)).astype(jnp.float32)    # NCHW -> NHWC
  cols1, _, _ = im2col(x, KH, KW, stride=STRIDE, pad=PAD)        # [N1, 27]
  cols1 = jnp.pad(cols1, ((0, 0), (0, K1_PAD - cols1.shape[1]))).astype(jnp.bfloat16)

  inputs = (cols1, pp["w1"], pp["b1"], pp["sel"], pp["w2"], pp["b2"],
            pp["wab"], pp["bab"], pp["pool"], pp["wcls"], pp["bcls"])
  emb_all, log_all = fused_forward_call(inputs)

  logits, embedding = {}, {}
  for i, name in enumerate(BRANCHES):
    r0, c0 = i * B, i * NUM_ATTR_CLASSES
    embedding[name] = emb_all[r0:r0 + B]
    logits[name] = log_all[r0:r0 + B, c0:c0 + NUM_ATTR_CLASSES]
  r0, c0 = NUM_BRANCH * B, NUM_BRANCH * NUM_ATTR_CLASSES
  embedding["id"] = emb_all[r0:r0 + B]
  logits["id"] = log_all[r0:r0 + B, c0:c0 + NUM_CLASSES]

  # MTLFaceForConcatOutputs(logits=LogitsOutputs(...), embedding=...)
  return {"logits": logits, "embedding": embedding}


# TODO(synk): checkpoint loading (_load_backbone_ckpt) and requires_grad freezing
#             (_freeze_layers) have no inference-time compute effect and are omitted.
# TODO(synk): fp8/int8 weight quantization (review item) not applied — needs accuracy check.

if __name__ == "__main__":
  key = jax.random.PRNGKey(0)
  pkey, xkey = jax.random.split(key)
  params = init_packed_params(pkey)
  x = jax.random.normal(xkey, (B, C_IN, H, W), jnp.float32)   # NCHW like PyTorch

  out = jax.jit(mtlface_forward)(params, x)
  out = jax.block_until_ready(out)

  assert out["logits"]["id"].shape == (B, NUM_CLASSES)
  assert out["logits"]["gender"].shape == (B, NUM_ATTR_CLASSES)
  assert out["embedding"]["id"].shape == (B, C_FEAT)
  assert out["embedding"]["spectacles"].shape == (B, C_FEAT)
  assert all(jnp.isfinite(v).all() for v in jax.tree_util.tree_leaves(out))
  print("KERNEL_OK")
</pallas_src>

<mosaic_0001>
module attributes {stable_mosaic.version = 11 : i64} {
  func.func @_fused_kernel(%arg0: i32, %arg1: memref<128x32xbf16, #tpu.memory_space<vmem>>, %arg2: memref<32x128xbf16, #tpu.memory_space<vmem>>, %arg3: memref<1x128xf32, #tpu.memory_space<vmem>>, %arg4: memref<9x32x128xbf16, #tpu.memory_space<vmem>>, %arg5: memref<1152x512xbf16, #tpu.memory_space<vmem>>, %arg6: memref<1x512xf32, #tpu.memory_space<vmem>>, %arg7: memref<1x512x512xbf16, #tpu.memory_space<vmem>>, %arg8: memref<1x1x512xf32, #tpu.memory_space<vmem>>, %arg9: memref<12x192xf32, #tpu.memory_space<vmem>>, %arg10: memref<512x128xbf16, #tpu.memory_space<vmem>>, %arg11: memref<1x128xf32, #tpu.memory_space<vmem>>, %arg12: memref<12x512xf32, #tpu.memory_space<vmem>>, %arg13: memref<12x128xf32, #tpu.memory_space<vmem>>, %arg14: memref<32x1152xbf16, #tpu.memory_space<vmem>>, %arg15: memref<32x512xf32, #tpu.memory_space<vmem>>, %arg16: memref<192x512xf32, #tpu.memory_space<vmem>>) attributes {dimension_semantics = [#tpu.dimension_semantics<arbitrary>], iteration_bounds = array<i64: 6>, scalar_prefetch = 0 : i64, scratch_operands = 3 : i64, tpu.core_type = #tpu.core_type<tc>, window_params = [{pipeline_mode = #tpu.pipeline_mode<synchronous>, transform_indices = @transform_0, window_bounds = array<i64: 128, 32>}, {pipeline_mode = #tpu.pipeline_mode<synchronous>, transform_indices = @transform_1, window_bounds = array<i64: 32, 128>}, {pipeline_mode = #tpu.pipeline_mode<synchronous>, transform_indices = @transform_2, window_bounds = array<i64: 1, 128>}, {pipeline_mode = #tpu.pipeline_mode<synchronous>, transform_indices = @transform_3, window_bounds = array<i64: 9, 32, 128>}, {pipeline_mode = #tpu.pipeline_mode<synchronous>, transform_indices = @transform_4, window_bounds = array<i64: 1152, 512>}, {pipeline_mode = #tpu.pipeline_mode<synchronous>, transform_indices = @transform_5, window_bounds = array<i64: 1, 512>}, {transform_indices = @transform_6, window_bounds = array<i64: 1, 512, 512>}, {transform_indices = @transform_7, window_bounds = array<i64: 1, 1, 512>}, {pipeline_mode = #tpu.pipeline_mode<synchronous>, transform_indices = @transform_8, window_bounds = array<i64: 12, 192>}, {pipeline_mode = #tpu.pipeline_mode<synchronous>, transform_indices = @transform_9, window_bounds = array<i64: 512, 128>}, {pipeline_mode = #tpu.pipeline_mode<synchronous>, transform_indices = @transform_10, window_bounds = array<i64: 1, 128>}, {pipeline_mode = #tpu.pipeline_mode<synchronous>, transform_indices = @transform_11, window_bounds = array<i64: 12, 512>}, {pipeline_mode = #tpu.pipeline_mode<synchronous>, transform_indices = @transform_12, window_bounds = array<i64: 12, 128>}]} {
    %c0_i32 = arith.constant 0 : i32
    %0 = arith.cmpi eq, %arg0, %c0_i32 : i32
    %1 = arith.extui %0 : i1 to i32
    %c0_i32_0 = arith.constant 0 : i32
    %2 = arith.cmpi ne, %1, %c0_i32_0 : i32
    scf.if %2 {
      %c0 = arith.constant 0 : index
      %c0_4 = arith.constant 0 : index
      %9 = vector.load %arg1[%c0, %c0_4] : memref<128x32xbf16, #tpu.memory_space<vmem>>, vector<128x32xbf16>
      %c0_5 = arith.constant 0 : index
      %c0_6 = arith.constant 0 : index
      %10 = vector.load %arg2[%c0_5, %c0_6] : memref<32x128xbf16, #tpu.memory_space<vmem>>, vector<32x128xbf16>
      %cst = arith.constant dense<0.000000e+00> : vector<128x128xf32>
      %11 = tpu.matmul %9, %10, %cst {dimension_numbers = #tpu.dot_dimension_numbers<[1], [0], [0], [1], [0, 0, 1, 1], [], []>} : vector<128x32xbf16>, vector<32x128xbf16>, vector<128x128xf32> -> vector<128x128xf32>
      %c0_7 = arith.constant 0 : index
      %c0_8 = arith.constant 0 : index
      %12 = vector.load %arg3[%c0_7, %c0_8] : memref<1x128xf32, #tpu.memory_space<vmem>>, vector<1x128xf32>
      %13 = vector.broadcast %12 : vector<1x128xf32> to vector<128x128xf32>
      %14 = arith.addf %11, %13 : vector<128x128xf32>
      %cst_9 = arith.constant 0.000000e+00 : f32
      %15 = vector.broadcast %cst_9 : f32 to vector<128x128xf32>
      %16 = arith.maximumf %14, %15 : vector<128x128xf32>
      %17 = arith.truncf %16 : vector<128x128xf32> to vector<128x128xbf16>
      %c0_10 = arith.constant 0 : index
      %c0_11 = arith.constant 0 : index
      %c0_12 = arith.constant 0 : index
      %18 = vector.load %arg4[%c0_10, %c0_11, %c0_12] : memref<9x32x128xbf16, #tpu.memory_space<vmem>>, vector<1x32x128xbf16>
      %19 = vector.shape_cast %18 : vector<1x32x128xbf16> to vector<32x128xbf16>
      %cst_13 = arith.constant dense<0.000000e+00> : vector<32x128xf32>
      %20 = tpu.matmul %19, %17, %cst_13 {dimension_numbers = #tpu.dot_dimension_numbers<[1], [0], [0], [1], [0, 0, 1, 1], [], []>} : vector<32x128xbf16>, vector<128x128xbf16>, vector<32x128xf32> -> vector<32x128xf32>
      %21 = arith.truncf %20 : vector<32x128xf32> to vector<32x128xbf16>
      %c0_14 = arith.constant 0 : index
      %c0_15 = arith.constant 0 : index
      %22 = vector.load %arg14[%c0_14, %c0_15] : memref<32x1152xbf16, #tpu.memory_space<vmem>>, vector<32x128xbf16>
      tpu.vector_store %arg14[%c0_14, %c0_15], %21 {strides = array<i32>} : memref<32x1152xbf16, #tpu.memory_space<vmem>>, vector<32x128xbf16>,
      %c1 = arith.constant 1 : index
      %c0_16 = arith.constant 0 : index
      %c0_17 = arith.constant 0 : index
      %23 = vector.load %arg4[%c1, %c0_16, %c0_17] : memref<9x32x128xbf16, #tpu.memory_space<vmem>>, vector<1x32x128xbf16>
      %24 = vector.shape_cast %23 : vector<1x32x128xbf16> to vector<32x128xbf16>
      %cst_18 = arith.constant dense<0.000000e+00> : vector<32x128xf32>
      %25 = tpu.matmul %24, %17, %cst_18 {dimension_numbers = #tpu.dot_dimension_numbers<[1], [0], [0], [1], [0, 0, 1, 1], [], []>} : vector<32x128xbf16>, vector<128x128xbf16>, vector<32x128xf32> -> vector<32x128xf32>
      %26 = arith.truncf %25 : vector<32x128xf32> to vector<32x128xbf16>
      %c0_19 = arith.constant 0 : index
      %c128 = arith.constant 128 : index
      %27 = vector.load %arg14[%c0_19, %c128] : memref<32x1152xbf16, #tpu.memory_space<vmem>>, vector<32x128xbf16>
      tpu.vector_store %arg14[%c0_19, %c128], %26 {strides = array<i32>} : memref<32x1152xbf16, #tpu.memory_space<vmem>>, vector<32x128xbf16>,
      %c2 = arith.constant 2 : index
      %c0_20 = arith.constant 0 : index
      %c0_21 = arith.constant 0 : index
      %28 = vector.load %arg4[%c2, %c0_20, %c0_21] : memref<9x32x128xbf16, #tpu.memory_space<vmem>>, vector<1x32x128xbf16>
      %29 = vector.shape_cast %28 : vector<1x32x128xbf16> to vector<32x128xbf16>
      %cst_22 = arith.constant dense<0.000000e+00> : vector<32x128xf32>
      %30 = tpu.matmul %29, %17, %cst_22 {dimension_numbers = #tpu.dot_dimension_numbers<[1], [0], [0], [1], [0, 0, 1, 1], [], []>} : vector<32x128xbf16>, vector<128x128xbf16>, vector<32x128xf32> -> vector<32x128xf32>
      %31 = arith.truncf %30 : vector<32x128xf32> to vector<32x128xbf16>
      %c0_23 = arith.constant 0 : index
      %c256 = arith.constant 256 : index
      %32 = vector.load %arg14[%c0_23, %c256] : memref<32x1152xbf16, #tpu.memory_space<vmem>>, vector<32x128xbf16>
      tpu.vector_store %arg14[%c0_23, %c256], %31 {strides = array<i32>} : memref<32x1152xbf16, #tpu.memory_space<vmem>>, vector<32x128xbf16>,
      %c3 = arith.constant 3 : index
      %c0_24 = arith.constant 0 : index
      %c0_25 = arith.constant 0 : index
      %33 = vector.load %arg4[%c3, %c0_24, %c0_25] : memref<9x32x128xbf16, #tpu.memory_space<vmem>>, vector<1x32x128xbf16>
      %34 = vector.shape_cast %33 : vector<1x32x128xbf16> to vector<32x128xbf16>
      %cst_26 = arith.constant dense<0.000000e+00> : vector<32x128xf32>
      %35 = tpu.matmul %34, %17, %cst_26 {dimension_numbers = #tpu.dot_dimension_numbers<[1], [0], [0], [1], [0, 0, 1, 1], [], []>} : vector<32x128xbf16>, vector<128x128xbf16>, vector<32x128xf32> -> vector<32x128xf32>
      %36 = arith.truncf %35 : vector<32x128xf32> to vector<32x128xbf16>
      %c0_27 = arith.constant 0 : index
      %c384 = arith.constant 384 : index
      %37 = vector.load %arg14[%c0_27, %c384] : memref<32x1152xbf16, #tpu.memory_space<vmem>>, vector<32x128xbf16>
      tpu.vector_store %arg14[%c0_27, %c384], %36 {strides = array<i32>} : memref<32x1152xbf16, #tpu.memory_space<vmem>>, vector<32x128xbf16>,
      %c4 = arith.constant 4 : index
      %c0_28 = arith.constant 0 : index
      %c0_29 = arith.constant 0 : index
      %38 = vector.load %arg4[%c4, %c0_28, %c0_29] : memref<9x32x128xbf16, #tpu.memory_space<vmem>>, vector<1x32x128xbf16>
      %39 = vector.shape_cast %38 : vector<1x32x128xbf16> to vector<32x128xbf16>
      %cst_30 = arith.constant dense<0.000000e+00> : vector<32x128xf32>
      %40 = tpu.matmul %39, %17, %cst_30 {dimension_numbers = #tpu.dot_dimension_numbers<[1], [0], [0], [1], [0, 0, 1, 1], [], []>} : vector<32x128xbf16>, vector<128x128xbf16>, vector<32x128xf32> -> vector<32x128xf32>
      %41 = arith.truncf %40 : vector<32x128xf32> to vector<32x128xbf16>
      %c0_31 = arith.constant 0 : index
      %c512 = arith.constant 512 : index
      %42 = vector.load %arg14[%c0_31, %c512] : memref<32x1152xbf16, #tpu.memory_space<vmem>>, vector<32x128xbf16>
      tpu.vector_store %arg14[%c0_31, %c512], %41 {strides = array<i32>} : memref<32x1152xbf16, #tpu.memory_space<vmem>>, vector<32x128xbf16>,
      %c5 = arith.constant 5 : index
      %c0_32 = arith.constant 0 : index
      %c0_33 = arith.constant 0 : index
      %43 = vector.load %arg4[%c5, %c0_32, %c0_33] : memref<9x32x128xbf16, #tpu.memory_space<vmem>>, vector<1x32x128xbf16>
      %44 = vector.shape_cast %43 : vector<1x32x128xbf16> to vector<32x128xbf16>
      %cst_34 = arith.constant dense<0.000000e+00> : vector<32x128xf32>
      %45 = tpu.matmul %44, %17, %cst_34 {dimension_numbers = #tpu.dot_dimension_numbers<[1], [0], [0], [1], [0, 0, 1, 1], [], []>} : vector<32x128xbf16>, vector<128x128xbf16>, vector<32x128xf32> -> vector<32x128xf32>
      %46 = arith.truncf %45 : vector<32x128xf32> to vector<32x128xbf16>
      %c0_35 = arith.constant 0 : index
      %c640 = arith.constant 640 : index
      %47 = vector.load %arg14[%c0_35, %c640] : memref<32x1152xbf16, #tpu.memory_space<vmem>>, vector<32x128xbf16>
      tpu.vector_store %arg14[%c0_35, %c640], %46 {strides = array<i32>} : memref<32x1152xbf16, #tpu.memory_space<vmem>>, vector<32x128xbf16>,
      %c6 = arith.constant 6 : index
      %c0_36 = arith.constant 0 : index
      %c0_37 = arith.constant 0 : index
      %48 = vector.load %arg4[%c6, %c0_36, %c0_37] : memref<9x32x128xbf16, #tpu.memory_space<vmem>>, vector<1x32x128xbf16>
      %49 = vector.shape_cast %48 : vector<1x32x128xbf16> to vector<32x128xbf16>
      %cst_38 = arith.constant dense<0.000000e+00> : vector<32x128xf32>
      %50 = tpu.matmul %49, %17, %cst_38 {dimension_numbers = #tpu.dot_dimension_numbers<[1], [0], [0], [1], [0, 0, 1, 1], [], []>} : vector<32x128xbf16>, vector<128x128xbf16>, vector<32x128xf32> -> vector<32x128xf32>
      %51 = arith.truncf %50 : vector<32x128xf32> to vector<32x128xbf16>
      %c0_39 = arith.constant 0 : index
      %c768 = arith.constant 768 : index
      %52 = vector.load %arg14[%c0_39, %c768] : memref<32x1152xbf16, #tpu.memory_space<vmem>>, vector<32x128xbf16>
      tpu.vector_store %arg14[%c0_39, %c768], %51 {strides = array<i32>} : memref<32x1152xbf16, #tpu.memory_space<vmem>>, vector<32x128xbf16>,
      %c7 = arith.constant 7 : index
      %c0_40 = arith.constant 0 : index
      %c0_41 = arith.constant 0 : index
      %53 = vector.load %arg4[%c7, %c0_40, %c0_41] : memref<9x32x128xbf16, #tpu.memory_space<vmem>>, vector<1x32x128xbf16>
      %54 = vector.shape_cast %53 : vector<1x32x128xbf16> to vector<32x128xbf16>
      %cst_42 = arith.constant dense<0.000000e+00> : vector<32x128xf32>
      %55 = tpu.matmul %54, %17, %cst_42 {dimension_numbers = #tpu.dot_dimension_numbers<[1], [0], [0], [1], [0, 0, 1, 1], [], []>} : vector<32x128xbf16>, vector<128x128xbf16>, vector<32x128xf32> -> vector<32x128xf32>
      %56 = arith.truncf %55 : vector<32x128xf32> to vector<32x128xbf16>
      %c0_43 = arith.constant 0 : index
      %c896 = arith.constant 896 : index
      %57 = vector.load %arg14[%c0_43, %c896] : memref<32x1152xbf16, #tpu.memory_space<vmem>>, vector<32x128xbf16>
      tpu.vector_store %arg14[%c0_43, %c896], %56 {strides = array<i32>} : memref<32x1152xbf16, #tpu.memory_space<vmem>>, vector<32x128xbf16>,
      %c8 = arith.constant 8 : index
      %c0_44 = arith.constant 0 : index
      %c0_45 = arith.constant 0 : index
      %58 = vector.load %arg4[%c8, %c0_44, %c0_45] : memref<9x32x128xbf16, #tpu.memory_space<vmem>>, vector<1x32x128xbf16>
      %59 = vector.shape_cast %58 : vector<1x32x128xbf16> to vector<32x128xbf16>
      %cst_46 = arith.constant dense<0.000000e+00> : vector<32x128xf32>
      %60 = tpu.matmul %59, %17, %cst_46 {dimension_numbers = #tpu.dot_dimension_numbers<[1], [0], [0], [1], [0, 0, 1, 1], [], []>} : vector<32x128xbf16>, vector<128x128xbf16>, vector<32x128xf32> -> vector<32x128xf32>
      %61 = arith.truncf %60 : vector<32x128xf32> to vector<32x128xbf16>
      %c0_47 = arith.constant 0 : index
      %c1024 = arith.constant 1024 : index
      %62 = vector.load %arg14[%c0_47, %c1024] : memref<32x1152xbf16, #tpu.memory_space<vmem>>, vector<32x128xbf16>
      tpu.vector_store %arg14[%c0_47, %c1024], %61 {strides = array<i32>} : memref<32x1152xbf16, #tpu.memory_space<vmem>>, vector<32x128xbf16>,
      %c0_48 = arith.constant 0 : index
      %c0_49 = arith.constant 0 : index
      %63 = vector.load %arg14[%c0_48, %c0_49] : memref<32x1152xbf16, #tpu.memory_space<vmem>>, vector<32x1152xbf16>
      %c0_50 = arith.constant 0 : index
      %c0_51 = arith.constant 0 : index
      %64 = vector.load %arg5[%c0_50, %c0_51] : memref<1152x512xbf16, #tpu.memory_space<vmem>>, vector<1152x512xbf16>
      %cst_52 = arith.constant dense<0.000000e+00> : vector<32x512xf32>
      %65 = tpu.matmul %63, %64, %cst_52 {dimension_numbers = #tpu.dot_dimension_numbers<[1], [0], [0], [1], [0, 0, 1, 1], [], []>} : vector<32x1152xbf16>, vector<1152x512xbf16>, vector<32x512xf32> -> vector<32x512xf32>
      %c0_53 = arith.constant 0 : index
      %c0_54 = arith.constant 0 : index
      %66 = vector.load %arg6[%c0_53, %c0_54] : memref<1x512xf32, #tpu.memory_space<vmem>>, vector<1x512xf32>
      %67 = vector.broadcast %66 : vector<1x512xf32> to vector<32x512xf32>
      %68 = arith.addf %65, %67 : vector<32x512xf32>
      %cst_55 = arith.constant 0.000000e+00 : f32
      %69 = vector.broadcast %cst_55 : f32 to vector<32x512xf32>
      %70 = arith.maximumf %68, %69 : vector<32x512xf32>
      %c0_56 = arith.constant 0 : index
      %c0_57 = arith.constant 0 : index
      %71 = vector.load %arg15[%c0_56, %c0_57] : memref<32x512xf32, #tpu.memory_space<vmem>>, vector<32x512xf32>
      tpu.vector_store %arg15[%c0_56, %c0_57], %70 {strides = array<i32>} : memref<32x512xf32, #tpu.memory_space<vmem>>, vector<32x512xf32>,
    } else {
    }
    %c5_i32 = arith.constant 5 : i32
    %3 = arith.cmpi slt, %arg0, %c5_i32 : i32
    %4 = arith.extui %3 : i1 to i32
    %c0_i32_1 = arith.constant 0 : i32
    %5 = arith.cmpi ne, %4, %c0_i32_1 : i32
    scf.if %5 {
      %c0 = arith.constant 0 : index
      %c0_4 = arith.constant 0 : index
      %9 = vector.load %arg15[%c0, %c0_4] : memref<32x512xf32, #tpu.memory_space<vmem>>, vector<32x512xf32>
      %10 = arith.truncf %9 : vector<32x512xf32> to vector<32x512xbf16>
      %c0_5 = arith.constant 0 : index
      %c0_6 = arith.constant 0 : index
      %c0_7 = arith.constant 0 : index
      %11 = vector.load %arg7[%c0_5, %c0_6, %c0_7] : memref<1x512x512xbf16, #tpu.memory_space<vmem>>, vector<1x512x512xbf16>
      %12 = vector.shape_cast %11 : vector<1x512x512xbf16> to vector<512x512xbf16>
      %cst = arith.constant dense<0.000000e+00> : vector<32x512xf32>
      %13 = tpu.matmul %10, %12, %cst {dimension_numbers = #tpu.dot_dimension_numbers<[1], [0], [0], [1], [0, 0, 1, 1], [], []>} : vector<32x512xbf16>, vector<512x512xbf16>, vector<32x512xf32> -> vector<32x512xf32>
      %c0_8 = arith.constant 0 : index
      %c0_9 = arith.constant 0 : index
      %c0_10 = arith.constant 0 : index
      %14 = vector.load %arg8[%c0_8, %c0_9, %c0_10] : memref<1x1x512xf32, #tpu.memory_space<vmem>>, vector<1x1x512xf32>
      %15 = vector.shape_cast %14 : vector<1x1x512xf32> to vector<1x512xf32>
      %16 = vector.broadcast %15 : vector<1x512xf32> to vector<32x512xf32>
      %17 = arith.addf %13, %16 : vector<32x512xf32>
      %cst_11 = arith.constant 0.000000e+00 : f32
      %18 = vector.broadcast %cst_11 : f32 to vector<32x512xf32>
      %19 = arith.subf %18, %17 : vector<32x512xf32>
      %20 = math.exp %19 : vector<32x512xf32>
      %cst_12 = arith.constant 1.000000e+00 : f32
      %21 = vector.broadcast %cst_12 : f32 to vector<32x512xf32>
      %22 = arith.addf %21, %20 : vector<32x512xf32>
      %23 = tpu.reciprocal %22 {approx = true} : vector<32x512xf32> -> vector<32x512xf32>
      %c32_i32 = arith.constant 32 : i32
      %24 = arith.muli %arg0, %c32_i32 : i32
      %25 = tpu.assume_multiple %24, 32 : i32
      %26 = arith.mulf %23, %9 : vector<32x512xf32>
      %27 = arith.index_cast %25 : i32 to index
      %c0_13 = arith.constant 0 : index
      %28 = vector.load %arg16[%27, %c0_13] : memref<192x512xf32, #tpu.memory_space<vmem>>, vector<32x512xf32>
      tpu.vector_store %arg16[%27, %c0_13], %26 {strides = array<i32>} : memref<192x512xf32, #tpu.memory_space<vmem>>, vector<32x512xf32>,
      %cst_14 = arith.constant 1.000000e+00 : f32
      %29 = vector.broadcast %cst_14 : f32 to vector<32x512xf32>
      %30 = arith.subf %29, %23 : vector<32x512xf32>
      %31 = arith.mulf %30, %9 : vector<32x512xf32>
      %c0_15 = arith.constant 0 : index
      %c0_16 = arith.constant 0 : index
      %32 = vector.load %arg15[%c0_15, %c0_16] : memref<32x512xf32, #tpu.memory_space<vmem>>, vector<32x512xf32>
      tpu.vector_store %arg15[%c0_15, %c0_16], %31 {strides = array<i32>} : memref<32x512xf32, #tpu.memory_space<vmem>>, vector<32x512xf32>,
    } else {
    }
    %c5_i32_2 = arith.constant 5 : i32
    %6 = arith.cmpi eq, %arg0, %c5_i32_2 : i32
    %7 = arith.extui %6 : i1 to i32
    %c0_i32_3 = arith.constant 0 : i32
    %8 = arith.cmpi ne, %7, %c0_i32_3 : i32
    scf.if %8 {
      %c0 = arith.constant 0 : index
      %c0_4 = arith.constant 0 : index
      %9 = vector.load %arg15[%c0, %c0_4] : memref<32x512xf32, #tpu.memory_space<vmem>>, vector<32x512xf32>
      %c160 = arith.constant 160 : index
      %c0_5 = arith.constant 0 : index
      %10 = vector.load %arg16[%c160, %c0_5] : memref<192x512xf32, #tpu.memory_space<vmem>>, vector<32x512xf32>
      tpu.vector_store %arg16[%c160, %c0_5], %9 {strides = array<i32>} : memref<192x512xf32, #tpu.memory_space<vmem>>, vector<32x512xf32>,
      %c0_6 = arith.constant 0 : index
      %c0_7 = arith.constant 0 : index
      %11 = vector.load %arg9[%c0_6, %c0_7] : memref<12x192xf32, #tpu.memory_space<vmem>>, vector<12x192xf32>
      %c0_8 = arith.constant 0 : index
      %c0_9 = arith.constant 0 : index
      %12 = vector.load %arg16[%c0_8, %c0_9] : memref<192x512xf32, #tpu.memory_space<vmem>>, vector<192x512xf32>
      %cst = arith.constant dense<0.000000e+00> : vector<12x512xf32>
      %13 = tpu.matmul %11, %12, %cst {dimension_numbers = #tpu.dot_dimension_numbers<[1], [0], [0], [1], [0, 0, 1, 1], [], []>} : vector<12x192xf32>, vector<192x512xf32>, vector<12x512xf32> -> vector<12x512xf32>
      %14 = arith.truncf %13 : vector<12x512xf32> to vector<12x512xbf16>
      %c0_10 = arith.constant 0 : index
      %c0_11 = arith.constant 0 : index
      %c0_12 = arith.constant 0 : index
      %15 = vector.load %arg7[%c0_10, %c0_11, %c0_12] : memref<1x512x512xbf16, #tpu.memory_space<vmem>>, vector<1x512x512xbf16>
      %16 = vector.shape_cast %15 : vector<1x512x512xbf16> to vector<512x512xbf16>
      %cst_13 = arith.constant dense<0.000000e+00> : vector<12x512xf32>
      %17 = tpu.matmul %14, %16, %cst_13 {dimension_numbers = #tpu.dot_dimension_numbers<[1], [0], [0], [1], [0, 0, 1, 1], [], []>} : vector<12x512xbf16>, vector<512x512xbf16>, vector<12x512xf32> -> vector<12x512xf32>
      %c0_14 = arith.constant 0 : index
      %c0_15 = arith.constant 0 : index
      %c0_16 = arith.constant 0 : index
      %18 = vector.load %arg8[%c0_14, %c0_15, %c0_16] : memref<1x1x512xf32, #tpu.memory_space<vmem>>, vector<1x1x512xf32>
      %19 = vector.shape_cast %18 : vector<1x1x512xf32> to vector<1x512xf32>
      %20 = vector.broadcast %19 : vector<1x512xf32> to vector<12x512xf32>
      %21 = arith.addf %17, %20 : vector<12x512xf32>
      %22 = tpu.iota {dimensions = array<i32: 0>} : vector<12x1xi32>
      %c10_i32 = arith.constant 10 : i32
      %23 = vector.broadcast %c10_i32 : i32 to vector<12x1xi32>
      %24 = arith.cmpi sge, %22, %23 : vector<12x1xi32>
      %25 = vector.shape_cast %24 : vector<12x1xi1> to vector<12x1xi1>
      %26 = vector.broadcast %25 : vector<12x1xi1> to vector<12x512xi1>
      %27 = arith.select %26, %21, %13 : vector<12x512xi1>, vector<12x512xf32>
      %c0_17 = arith.constant 0 : index
      %c0_18 = arith.constant 0 : index
      %28 = vector.load %arg12[%c0_17, %c0_18] : memref<12x512xf32, #tpu.memory_space<vmem>>, vector<12x512xf32>
      tpu.vector_store %arg12[%c0_17, %c0_18], %27 {strides = array<i32>} : memref<12x512xf32, #tpu.memory_space<vmem>>, vector<12x512xf32>,
      %29 = arith.truncf %27 : vector<12x512xf32> to vector<12x512xbf16>
      %c0_19 = arith.constant 0 : index
      %c0_20 = arith.constant 0 : index
      %30 = vector.load %arg10[%c0_19, %c0_20] : memref<512x128xbf16, #tpu.memory_space<vmem>>, vector<512x128xbf16>
      %cst_21 = arith.constant dense<0.000000e+00> : vector<12x128xf32>
      %31 = tpu.matmul %29, %30, %cst_21 {dimension_numbers = #tpu.dot_dimension_numbers<[1], [0], [0], [1], [0, 0, 1, 1], [], []>} : vector<12x512xbf16>, vector<512x128xbf16>, vector<12x128xf32> -> vector<12x128xf32>
      %c0_22 = arith.constant 0 : index
      %c0_23 = arith.constant 0 : index
      %32 = vector.load %arg11[%c0_22, %c0_23] : memref<1x128xf32, #tpu.memory_space<vmem>>, vector<1x128xf32>
      %33 = vector.broadcast %32 : vector<1x128xf32> to vector<12x128xf32>
      %34 = arith.addf %31, %33 : vector<12x128xf32>
      %c0_24 = arith.constant 0 : index
      %c0_25 = arith.constant 0 : index
      %35 = vector.load %arg13[%c0_24, %c0_25] : memref<12x128xf32, #tpu.memory_space<vmem>>, vector<12x128xf32>
      tpu.vector_store %arg13[%c0_24, %c0_25], %34 {strides = array<i32>} : memref<12x128xf32, #tpu.memory_space<vmem>>, vector<12x128xf32>,
    } else {
    }
    return
  }
  func.func @transform_0(%arg0: i32) -> (i32, i32) {
    %c0_i32 = arith.constant 0 : i32
    %c0_i32_0 = arith.constant 0 : i32
    %c0_i32_1 = arith.constant 0 : i32
    return %c0_i32, %c0_i32_0 : i32, i32
  }
  func.func @transform_1(%arg0: i32) -> (i32, i32) {
    %c0_i32 = arith.constant 0 : i32
    %c0_i32_0 = arith.constant 0 : i32
    %c0_i32_1 = arith.constant 0 : i32
    return %c0_i32, %c0_i32_0 : i32, i32
  }
  func.func @transform_2(%arg0: i32) -> (i32, i32) {
    %c0_i32 = arith.constant 0 : i32
    %c0_i32_0 = arith.constant 0 : i32
    %c0_i32_1 = arith.constant 0 : i32
    return %c0_i32, %c0_i32_0 : i32, i32
  }
  func.func @transform_3(%arg0: i32) -> (i32, i32, i32) {
    %c0_i32 = arith.constant 0 : i32
    %c0_i32_0 = arith.constant 0 : i32
    %c0_i32_1 = arith.constant 0 : i32
    %c0_i32_2 = arith.constant 0 : i32
    return %c0_i32, %c0_i32_0, %c0_i32_1 : i32, i32, i32
  }
  func.func @transform_4(%arg0: i32) -> (i32, i32) {
    %c0_i32 = arith.constant 0 : i32
    %c0_i32_0 = arith.constant 0 : i32
    %c0_i32_1 = arith.constant 0 : i32
    return %c0_i32, %c0_i32_0 : i32, i32
  }
  func.func @transform_5(%arg0: i32) -> (i32, i32) {
    %c0_i32 = arith.constant 0 : i32
    %c0_i32_0 = arith.constant 0 : i32
    %c0_i32_1 = arith.constant 0 : i32
    return %c0_i32, %c0_i32_0 : i32, i32
  }
  func.func @transform_6(%arg0: i32) -> (i32, i32, i32) {
    %c0_i32 = arith.constant 0 : i32
    %c0_i32_0 = arith.constant 0 : i32
    %c0_i32_1 = arith.constant 0 : i32
    return %arg0, %c0_i32, %c0_i32_0 : i32, i32, i32
  }
  func.func @transform_7(%arg0: i32) -> (i32, i32, i32) {
    %c0_i32 = arith.constant 0 : i32
    %c0_i32_0 = arith.constant 0 : i32
    %c0_i32_1 = arith.constant 0 : i32
    return %arg0, %c0_i32, %c0_i32_0 : i32, i32, i32
  }
  func.func @transform_8(%arg0: i32) -> (i32, i32) {
    %c0_i32 = arith.constant 0 : i32
    %c0_i32_0 = arith.constant 0 : i32
    %c0_i32_1 = arith.constant 0 : i32
    return %c0_i32, %c0_i32_0 : i32, i32
  }
  func.func @transform_9(%arg0: i32) -> (i32, i32) {
    %c0_i32 = arith.constant 0 : i32
    %c0_i32_0 = arith.constant 0 : i32
    %c0_i32_1 = arith.constant 0 : i32
    return %c0_i32, %c0_i32_0 : i32, i32
  }
  func.func @transform_10(%arg0: i32) -> (i32, i32) {
    %c0_i32 = arith.constant 0 : i32
    %c0_i32_0 = arith.constant 0 : i32
    %c0_i32_1 = arith.constant 0 : i32
    return %c0_i32, %c0_i32_0 : i32, i32
  }
  func.func @transform_11(%arg0: i32) -> (i32, i32) {
    %c0_i32 = arith.constant 0 : i32
    %c0_i32_0 = arith.constant 0 : i32
    %c0_i32_1 = arith.constant 0 : i32
    return %c0_i32, %c0_i32_0 : i32, i32
  }
  func.func @transform_12(%arg0: i32) -> (i32, i32) {
    %c0_i32 = arith.constant 0 : i32
    %c0_i32_0 = arith.constant 0 : i32
    %c0_i32_1 = arith.constant 0 : i32
    return %c0_i32, %c0_i32_0 : i32, i32
  }
}

</mosaic_0001>

<bundles_post_ra>
// kernel: mtlface_forward.1
= control target key start
LH: loop header
LB: loop body
LE: loop exit
PB: predicated region body
PF: predicated region fallthrough
CT: control target
= control target key end

     0   :  { %s10571_s0 = inlined_call_operand.vmem [shape: bf16[128,32], index: 0, kind: input, shape index: {}]   ;;  %s10572_s1 = inlined_call_operand.hbm [shape: bf16[32,128], index: 1, kind: input, shape index: {}]   ;;  %s10573_s2 = inlined_call_operand.hbm [shape: f32[1,128], index: 2, kind: input, shape index: {}]   ;;  %s10574_s3 = inlined_call_operand.hbm [shape: bf16[9,32,128], index: 3, kind: input, shape index: {}]   ;;  %s10575_s4 = inlined_call_operand.hbm [shape: bf16[1152,512], index: 4, kind: input, shape index: {}]   ;;  %s10576_s5 = inlined_call_operand.hbm [shape: f32[1,512], index: 5, kind: input, shape index: {}]   ;;  %s10577_s6 = inlined_call_operand.hbm [shape: bf16[6,512,512], index: 6, kind: input, shape index: {}]   ;;  %s10578_s7 = inlined_call_operand.hbm [shape: f32[6,1,512], index: 7, kind: input, shape index: {}]   ;;  %s10579_s8 = inlined_call_operand.hbm [shape: f32[12,192], index: 8, kind: input, shape index: {}]   ;;  %s10580_s9 = inlined_call_operand.hbm [shape: bf16[512,128], index: 9, kind: input, shape index: {}]   ;;  %s10581_s10 = inlined_call_operand.hbm [shape: f32[1,128], index: 10, kind: input, shape index: {}]   ;;  %s10582_s11 = inlined_call_operand.vmem [shape: f32[12,512], index: 11, kind: output, shape index: {0}]   ;;  %s10583_s12 = inlined_call_operand.vmem [shape: f32[12,128], index: 12, kind: output, shape index: {1}]  }
   0x1   :  { %10602 = sst [smem:[#allocation30_spill]] %s10571_s0 }
   0x2   :  { %10603 = sst [smem:[#allocation31_spill]] %s10573_s2 }
   0x3   :  { %10604 = sst [smem:[#allocation32_spill]] %s10575_s4 }
   0x4   :  { %10605 = sst [smem:[#allocation33_spill]] %s10577_s6 }
   0x5   :  { %10606 = sst [smem:[#allocation34_spill]] %s10579_s8 }
   0x6   :  { %10607 = sst [smem:[#allocation35_spill]] %s10582_s11 }
   0x7   :  { %10608 = sst [smem:[#allocation36_spill]] %s10583_s12 }
   0x8   :  { %18 = vsyncpa [#allocation6], 0 }
   0x9   :  { %19 = vsyncpa [#allocation8], 0 }
   0xa   :  { %20 = vsyncpa [#allocation11], 0 }
   0xb   :  { %21 = vsyncpa [#allocation14], 0 }
   0xc   :  { %23 = vsyncpa [#allocation14 + $0x1], 0 }
   0xd   :  { %24 = vsyncpa [#allocation17], 0 }
   0xe   :  { %25 = vsyncpa [#allocation20], 0  ;;  %s9444_s21 = smov 0   ;;  %s9446_s22 = smov 0  }
   0xf   :  { %s9448_s23 = smov 0   ;;  %s9450_s24 = smov 0  }
  0x10 LB: > { %s9364_s25 = smov [#allocation7]   ;;  %s9465_s27 = sadd.s32 4294967295, %s9362_s24   ;;  %s9362_s24 = sphi %s9450_s24, %s10646_s24   ;;  %s9358_s23 = sphi %s9448_s23, %s10650_s23   ;;  %s9354_s22 = sphi %s9446_s22, %s10649_s22   ;;  %s9350_s21 = sphi %s9444_s21, %s10648_s21  }
  0x11   : > { %s348_s26 = sshll.u32 %s9364_s25, 4  ;;  %p6734_p0 = scmp.ge.s32.totalorder %s9362_s24, 1  ;;  %s349_s26 = int_to_ptr.vmem [resolvable:$true] %s348_s26 }
  0x12   : > { %p10584_p1 = scmp.eq.s32.totalorder %s9465_s27, 0  ;;  %p319_p2 = scmp.lt.s32.totalorder %s9362_s24, 7 }
  0x13   : > { %s9365_s29 = smov [#allocation10]   ;;  %s9366_s14 = smov [#allocation16]  }
  0x14   : > { %p9471_p4 = pnand %p6734_p0, %p319_p2  ;;  %s371_s30 = sshll.u32 %s9365_s29, 4  ;;  %s9477_s30 = int_to_ptr.vmem [resolvable:$true] %s371_s30 }
  0x15   : > { %s395_s15 = sshll.u32 %s9366_s14, 4  ;;  %s10611_s2 = sld [smem:[#allocation31_spill]]  ;;  %s9485_s15 = int_to_ptr.vmem [resolvable:$true] %s395_s15 }
  0x16   : > { %s10609_s28 = scalar_select %p9471_p4, 1, 0 }
  0x17   : > { %p7990_p5 = pneg %p9471_p4 }
  0x19   : > { %p9481_p6 = pnand %p7990_p5, %p10584_p1 }
  0x1b   : > { %s10610_s13 = scalar_select %p9481_p6, 1, 0 }
  0x1c   : > { %s9024_s18 = scalar_lea.hbm %s10611_s2, 16  ;;  %p9495_p8 = pneg %p9481_p6 }
  0x1d   : > { %p9025_p7 = scmp.ne.s32.totalorder %s10611_s2, %s9024_s18  ;;  %p9031_p11 = scmp.lt.u32.totalorder %s9024_s18, %s10611_s2 }
  0x1f   : > { %p9027_p9 = pnand %p9495_p8, %p9025_p7 }
  0x21   : > { %p9028_p10 = pneg %p9027_p9 }
  0x23   : > { %p9033_p12 = pnand %p9031_p11, %p9028_p10 }
  0x25   : > { %9036 = shalt.err (!%p9033_p12)
}
  0x26   : > { %s9037_s16 = scalar_lea.vmem %s349_s26, 16  ;;  %s9044_s17 = scalar_lea.vmem %s349_s26, 32 }
  0x27   : > { %p9038_p13 = scmp.ne.s32.totalorder %s349_s26, %s9037_s16  ;;  %p9045_p5 = scmp.lt.s32.totalorder %s349_s26, %s349_s26 }
  0x28   : > { %p9046_p3 = scmp.lt.s32.totalorder %s9044_s17, %s9037_s16 }
  0x29   : > { %p9040_p0 = pnand %p9038_p13, %p9495_p8 }
  0x2a   : > { %p9047_p1 = por %p9046_p3, %p9045_p5 }
  0x2b   : > { %p9041_p2 = pneg %p9040_p0 }
  0x2d   : > { %p9048_p4 = pnand %p9047_p1, %p9041_p2 }
  0x2f   : > { %9051 = shalt.err (!%p9048_p4)
}
  0x30   : > { %7996 = dma.hbm_to_vmem [thread:$0]  (!%p9481_p6), %s10611_s2, 16, %s349_s26, [#allocation8]  }
  0x31   : > { %s10613_s4 = sld [smem:[#allocation32_spill]] }
  0x37   : > { %s9052_s14 = scalar_lea.hbm %s10613_s4, 36864 }
  0x38   : > { %p9053_p7 = scmp.ne.s32.totalorder %s10613_s4, %s9052_s14  ;;  %p9059_p1 = scmp.lt.u32.totalorder %s9052_s14, %s10613_s4 }
  0x3a   : > { %p9055_p9 = pnand %p9053_p7, %p9495_p8 }
  0x3c   : > { %p9056_p3 = pneg %p9055_p9 }
  0x3e   : > { %p9061_p4 = pnand %p9059_p1, %p9056_p3 }
  0x40   : > { %9064 = shalt.err (!%p9061_p4)
}
  0x41   : > { %s9065_s26 = scalar_lea.vmem %s9477_s30, 36864  ;;  %p9073_p13 = scmp.lt.s32.totalorder %s9477_s30, %s9477_s30 }
  0x42   : > { %p9066_p10 = scmp.ne.s32.totalorder %s9477_s30, %s9065_s26  ;;  %p9074_p0 = scmp.lt.s32.totalorder %s9065_s26, %s9065_s26 }
  0x44   : > { %p9068_p11 = pnand %p9066_p10, %p9495_p8  ;;  %p9075_p2 = por %p9074_p0, %p9073_p13 }
  0x46   : > { %p9069_p12 = pneg %p9068_p11 }
  0x48   : > { %p9076_p5 = pnand %p9075_p2, %p9069_p12 }
  0x4a   : > { %9079 = shalt.err (!%p9076_p5)
}
  0x4b   : > { %s10588_s11 = smov 256   ;;  %s10590_s12 = smov 16  }
  0x4c   : > { %8002 = dma.hbm_to_vmem [thread:$0]  (!%p9481_p6), %s10613_s4, 36864, %s9477_s30, [#allocation11], %s10588_s11, %s10588_s11, %s10590_s12  }
  0x4d   : > { %s10614_s8 = sld [smem:[#allocation34_spill]] }
  0x53   : > { %s9080_s14 = scalar_lea.hbm %s10614_s8, 512 }
  0x54   : > { %p9081_p7 = scmp.ne.s32.totalorder %s10614_s8, %s9080_s14  ;;  %p9087_p1 = scmp.lt.u32.totalorder %s9080_s14, %s10614_s8 }
  0x56   : > { %p9083_p9 = pnand %p9081_p7, %p9495_p8 }
  0x58   : > { %p9084_p3 = pneg %p9083_p9 }
  0x5a   : > { %p9089_p4 = pnand %p9087_p1, %p9084_p3 }
  0x5c   : > { %9092 = shalt.err (!%p9089_p4)
}
  0x5d   : > { %s9093_s30 = scalar_lea.vmem %s9485_s15, 512  ;;  %p9101_p13 = scmp.lt.s32.totalorder %s9485_s15, %s9485_s15 }
  0x5e   : > { %p9094_p10 = scmp.ne.s32.totalorder %s9485_s15, %s9093_s30  ;;  %p9102_p0 = scmp.lt.s32.totalorder %s9093_s30, %s9093_s30 }
  0x60   : > { %p9096_p11 = pnand %p9094_p10, %p9495_p8  ;;  %p9103_p2 = por %p9102_p0, %p9101_p13 }
  0x62   : > { %p9097_p12 = pneg %p9096_p11 }
  0x64   : > { %p9104_p5 = pnand %p9103_p2, %p9097_p12 }
  0x66   : > { %9107 = shalt.err (!%p9104_p5)
}
  0x67   : > { %8008 = dma.hbm_to_vmem [thread:$0]  (!%p9481_p6), %s10614_s8, 512, %s9485_s15, [#allocation17], %s10588_s11, %s10588_s11, %s10590_s12  }
  0x68   : > { %s9564_s20 = sadd.s32 1, %s9362_s24   ;;  %s164_s29 = sadd.s32 1, %s9358_s23 }
  0x69   : > { %10615 = sst [smem:[#allocation27_spill]] %s9564_s20  ;;  %s161_s18 = ssub.s32 %s9362_s24, %s9564_s20 }
  0x6a   : > { %p162_p7 = scmp.eq.s32.totalorder %s161_s18, 0  ;;  %p171_p9 = scmp.ne.s32.totalorder %s9358_s23, %s9354_s22 }
  0x6b   : > { %p172_p3 = scmp.eq.s32.totalorder %s9362_s24, 0  ;;  %p177_p1 = scmp.ne.s32.totalorder %s9354_s22, %s9350_s21 }
  0x6c   : > { %s9575_s14 = scalar_select %p162_p7, %s9358_s23, %s164_s29  }
  0x6d   : > { %p173_p4 = por %p172_p3, %p171_p9  ;;  %p10617_p10 = scmp.eq.s32.totalorder %s9465_s27, 0 }
  0x6e   : > { %10616 = sst [smem:[#allocation28_spill]] %s9575_s14  ;;  %p8030_p12 = scmp.lt.s32.totalorder %s9362_s24, 6 }
  0x6f   : > { %p9579_p11 = por %p10617_p10, %p177_p1  ;;  %s433_s17 = sand.u32 1, %s9362_s24  }
  0x70   : > { %s10589_s15 = sand.u32 1, %s9358_s23   ;;  %s7387_s30 = sshll.u32 %s9362_s24, 14 }
  0x71   : > { %s10618_s16 = scalar_select %p9579_p11, 1, 0 }
  0x72   : > { %s6744_s26 = sshll.u32 %s10589_s15, 10  ;;  %s10620_s6 = sld [smem:[#allocation33_spill]] }
  0x73   : > { %10619 = sst [smem:[#allocation29_spill]] %s10618_s16  ;;  %s437_s21 = scalar_lea.vmem [#allocation13], %s6744_s26 }
  0x74   : > { %s444_s29 = sshll.u32 %s437_s21, 4  ;;  %p9594_p13 = pnand %p8030_p12, %p173_p4  ;;  %s9598_s29 = int_to_ptr.vmem [resolvable:$true] %s444_s29 }
  0x75   : > { %s9369_s15 = smov [#allocation5]   ;;  %s9602_s2 = scalar_lea.sflag [#allocation14], %s433_s17 }
  0x76   : > { %s10621_s11 = scalar_select %p9594_p13, 1, 0 }
  0x77   : > { %s9600_s12 = sshll.u32 %s9369_s15, 4  ;;  %p10594_p2 = pneg %p9594_p13  ;;  %s335_s12 = int_to_ptr.vmem [resolvable:$true] %s9600_s12 }
  0x78   : > { %s9592_s18 = scalar_lea.hbm %s10620_s6, %s7387_s30  ;;  %s9113_s21 = scalar_lea.hbm %s10620_s6, 98304 }
  0x79   : > { %s9108_s30 = scalar_lea.hbm %s9592_s18, 16384  ;;  %p9114_p9 = scmp.lt.u32.totalorder %s9592_s18, %s10620_s6 }
  0x7a   : > { %p9109_p0 = scmp.ne.s32.totalorder %s9592_s18, %s9108_s30  ;;  %p9115_p3 = scmp.lt.u32.totalorder %s9113_s21, %s9108_s30 }
  0x7b   : > { %p9117_p4 = scmp.lt.u32.totalorder %s9108_s30, %s9592_s18 }
  0x7c   : > { %p9111_p5 = pnand %p10594_p2, %p9109_p0  ;;  %p9116_p1 = por %p9115_p3, %p9114_p9 }
  0x7e   : > { %p9112_p7 = pneg %p9111_p5  ;;  %p9118_p10 = por %p9117_p4, %p9116_p1 }
  0x80   : > { %p9119_p12 = pnand %p9118_p10, %p9112_p7 }
  0x82   : > { %9122 = shalt.err (!%p9119_p12)
}
  0x83   : > { %s9123_s17 = scalar_lea.vmem %s9598_s29, 16384  ;;  %s9370_s15 = smov [#allocation13]  }
  0x84   : > { %p9124_p0 = scmp.ne.s32.totalorder %s9598_s29, %s9123_s17  ;;  %s9128_s26 = sshll.u32 %s9370_s15, 4  ;;  %s9129_s26 = int_to_ptr.vmem [resolvable:$false] %s9128_s26 }
  0x85   : > { %s9130_s4 = scalar_lea.vmem %s9129_s26, 32768  ;;  %p9131_p6 = scmp.lt.s32.totalorder %s9598_s29, %s9129_s26 }
  0x86   : > { %p9126_p5 = pnand %p9124_p0, %p10594_p2  ;;  %p9132_p9 = scmp.lt.s32.totalorder %s9130_s4, %s9123_s17 }
  0x88   : > { %p9127_p11 = pneg %p9126_p5  ;;  %p9133_p3 = por %p9132_p9, %p9131_p6 }
  0x8a   : > { %p9134_p1 = pnand %p9133_p3, %p9127_p11 }
  0x8c   : > { %9137 = shalt.err (!%p9134_p1)
}
  0x8d   : > { %s10622_s8 = smov 16   ;;  %s10623_s30 = smov 256  }
  0x8e   : > { %8018 = dma.hbm_to_vmem [thread:$0]  (!%p9594_p13), %s9592_s18, 16384, %s9598_s29, %s9602_s2, %s10623_s30, %s10623_s30, %s10622_s8  }
  0x8f   : > { %s9138_s15 = scalar_lea.hbm %s10572_s1, 256 }
  0x90   : > { %p9139_p6 = scmp.ne.s32.totalorder %s10572_s1, %s9138_s15  ;;  %p9145_p4 = scmp.lt.u32.totalorder %s9138_s15, %s10572_s1 }
  0x92   : > { %p9141_p11 = pnand %p9139_p6, %p9495_p8 }
  0x94   : > { %p9142_p7 = pneg %p9141_p11 }
  0x96   : > { %p9147_p10 = pnand %p9145_p4, %p9142_p7 }
  0x98   : > { %9150 = shalt.err (!%p9147_p10)
}
  0x99   : > { %s9151_s14 = scalar_lea.vmem %s335_s12, 256  ;;  %p9159_p9 = scmp.lt.s32.totalorder %s335_s12, %s335_s12 }
  0x9a   : > { %p9152_p12 = scmp.ne.s32.totalorder %s335_s12, %s9151_s14  ;;  %p9160_p3 = scmp.lt.s32.totalorder %s9151_s14, %s9151_s14 }
  0x9c   : > { %p9154_p0 = pnand %p9152_p12, %p9495_p8  ;;  %p9161_p1 = por %p9160_p3, %p9159_p9 }
  0x9e   : > { %p9155_p5 = pneg %p9154_p0 }
  0xa0   : > { %p9162_p2 = pnand %p9161_p1, %p9155_p5 }
  0xa2   : > { %9165 = shalt.err (!%p9162_p2)
}
  0xa3   : > { %s9371_s18 = smov 64   ;;  %s9372_s29 = smov 4  }
  0xa4   : > { %p10624_p6 = scmp.ne.s32.totalorder %s10610_s13, 0  ;;  %s9373_s30 = smov [#allocation9]  }
  0xa5   : > { %s358_s19 = sshll.u32 %s9373_s30, 4  ;;  %s9374_s21 = smov [#allocation12]   ;;  %s359_s19 = int_to_ptr.vmem [resolvable:$true] %s358_s19 }
  0xa6   : > { %7993 = dma.hbm_to_vmem [thread:$0]  (!%p10624_p6), %s10572_s1, 256, %s335_s12, [#allocation6], %s9371_s18, %s9371_s18, %s9372_s29  }
  0xa7   : > { %s385_s14 = sshll.u32 %s9374_s21, 4  ;;  %s9166_s26 = scalar_lea.hbm %s10574_s3, 2304  ;;  %s386_s14 = int_to_ptr.vmem [resolvable:$true] %s385_s14 }
  0xa8   : > { %p9167_p2 = scmp.ne.s32.totalorder %s10574_s3, %s9166_s26  ;;  %p9173_p4 = scmp.lt.u32.totalorder %s9166_s26, %s10574_s3 }
  0xaa   : > { %p9169_p11 = pnand %p9167_p2, %p9495_p8 }
  0xac   : > { %p9170_p7 = pneg %p9169_p11 }
  0xae   : > { %p9175_p10 = pnand %p9173_p4, %p9170_p7 }
  0xb0   : > { %9178 = shalt.err (!%p9175_p10)
}
  0xb1   : > { %s9179_s12 = scalar_lea.vmem %s359_s19, 2304  ;;  %p9187_p9 = scmp.lt.s32.totalorder %s359_s19, %s359_s19 }
  0xb2   : > { %p9180_p12 = scmp.ne.s32.totalorder %s359_s19, %s9179_s12  ;;  %p9188_p3 = scmp.lt.s32.totalorder %s9179_s12, %s9179_s12 }
  0xb4   : > { %p9182_p0 = pnand %p9180_p12, %p9495_p8  ;;  %p9189_p1 = por %p9188_p3, %p9187_p9 }
  0xb6   : > { %p9183_p5 = pneg %p9182_p0 }
  0xb8   : > { %p9190_p13 = pnand %p9189_p1, %p9183_p5 }
  0xba   : > { %9193 = shalt.err (!%p9190_p13)
}
  0xbb   : > { %7999 = dma.hbm_to_vmem [thread:$0]  (!%p10624_p6), %s10574_s3, 2304, %s359_s19, [#allocation8], %s9371_s18, %s9371_s18, %s9372_s29  }
  0xbc   : > { %s9194_s8 = scalar_lea.hbm %s10576_s5, 64 }
  0xbd   : > { %p9195_p2 = scmp.ne.s32.totalorder %s10576_s5, %s9194_s8  ;;  %p9201_p7 = scmp.lt.u32.totalorder %s9194_s8, %s10576_s5 }
  0xbf   : > { %p9197_p13 = pnand %p9195_p2, %p9495_p8 }
  0xc1   : > { %p9198_p11 = pneg %p9197_p13 }
  0xc3   : > { %p9203_p4 = pnand %p9201_p7, %p9198_p11 }
  0xc5   : > { %9206 = shalt.err (!%p9203_p4)
}
  0xc6   : > { %s9207_s26 = scalar_lea.vmem %s386_s14, 64  ;;  %p9215_p5 = scmp.lt.s32.totalorder %s386_s14, %s386_s14 }
  0xc7   : > { %p9208_p10 = scmp.ne.s32.totalorder %s386_s14, %s9207_s26  ;;  %p9216_p9 = scmp.lt.s32.totalorder %s9207_s26, %s9207_s26 }
  0xc9   : > { %p9210_p12 = pnand %p9208_p10, %p9495_p8  ;;  %p9217_p3 = por %p9216_p9, %p9215_p5 }
  0xcb   : > { %p9211_p0 = pneg %p9210_p12 }
  0xcd   : > { %p9218_p1 = pnand %p9217_p3, %p9211_p0 }
  0xcf   : > { %9221 = shalt.err (!%p9218_p1)
}
  0xd0   : > { %8005 = dma.hbm_to_vmem [thread:$0]  (!%p10624_p6), %s10576_s5, 64, %s386_s14, [#allocation11]  }
  0xd1   : > { %s9375_s12 = smov [#allocation18]   ;;  %s9376_s20 = smov [#allocation19]  }
  0xd2   : > { %s408_s0 = sshll.u32 %s9375_s12, 4  ;;  %s422_s16 = sshll.u32 %s9376_s20, 4  ;;  %s409_s0 = int_to_ptr.vmem [resolvable:$true] %s408_s0  ;;  %s423_s16 = int_to_ptr.vmem [resolvable:$true] %s422_s16 }
  0xd3   : > { %s9222_s30 = scalar_lea.hbm %s10580_s9, 4096 }
  0xd4   : > { %p9223_p2 = scmp.ne.s32.totalorder %s10580_s9, %s9222_s30  ;;  %p9229_p7 = scmp.lt.u32.totalorder %s9222_s30, %s10580_s9 }
  0xd6   : > { %p9225_p13 = pnand %p9223_p2, %p9495_p8 }
  0xd8   : > { %p9226_p11 = pneg %p9225_p13 }
  0xda   : > { %p9231_p4 = pnand %p9229_p7, %p9226_p11 }
  0xdc   : > { %9234 = shalt.err (!%p9231_p4)
}
  0xdd   : > { %s9235_s14 = scalar_lea.vmem %s409_s0, 4096  ;;  %p9243_p5 = scmp.lt.s32.totalorder %s409_s0, %s409_s0 }
  0xde   : > { %p9236_p10 = scmp.ne.s32.totalorder %s409_s0, %s9235_s14  ;;  %p9244_p9 = scmp.lt.s32.totalorder %s9235_s14, %s9235_s14 }
  0xe0   : > { %p9238_p12 = pnand %p9236_p10, %p9495_p8  ;;  %p9245_p3 = por %p9244_p9, %p9243_p5 }
  0xe2   : > { %p9239_p0 = pneg %p9238_p12 }
  0xe4   : > { %p9246_p1 = pnand %p9245_p3, %p9239_p0 }
  0xe6   : > { %9249 = shalt.err (!%p9246_p1)
}
  0xe7   : > { %8011 = dma.hbm_to_vmem [thread:$0]  (!%p10624_p6), %s10580_s9, 4096, %s409_s0, [#allocation17], %s9371_s18, %s9371_s18, %s9372_s29  }
  0xe8   : > { %s10625_s12 = sand.u32 1, %s9358_s23   ;;  %s9250_s30 = scalar_lea.hbm %s10581_s10, 16 }
  0xe9   : > { %s6747_s20 = sshll.u32 %s10625_s12, 2  ;;  %p9251_p2 = scmp.ne.s32.totalorder %s10581_s10, %s9250_s30 }
  0xea   : > { %p9257_p7 = scmp.lt.u32.totalorder %s9250_s30, %s10581_s10 }
  0xeb   : > { %p9253_p13 = pnand %p9251_p2, %p9495_p8 }
  0xed   : > { %p9254_p11 = pneg %p9253_p13 }
  0xef   : > { %p9259_p4 = pnand %p9257_p7, %p9254_p11 }
  0xf1   : > { %9262 = shalt.err (!%p9259_p4)
}
  0xf2   : > { %s9263_s18 = scalar_lea.vmem %s423_s16, 16  ;;  %s9270_s29 = scalar_lea.vmem %s423_s16, 32 }
  0xf3   : > { %p9264_p10 = scmp.ne.s32.totalorder %s423_s16, %s9263_s18  ;;  %p9271_p5 = scmp.lt.s32.totalorder %s423_s16, %s423_s16 }
  0xf4   : > { %p9272_p9 = scmp.lt.s32.totalorder %s9270_s29, %s9263_s18 }
  0xf5   : > { %p9266_p12 = pnand %p9264_p10, %p9495_p8 }
  0xf6   : > { %p9273_p3 = por %p9272_p9, %p9271_p5 }
  0xf7   : > { %p9267_p0 = pneg %p9266_p12 }
  0xf9   : > { %p9274_p1 = pnand %p9273_p3, %p9267_p0 }
  0xfb   : > { %9277 = shalt.err (!%p9274_p1)
}
  0xfc   : > { %8014 = dma.hbm_to_vmem [thread:$0]  (!%p10624_p6), %s10581_s10, 16, %s423_s16, [#allocation20]  }
  0xfd   : > { %s7388_s19 = sshll.u32 %s9362_s24, 6  ;;  %s458_s6 = scalar_lea.vmem [#allocation15], %s6747_s20 }
  0xfe   : > { %s9739_s25 = scalar_lea.hbm %s10578_s7, %s7388_s19  ;;  %s466_s8 = sshll.u32 %s458_s6, 4  ;;  %s467_s8 = int_to_ptr.vmem [resolvable:$true] %s466_s8 }
  0xff   : > { %s9278_s13 = scalar_lea.hbm %s9739_s25, 64  ;;  %p10626_p2 = scmp.ne.s32.totalorder %s10621_s11, 0 }
 0x100   : > { %p9279_p8 = scmp.ne.s32.totalorder %s9739_s25, %s9278_s13  ;;  %s9283_s30 = scalar_lea.hbm %s10578_s7, 384 }
 0x101   : > { %p10627_p13 = pneg %p10626_p2  ;;  %p9284_p6 = scmp.lt.u32.totalorder %s9739_s25, %s10578_s7 }
 0x102   : > { %p9285_p4 = scmp.lt.u32.totalorder %s9283_s30, %s9278_s13  ;;  %p9287_p12 = scmp.lt.u32.totalorder %s9278_s13, %s9739_s25 }
 0x103   : > { %p9281_p11 = pnand %p9279_p8, %p10627_p13 }
 0x104   : > { %p9286_p10 = por %p9285_p4, %p9284_p6 }
 0x105   : > { %p9282_p7 = pneg %p9281_p11 }
 0x106   : > { %p9288_p0 = por %p9287_p12, %p9286_p10 }
 0x108   : > { %p9289_p5 = pnand %p9288_p0, %p9282_p7 }
 0x10a   : > { %9292 = shalt.err (!%p9289_p5)
}
 0x10b   : > { %s9293_s20 = scalar_lea.vmem %s467_s8, 64  ;;  %p10628_p3 = pmov %p10627_p13 }
 0x10c   : > { %p9294_p9 = scmp.ne.s32.totalorder %s467_s8, %s9293_s20  ;;  %s9377_s17 = smov [#allocation15]  }
 0x10d   : > { %s9298_s26 = sshll.u32 %s9377_s17, 4  ;;  %s9299_s26 = int_to_ptr.vmem [resolvable:$false] %s9298_s26 }
 0x10e   : > { %p9296_p1 = pnand %p9294_p9, %p10628_p3  ;;  %s9300_s18 = scalar_lea.vmem %s9299_s26, 128 }
 0x10f   : > { %p9301_p13 = scmp.lt.s32.totalorder %s467_s8, %s9299_s26  ;;  %p9302_p11 = scmp.lt.s32.totalorder %s9300_s18, %s9293_s20 }
 0x110   : > { %p9297_p8 = pneg %p9296_p1 }
 0x111   : > { %p9303_p4 = por %p9302_p11, %p9301_p13 }
 0x113   : > { %p9304_p6 = pnand %p9303_p4, %p9297_p8 }
 0x115   : > { %9307 = shalt.err (!%p9304_p6)
}
 0x116   : > { %8021 = dma.hbm_to_vmem [thread:$0]  (!%p10626_p2), %s9739_s25, 64, %s467_s8, %s9602_s2  }
 0x117   : > { %p10629_p7 = scmp.ne.s32.totalorder %s10609_s28, 0 }
 0x118   : > { %p10630_p10 = scmp.eq.s32.totalorder (!%p10629_p7), %s9465_s27, 0 }
 0x119   : > { %475 = sbr.rel (%p10629_p7) target bundleno = 2434 (0x982), region = 64 }
 0x120   : > { %9325 = dma.done.wait (%p10630_p10), [#allocation6], 256   ;;  %p10631_p12 = pmov %p10630_p10 }
 0x121   : > { %p10632_p0 = pmov %p10630_p10 }
 0x122   : > { %9327 = vsyncadd (%p10631_p12), [#allocation6], 4294967040 }
 0x123   : > { %9329 = dma.done.wait (%p10632_p0), [#allocation8], 2320   ;;  %p10633_p5 = pmov %p10632_p0 }
 0x124   : > { %p10634_p9 = pmov %p10632_p0 }
 0x125   : > { %9331 = vsyncadd (%p10633_p5), [#allocation8], 4294964976 }
 0x126   : > { %9333 = dma.done.wait (%p10634_p9), [#allocation11], 36928   ;;  %p10635_p2 = pmov %p10632_p0 }
 0x127   : > { %s10636_s28 = sld [smem:[#allocation29_spill]]  ;;  %s497_s11 = sand.u32 1, %s9465_s27  }
 0x128   : > { %9335 = vsyncadd (%p10635_p2), [#allocation11], 4294930368  ;;  %s499_s2 = sand.u32 1, %s9354_s22   ;;  %s498_s0 = scalar_lea.sflag [#allocation14], %s497_s11 }
 0x129   : > { %s6756_s29 = sshll.u32 %s499_s2, 10 }
 0x12a   : > { %s9777_s14 = scalar_lea.vmem [#allocation13], %s6756_s29 }
 0x12d   : > { %p10637_p3 = scmp.ne.s32.totalorder %s10636_s28, 0 }
 0x12f   : > { %9337 = dma.done.wait (%p10637_p3), %s498_s0, 16448  }
 0x130   : > { %9339 = vsyncadd (%p10637_p3), %s498_s0, 4294950848  ;;  %s9783_s19 = sshll.u32 %s499_s2, 2  ;;  %p10638_p1 = pmov %p10632_p0 }
 0x131   : > { %s510_s4 = scalar_lea.vmem [#allocation15], %s9783_s19 }
 0x132   : > { %9341 = dma.done.wait (%p10638_p1), [#allocation17], 4608   ;;  %p10639_p8 = pmov %p10632_p0 }
 0x133   : > { %p10640_p13 = pmov %p10632_p0 }
 0x134   : > { %9343 = vsyncadd (%p10639_p8), [#allocation17], 4294962688 }
 0x135   : > { %9345 = dma.done.wait (%p10640_p13), [#allocation20], 16   ;;  %p10641_p11 = pmov %p10632_p0 }
 0x136   : > { %p10642_p4 = scmp.ne.s32.totalorder %s9465_s27, 0 }
 0x137   : > { %9347 = vsyncadd (%p10641_p11), [#allocation20], 4294967280  ;;  %v8084_v0 = vld [vmem:[#allocation5] sm:$0xff] (!%p10642_p4)   ;;  %v8085_v1 = vld [vmem:[#allocation5 + $0x8] sm:$0xff] (!%p10642_p4)   ;;  %vm647_vm0 = vcmask (!%p10642_p4), 261120   ;;  %s10643_s6 = sld [smem:[#allocation30_spill]] (!%p10642_p4) }
 0x138   : > { %567 = sbr.rel (%p10642_p4) target bundleno = 1246 (0x4de), region = 108  ;;  %7534 = vmatprep.subr.bf16.mxu0 (!%p10642_p4), %v8084_v0  ;;  %v8094_v10 = vld [vmem:[#allocation9] sm:$0xff] (!%p10642_p4)   ;;  %v8095_v11 = vld [vmem:[#allocation9 + $0x10] sm:$0xff] (!%p10642_p4)   ;;  %v9828_v12 = vld [vmem:[#allocation7] ss:$0 sm:$0xff] (!%p10642_p4) }
 0x139   : > { %7535 = vmatpush3.bf16.msra.mxu0 (!%p10642_p4), %v8084_v0  ;;  %7570 = vmatprep.mubr.bf16.mxu1 (!%p10642_p4), %v8094_v10  ;;  %v8101_v10 = vld [vmem:[#allocation9 + $0x38] sm:$0xff] (!%p10642_p4)  }
 0x13a   : > { %7536 = vmatprep.subr.bf16.mxu0 (!%p10642_p4), %v8085_v1 }
 0x13d   : > { %v8086_v2 = vld [vmem:[%s10643_s6] sm:$0xff] (!%p10642_p4)   ;;  %v8087_v3 = vld [vmem:[%s10643_s6 + $0x8] sm:$0xff] (!%p10642_p4)   ;;  %7537 = vmatpush3.bf16.msra.mxu0 (!%p10642_p4), %v8085_v1  ;;  %v8088_v4 = vld [vmem:[%s10643_s6 + $0x10] sm:$0xff] (!%p10642_p4)  }
 0x13e   : > { %7538 = vmatprep.mubr.msk.bf16.mxu0 (!%p10642_p4), %vm647_vm0, %v8086_v2  ;;  %v8089_v5 = vld [vmem:[%s10643_s6 + $0x18] sm:$0xff] (!%p10642_p4)   ;;  %v8090_v6 = vld [vmem:[%s10643_s6 + $0x20] sm:$0xff] (!%p10642_p4)   ;;  %v8091_v7 = vld [vmem:[%s10643_s6 + $0x28] sm:$0xff] (!%p10642_p4)  }
 0x13f   : > { %v8092_v8 = vld [vmem:[%s10643_s6 + $0x30] sm:$0xff]   ;;  %v8093_v9 = vld [vmem:[%s10643_s6 + $0x38] sm:$0xff]  }
 0x140   : > { %7539 = vmatmul.mubr.msk.bf16.vlgmr.msra.gmra.mrb[0].mxu0 %vm647_vm0, %v8087_v3 }
 0x141   : > { %7542 = vmatprep.mubr.msk.bf16.mxu0 %vm647_vm0, %v8088_v4 }
 0x148   : > { %7543 = vmatmul.mubr.msk.bf16.gmra.mrb[4].mxu0 %vm647_vm0, %v8089_v5  ;;  %v8096_v5 = vld [vmem:[#allocation9 + $0x8] sm:$0xff]  }
 0x149   : > { %7546 = vmatprep.mubr.msk.bf16.mxu0 %vm647_vm0, %v8090_v6  ;;  %v8097_v6 = vld [vmem:[#allocation9 + $0x18] sm:$0xff]  }
 0x150   : > { %7547 = vmatmul.mubr.msk.bf16.gmra.mrb[8].mxu0 %vm647_vm0, %v8091_v7  ;;  %v8098_v7 = vld [vmem:[#allocation9 + $0x20] sm:$0xff]  }
 0x151   : > { %7550 = vmatprep.mubr.msk.bf16.mxu0 %vm647_vm0, %v8092_v8  ;;  %v8099_v8 = vld [vmem:[#allocation9 + $0x30] sm:$0xff]  }
 0x158   : > { %7551 = vmatmul.mubr.msk.bf16.gmra.mrb[12].mxu0 %vm647_vm0, %v8093_v9  ;;  %v8100_v9 = vld [vmem:[#allocation9 + $0x28] sm:$0xff]  }
 0x159   : > { %7590 = vmatprep.mubr.bf16.mxu0 %v8095_v11  ;;  %v8102_v11 = vld [vmem:[#allocation9 + $0x40] sm:$0xff]  }
 0x213   : > { %v7540_v13 = vpop.f32.mrb[0].mxu0 }
 0x214   : > { %v715_v14 = vadd.f32 %v7540_v13, %v9828_v12  ;;  %v706_v15 = vpop.f32.mrb[1].mxu0  ;;  %v8104_v13 = vld [vmem:[#allocation9 + $0x48] sm:$0xff]  }
 0x215   : > { %v707_v16 = vadd.f32 %v9828_v12, %v706_v15  ;;  %v7541_v17 = vpop.f32.mrb[2].mxu0  ;;  %v8106_v15 = vld [vmem:[#allocation9 + $0x60] sm:$0xff]  }
 0x216   : > { %v718_v18 = vadd.f32 %v7541_v17, %v9828_v12  ;;  %v709_v19 = vpop.f32.mrb[3].mxu0  ;;  %v771_v21 = vmax.f32 %v715_v14, 0.0  ;;  %v8105_v14 = vld [vmem:[#allocation9 + $0x58] sm:$0xff]   ;;  %v8114_v17 = vld [vmem:[#allocation10 + $0x4] ss:$16 sps:$4 sm:$0xff]  }
 0x217   : > { %v710_v20 = vadd.f32 %v9828_v12, %v709_v19  ;;  %v769_v23 = vmax.f32 %v707_v16, 0.0  ;;  %v8108_v16 = vld [vmem:[#allocation9 + $0x70] sm:$0xff]   ;;  %v8110_v19 = vld [vmem:[#allocation9 + $0x78] sm:$0xff]  }
 0x218   : > { %v772_v22 = vmax.f32 %v718_v18, 0.0  ;;  %v8107_v18 = vld [vmem:[#allocation9 + $0x68] sm:$0xff]  }
 0x219   : > { %v770_v24 = vmax.f32 %v710_v20, 0.0  ;;  %v8109_v20 = vld [vmem:[#allocation9 + $0x80] sm:$0xff]  }
 0x21a   : > { %v9834_v25 = vpack.c.bf16 %v772_v22, %v771_v21  ;;  %v8112_v21 = vld [vmem:[#allocation10] ss:$16 sps:$4 sm:$0xff]   ;;  %v8120_v22 = vld [vmem:[#allocation10 + $0x24] ss:$16 sps:$4 sm:$0xff]  }
 0x21b   : > { %v9836_v26 = vpack.c.bf16 %v770_v24, %v769_v23  ;;  %v7544_v27 = vpop.f32.mrb[4].mxu0  ;;  %v8118_v23 = vld [vmem:[#allocation10 + $0x20] ss:$16 sps:$4 sm:$0xff]   ;;  %v8126_v24 = vld [vmem:[#allocation10 + $0x44] ss:$16 sps:$4 sm:$0xff]  }
 0x21c   : > { %v731_v28 = vadd.f32 %v7544_v27, %v9828_v12  ;;  %v722_v29 = vpop.f32.mrb[5].mxu0  ;;  %v8124_v27 = vld [vmem:[#allocation10 + $0x40] ss:$16 sps:$4 sm:$0xff]  }
 0x21d   : > { %v723_v30 = vadd.f32 %v9828_v12, %v722_v29  ;;  %v7545_v31 = vpop.f32.mrb[6].mxu0  ;;  %7554 = vmatprep.subr.bf16.mxu1 %v9836_v26  ;;  %7574 = vmatprep.subr.bf16.mxu0 %v9836_v26  ;;  %v8138_v29 = vld [vmem:[#allocation10 + $0x84] ss:$16 sps:$4 sm:$0xff]  }
 0x21e   : > { %v734_v32 = vadd.f32 %v7545_v31, %v9828_v12  ;;  %v725_v33 = vpop.f32.mrb[7].mxu0  ;;  %7555 = vmatpush3.bf16.msra.mxu1 %v9836_v26  ;;  %7575 = vmatpush3.bf16.msra.mxu0 %v9836_v26  ;;  %v775_v35 = vmax.f32 %v731_v28, 0.0  ;;  %v8132_v28 = vld [vmem:[#allocation10 + $0x64] ss:$16 sps:$4 sm:$0xff]   ;;  %v8142_v31 = vld [vmem:[#allocation10 + $0xa0] ss:$16 sps:$4 sm:$0xff]  }
 0x21f   : > { %v726_v34 = vadd.f32 %v9828_v12, %v725_v33  ;;  %7556 = vmatprep.subr.bf16.mxu1 %v9834_v25  ;;  %7576 = vmatprep.subr.bf16.mxu0 %v9834_v25  ;;  %v773_v37 = vmax.f32 %v723_v30, 0.0  ;;  %v8144_v30 = vld [vmem:[#allocation10 + $0xa4] ss:$16 sps:$4 sm:$0xff]   ;;  %v8148_v33 = vld [vmem:[#allocation10 + $0xc0] ss:$16 sps:$4 sm:$0xff]  }
 0x220   : > { %v776_v36 = vmax.f32 %v734_v32, 0.0  ;;  %v8150_v32 = vld [vmem:[#allocation10 + $0xc4] ss:$16 sps:$4 sm:$0xff]  }
 0x221   : > { %v774_v38 = vmax.f32 %v726_v34, 0.0  ;;  %v8156_v34 = vld [vmem:[#allocation10 + $0xe4] ss:$16 sps:$4 sm:$0xff]  }
 0x222   : > { %v9848_v39 = vpack.c.bf16 %v776_v36, %v775_v35  ;;  %7557 = vmatpush3.bf16.msra.mxu1 %v9834_v25  ;;  %7577 = vmatpush3.bf16.msra.mxu0 %v9834_v25  ;;  %v8117_v35 = vld [vmem:[#allocation10 + $0xc] ss:$16 sps:$4 sm:$0xff]   ;;  %v8154_v36 = vld [vmem:[#allocation10 + $0xe0] ss:$16 sps:$4 sm:$0xff]  }
 0x223   : > { %v9852_v40 = vpack.c.bf16 %v774_v38, %v773_v37  ;;  %v7548_v41 = vpop.f32.mrb[8].mxu0  ;;  %v8162_v37 = vld [vmem:[#allocation10 + $0x104] ss:$16 sps:$4 sm:$0xff]   ;;  %v8111_v38 = vld [vmem:[#allocation9 + $0x88] sm:$0xff]  }
 0x224   : > { %v747_v42 = vadd.f32 %v7548_v41, %v9828_v12  ;;  %v738_v43 = vpop.f32.mrb[9].mxu0  ;;  %v8160_v41 = vld [vmem:[#allocation10 + $0x100] ss:$16 sps:$4 sm:$0xff]  }
 0x225   : > { %v739_v44 = vadd.f32 %v9828_v12, %v738_v43  ;;  %v7549_v45 = vpop.f32.mrb[10].mxu0  ;;  %7558 = vmatprep.subr.bf16.mxu1 %v9852_v40  ;;  %7578 = vmatprep.subr.bf16.mxu0 %v9852_v40  ;;  %v8121_v43 = vld [vmem:[#allocation10 + $0x28] ss:$16 sps:$4 sm:$0xff]  }
 0x226   : > { %v750_v46 = vadd.f32 %v7549_v45, %v9828_v12  ;;  %v741_v47 = vpop.f32.mrb[11].mxu0  ;;  %7559 = vmatpush3.bf16.msra.mxu1 %v9852_v40  ;;  %7579 = vmatpush3.bf16.msra.mxu0 %v9852_v40  ;;  %v779_v49 = vmax.f32 %v747_v42, 0.0  ;;  %v8168_v42 = vld [vmem:[#allocation10 + $0x124] ss:$16 sps:$4 sm:$0xff]   ;;  %v8166_v45 = vld [vmem:[#allocation10 + $0x120] ss:$16 sps:$4 sm:$0xff]  }
 0x227   : > { %v742_v48 = vadd.f32 %v9828_v12, %v741_v47  ;;  %7560 = vmatprep.subr.bf16.mxu1 %v9848_v39  ;;  %7580 = vmatprep.subr.bf16.mxu0 %v9848_v39  ;;  %v777_v51 = vmax.f32 %v739_v44, 0.0  ;;  %v8129_v44 = vld [vmem:[#allocation10 + $0x4c] ss:$16 sps:$4 sm:$0xff]   ;;  %v8127_v47 = vld [vmem:[#allocation10 + $0x48] ss:$16 sps:$4 sm:$0xff]  }
 0x228   : > { %v780_v50 = vmax.f32 %v750_v46, 0.0  ;;  %v8174_v46 = vld [vmem:[#allocation10 + $0x144] ss:$16 sps:$4 sm:$0xff]  }
 0x229   : > { %v778_v52 = vmax.f32 %v742_v48, 0.0  ;;  %v8135_v48 = vld [vmem:[#allocation10 + $0x6c] ss:$16 sps:$4 sm:$0xff]  }
 0x22a   : > { %v9864_v53 = vpack.c.bf16 %v780_v50, %v779_v49  ;;  %7561 = vmatpush3.bf16.msra.mxu1 %v9848_v39  ;;  %7581 = vmatpush3.bf16.msra.mxu0 %v9848_v39  ;;  %v8172_v49 = vld [vmem:[#allocation10 + $0x140] ss:$16 sps:$4 sm:$0xff]   ;;  %v8180_v50 = vld [vmem:[#allocation10 + $0x164] ss:$16 sps:$4 sm:$0xff]  }
 0x22b   : > { %v9868_v54 = vpack.c.bf16 %v778_v52, %v777_v51  ;;  %v7552_v55 = vpop.f32.mrb[12].mxu0  ;;  %v8133_v51 = vld [vmem:[#allocation10 + $0x68] ss:$16 sps:$4 sm:$0xff]   ;;  %v8141_v52 = vld [vmem:[#allocation10 + $0x8c] ss:$16 sps:$4 sm:$0xff]  }
 0x22c   : > { %v763_v56 = vadd.f32 %v7552_v55, %v9828_v12  ;;  %v754_v57 = vpop.f32.mrb[13].mxu0  ;;  %v8139_v55 = vld [vmem:[#allocation10 + $0x88] ss:$16 sps:$4 sm:$0xff]  }
 0x22d   : > { %v755_v58 = vadd.f32 %v9828_v12, %v754_v57  ;;  %v7553_v59 = vpop.f32.mrb[14].mxu0  ;;  %7562 = vmatprep.subr.bf16.mxu1 %v9868_v54  ;;  %7582 = vmatprep.subr.bf16.mxu0 %v9868_v54  ;;  %v8184_v57 = vld [vmem:[#allocation10 + $0x180] ss:$16 sps:$4 sm:$0xff]  }
 0x22e   : > { %v766_v60 = vadd.f32 %v7553_v59, %v9828_v12  ;;  %v757_v61 = vpop.f32.mrb[15].mxu0  ;;  %7563 = vmatpush3.bf16.msra.mxu1 %v9868_v54  ;;  %7583 = vmatpush3.bf16.msra.mxu0 %v9868_v54  ;;  %v783_v63 = vmax.f32 %v763_v56, 0.0  ;;  %v8147_v56 = vld [vmem:[#allocation10 + $0xac] ss:$16 sps:$4 sm:$0xff]   ;;  %v8145_v59 = vld [vmem:[#allocation10 + $0xa8] ss:$16 sps:$4 sm:$0xff]  }
 0x22f   : > { %v758_v62 = vadd.f32 %v9828_v12, %v757_v61  ;;  %7564 = vmatprep.subr.bf16.mxu1 %v9864_v53  ;;  %7584 = vmatprep.subr.bf16.mxu0 %v9864_v53  ;;  %v781_v1 = vmax.f32 %v755_v58, 0.0  ;;  %v8103_v12 = vld [vmem:[#allocation9 + $0x50] sm:$0xff]  }
 0x230   : > { %v784_v0 = vmax.f32 %v766_v60, 0.0  ;;  %v8192_v58 = vld [vmem:[#allocation10 + $0x1a4] ss:$16 sps:$4 sm:$0xff]   ;;  %v8153_v60 = vld [vmem:[#allocation10 + $0xcc] ss:$16 sps:$4 sm:$0xff]  }
 0x231   : > { %v782_v2 = vmax.f32 %v758_v62, 0.0  ;;  %v8190_v61 = vld [vmem:[#allocation10 + $0x1a0] ss:$16 sps:$4 sm:$0xff]   ;;  %v8198_v62 = vld [vmem:[#allocation10 + $0x1c4] ss:$16 sps:$4 sm:$0xff]  }
 0x232   : > { %v9880_v3 = vpack.c.bf16 %v784_v0, %v783_v63  ;;  %7565 = vmatpush3.bf16.msra.mxu1 %v9864_v53  ;;  %7585 = vmatpush3.bf16.msra.mxu0 %v9864_v53  ;;  %v8151_v63 = vld [vmem:[#allocation10 + $0xc8] ss:$16 sps:$4 sm:$0xff]   ;;  %v8159_v0 = vld [vmem:[#allocation10 + $0xec] ss:$16 sps:$4 sm:$0xff]  }
 0x233   : > { %v9884_v4 = vpack.c.bf16 %v782_v2, %v781_v1  ;;  %v8196_v1 = vld [vmem:[#allocation10 + $0x1c0] ss:$16 sps:$4 sm:$0xff]   ;;  %v8204_v2 = vld [vmem:[#allocation10 + $0x1e4] ss:$16 sps:$4 sm:$0xff]  }
 0x235   : > { %7566 = vmatprep.subr.bf16.mxu1 %v9884_v4  ;;  %7586 = vmatprep.subr.bf16.mxu0 %v9884_v4 }
 0x236   : > { %7567 = vmatpush3.bf16.msra.mxu1 %v9884_v4  ;;  %7587 = vmatpush3.bf16.msra.mxu0 %v9884_v4 }
 0x237   : > { %7568 = vmatprep.subr.bf16.mxu1 %v9880_v3  ;;  %7588 = vmatprep.subr.bf16.mxu0 %v9880_v3 }
 0x23a   : > { %7569 = vmatpush3.bf16.msra.mxu1 %v9880_v3  ;;  %7589 = vmatpush3.bf16.msra.mxu0 %v9880_v3 }
 0x23b   : > { %7594 = vmatprep.subr.bf16.mxu1 %v9836_v26  ;;  %7614 = vmatprep.subr.bf16.mxu0 %v9836_v26 }
 0x23d   : > { %7571 = vmatmul.mubr.bf16.vlgmr.msra.gmra.mrb[0].mxu1 %v8096_v5  ;;  %7591 = vmatmul.mubr.bf16.vlgmr.msra.gmra.mrb[16].mxu0 %v8097_v6  ;;  %v8202_v5 = vld [vmem:[#allocation10 + $0x1e0] ss:$16 sps:$4 sm:$0xff]   ;;  %v8210_v6 = vld [vmem:[#allocation10 + $0x204] ss:$16 sps:$4 sm:$0xff]  }
 0x23e   : > { %7595 = vmatpush3.bf16.msra.mxu1 %v9836_v26  ;;  %7615 = vmatpush3.bf16.msra.mxu0 %v9836_v26 }
 0x23f   : > { %7596 = vmatprep.subr.bf16.mxu1 %v9834_v25  ;;  %7616 = vmatprep.subr.bf16.mxu0 %v9834_v25 }
 0x240   : > { %7610 = vmatprep.mubr.bf16.mxu1 %v8098_v7  ;;  %7630 = vmatprep.mubr.bf16.mxu0 %v8099_v8  ;;  %v8163_v7 = vld [vmem:[#allocation10 + $0x108] ss:$16 sps:$4 sm:$0xff]   ;;  %v8171_v8 = vld [vmem:[#allocation10 + $0x12c] ss:$16 sps:$4 sm:$0xff]  }
 0x242   : > { %7597 = vmatpush3.bf16.msra.mxu1 %v9834_v25  ;;  %7617 = vmatpush3.bf16.msra.mxu0 %v9834_v25 }
 0x243   : > { %7598 = vmatprep.subr.bf16.mxu1 %v9852_v40  ;;  %7618 = vmatprep.subr.bf16.mxu0 %v9852_v40 }
 0x246   : > { %7599 = vmatpush3.bf16.msra.mxu1 %v9852_v40  ;;  %7619 = vmatpush3.bf16.msra.mxu0 %v9852_v40 }
 0x247   : > { %7600 = vmatprep.subr.bf16.mxu1 %v9848_v39  ;;  %7620 = vmatprep.subr.bf16.mxu0 %v9848_v39 }
 0x24a   : > { %7601 = vmatpush3.bf16.msra.mxu1 %v9848_v39  ;;  %7621 = vmatpush3.bf16.msra.mxu0 %v9848_v39 }
 0x24b   : > { %7602 = vmatprep.subr.bf16.mxu1 %v9868_v54  ;;  %7622 = vmatprep.subr.bf16.mxu0 %v9868_v54 }
 0x24e   : > { %7603 = vmatpush3.bf16.msra.mxu1 %v9868_v54  ;;  %7623 = vmatpush3.bf16.msra.mxu0 %v9868_v54 }
 0x24f   : > { %7604 = vmatprep.subr.bf16.mxu1 %v9864_v53  ;;  %7624 = vmatprep.subr.bf16.mxu0 %v9864_v53 }
 0x252   : > { %7605 = vmatpush3.bf16.msra.mxu1 %v9864_v53  ;;  %7625 = vmatpush3.bf16.msra.mxu0 %v9864_v53 }
 0x253   : > { %7606 = vmatprep.subr.bf16.mxu1 %v9884_v4  ;;  %7626 = vmatprep.subr.bf16.mxu0 %v9884_v4 }
 0x256   : > { %7607 = vmatpush3.bf16.msra.mxu1 %v9884_v4  ;;  %7627 = vmatpush3.bf16.msra.mxu0 %v9884_v4 }
 0x257   : > { %7608 = vmatprep.subr.bf16.mxu1 %v9880_v3  ;;  %7628 = vmatprep.subr.bf16.mxu0 %v9880_v3 }
 0x25a   : > { %7609 = vmatpush3.bf16.msra.mxu1 %v9880_v3  ;;  %7629 = vmatpush3.bf16.msra.mxu0 %v9880_v3 }
 0x25b   : > { %7634 = vmatprep.subr.bf16.mxu1 %v9836_v26  ;;  %7654 = vmatprep.subr.bf16.mxu0 %v9836_v26 }
 0x25d   : > { %7611 = vmatmul.mubr.bf16.vlgmr.msra.gmra.mrb[4].mxu1 %v8100_v9  ;;  %7631 = vmatmul.mubr.bf16.vlgmr.msra.gmra.mrb[20].mxu0 %v8101_v10  ;;  %v8169_v9 = vld [vmem:[#allocation10 + $0x128] ss:$16 sps:$4 sm:$0xff]   ;;  %v8177_v10 = vld [vmem:[#allocation10 + $0x14c] ss:$16 sps:$4 sm:$0xff]  }
 0x25e   : > { %7635 = vmatpush3.bf16.msra.mxu1 %v9836_v26  ;;  %7655 = vmatpush3.bf16.msra.mxu0 %v9836_v26 }
 0x25f   : > { %7636 = vmatprep.subr.bf16.mxu1 %v9834_v25  ;;  %7656 = vmatprep.subr.bf16.mxu0 %v9834_v25 }
 0x260   : > { %7650 = vmatprep.mubr.bf16.mxu1 %v8102_v11  ;;  %7670 = vmatprep.mubr.bf16.mxu0 %v8103_v12  ;;  %v8175_v11 = vld [vmem:[#allocation10 + $0x148] ss:$16 sps:$4 sm:$0xff]   ;;  %v8183_v12 = vld [vmem:[#allocation10 + $0x16c] ss:$16 sps:$4 sm:$0xff]  }
 0x262   : > { %7637 = vmatpush3.bf16.msra.mxu1 %v9834_v25  ;;  %7657 = vmatpush3.bf16.msra.mxu0 %v9834_v25 }
 0x263   : > { %7638 = vmatprep.subr.bf16.mxu1 %v9852_v40  ;;  %7658 = vmatprep.subr.bf16.mxu0 %v9852_v40 }
 0x266   : > { %7639 = vmatpush3.bf16.msra.mxu1 %v9852_v40  ;;  %7659 = vmatpush3.bf16.msra.mxu0 %v9852_v40 }
 0x267   : > { %7640 = vmatprep.subr.bf16.mxu1 %v9848_v39  ;;  %7660 = vmatprep.subr.bf16.mxu0 %v9848_v39 }
 0x26a   : > { %7641 = vmatpush3.bf16.msra.mxu1 %v9848_v39  ;;  %7661 = vmatpush3.bf16.msra.mxu0 %v9848_v39 }
 0x26b   : > { %7642 = vmatprep.subr.bf16.mxu1 %v9868_v54  ;;  %7662 = vmatprep.subr.bf16.mxu0 %v9868_v54 }
 0x26e   : > { %7643 = vmatpush3.bf16.msra.mxu1 %v9868_v54  ;;  %7663 = vmatpush3.bf16.msra.mxu0 %v9868_v54 }
 0x26f   : > { %7644 = vmatprep.subr.bf16.mxu1 %v9864_v53  ;;  %7664 = vmatprep.subr.bf16.mxu0 %v9864_v53 }
 0x272   : > { %7645 = vmatpush3.bf16.msra.mxu1 %v9864_v53  ;;  %7665 = vmatpush3.bf16.msra.mxu0 %v9864_v53 }
 0x273   : > { %7646 = vmatprep.subr.bf16.mxu1 %v9884_v4  ;;  %7666 = vmatprep.subr.bf16.mxu0 %v9884_v4 }
 0x276   : > { %7647 = vmatpush3.bf16.msra.mxu1 %v9884_v4  ;;  %7667 = vmatpush3.bf16.msra.mxu0 %v9884_v4 }
 0x277   : > { %7648 = vmatprep.subr.bf16.mxu1 %v9880_v3  ;;  %7668 = vmatprep.subr.bf16.mxu0 %v9880_v3 }
 0x27a   : > { %7649 = vmatpush3.bf16.msra.mxu1 %v9880_v3  ;;  %7669 = vmatpush3.bf16.msra.mxu0 %v9880_v3 }
 0x27b   : > { %7674 = vmatprep.subr.bf16.mxu1 %v9836_v26  ;;  %7694 = vmatprep.subr.bf16.mxu0 %v9836_v26 }
 0x27d   : > { %7651 = vmatmul.mubr.bf16.vlgmr.msra.gmra.mrb[8].mxu1 %v8104_v13  ;;  %7671 = vmatmul.mubr.bf16.vlgmr.msra.gmra.mrb[24].mxu0 %v8105_v14  ;;  %v8181_v13 = vld [vmem:[#allocation10 + $0x168] ss:$16 sps:$4 sm:$0xff]   ;;  %v8189_v14 = vld [vmem:[#allocation10 + $0x18c] ss:$16 sps:$4 sm:$0xff]  }
 0x27e   : > { %7675 = vmatpush3.bf16.msra.mxu1 %v9836_v26  ;;  %7695 = vmatpush3.bf16.msra.mxu0 %v9836_v26 }
 0x27f   : > { %7676 = vmatprep.subr.bf16.mxu1 %v9834_v25  ;;  %7696 = vmatprep.subr.bf16.mxu0 %v9834_v25 }
 0x280   : > { %7690 = vmatprep.mubr.bf16.mxu1 %v8106_v15  ;;  %7710 = vmatprep.mubr.bf16.mxu0 %v8108_v16  ;;  %v8187_v15 = vld [vmem:[#allocation10 + $0x188] ss:$16 sps:$4 sm:$0xff]   ;;  %v8195_v16 = vld [vmem:[#allocation10 + $0x1ac] ss:$16 sps:$4 sm:$0xff]  }
 0x282   : > { %7677 = vmatpush3.bf16.msra.mxu1 %v9834_v25  ;;  %7697 = vmatpush3.bf16.msra.mxu0 %v9834_v25 }
 0x283   : > { %7678 = vmatprep.subr.bf16.mxu1 %v9852_v40  ;;  %7698 = vmatprep.subr.bf16.mxu0 %v9852_v40 }
 0x286   : > { %7679 = vmatpush3.bf16.msra.mxu1 %v9852_v40  ;;  %7699 = vmatpush3.bf16.msra.mxu0 %v9852_v40 }
 0x287   : > { %7680 = vmatprep.subr.bf16.mxu1 %v9848_v39  ;;  %7700 = vmatprep.subr.bf16.mxu0 %v9848_v39 }
 0x28a   : > { %7681 = vmatpush3.bf16.msra.mxu1 %v9848_v39  ;;  %7701 = vmatpush3.bf16.msra.mxu0 %v9848_v39 }
 0x28b   : > { %7682 = vmatprep.subr.bf16.mxu1 %v9868_v54  ;;  %7702 = vmatprep.subr.bf16.mxu0 %v9868_v54 }
 0x28e   : > { %7683 = vmatpush3.bf16.msra.mxu1 %v9868_v54  ;;  %7703 = vmatpush3.bf16.msra.mxu0 %v9868_v54 }
 0x28f   : > { %7684 = vmatprep.subr.bf16.mxu1 %v9864_v53  ;;  %7704 = vmatprep.subr.bf16.mxu0 %v9864_v53 }
 0x292   : > { %7685 = vmatpush3.bf16.msra.mxu1 %v9864_v53  ;;  %7705 = vmatpush3.bf16.msra.mxu0 %v9864_v53 }
 0x293   : > { %7686 = vmatprep.subr.bf16.mxu1 %v9884_v4  ;;  %7706 = vmatprep.subr.bf16.mxu0 %v9884_v4 }
 0x296   : > { %7687 = vmatpush3.bf16.msra.mxu1 %v9884_v4  ;;  %7707 = vmatpush3.bf16.msra.mxu0 %v9884_v4 }
 0x297   : > { %7688 = vmatprep.subr.bf16.mxu1 %v9880_v3  ;;  %7708 = vmatprep.subr.bf16.mxu0 %v9880_v3 }
 0x29a   : > { %7689 = vmatpush3.bf16.msra.mxu1 %v9880_v3  ;;  %7709 = vmatpush3.bf16.msra.mxu0 %v9880_v3 }
 0x29b   : > { %7714 = vmatprep.subr.bf16.mxu1 %v9836_v26  ;;  %3190 = vmatprep.subr.bf16.mxu0 %v8114_v17  ;;  %v8193_v17 = vld [vmem:[#allocation10 + $0x1a8] ss:$16 sps:$4 sm:$0xff]  }
 0x29d   : > { %7691 = vmatmul.mubr.bf16.vlgmr.msra.gmra.mrb[12].mxu1 %v8107_v18  ;;  %7711 = vmatmul.mubr.bf16.vlgmr.msra.gmra.mrb[28].mxu0 %v8110_v19  ;;  %v8201_v18 = vld [vmem:[#allocation10 + $0x1cc] ss:$16 sps:$4 sm:$0xff]   ;;  %v8199_v19 = vld [vmem:[#allocation10 + $0x1c8] ss:$16 sps:$4 sm:$0xff]  }
 0x29e   : > { %7715 = vmatpush3.bf16.msra.mxu1 %v9836_v26  ;;  %7730 = vmatprep.mubr.bf16.mxu1 %v8109_v20  ;;  %v8130_v26 = vld [vmem:[#allocation10 + $0x60] ss:$16 sps:$4 sm:$0xff]   ;;  %v8207_v20 = vld [vmem:[#allocation10 + $0x1ec] ss:$16 sps:$4 sm:$0xff]  }
 0x29f   : > { %7716 = vmatprep.subr.bf16.mxu1 %v9834_v25  ;;  %3191 = vmatpush1.bf16.msra.mxu0 %v8112_v21  ;;  %v8205_v21 = vld [vmem:[#allocation10 + $0x1e8] ss:$16 sps:$4 sm:$0xff]  }
 0x2a0   : > { %3192 = vmatprep.subr.bf16.mxu0 %v8120_v22  ;;  %v8213_v22 = vld [vmem:[#allocation10 + $0x20c] ss:$16 sps:$4 sm:$0xff]  }
 0x2a2   : > { %7717 = vmatpush3.bf16.msra.mxu1 %v9834_v25  ;;  %v8136_v25 = vld [vmem:[#allocation10 + $0x80] ss:$16 sps:$4 sm:$0xff]  }
 0x2a3   : > { %7718 = vmatprep.subr.bf16.mxu1 %v9852_v40  ;;  %3193 = vmatpush1.bf16.msra.mxu0 %v8118_v23 }
 0x2a4   : > { %3194 = vmatprep.subr.bf16.mxu0 %v8126_v24 }
 0x2a6   : > { %7719 = vmatpush3.bf16.msra.mxu1 %v9852_v40  ;;  %v8123_v40 = vld [vmem:[#allocation10 + $0x2c] ss:$16 sps:$4 sm:$0xff]  }
 0x2a7   : > { %7720 = vmatprep.subr.bf16.mxu1 %v9848_v39  ;;  %3195 = vmatpush1.bf16.msra.mxu0 %v8124_v27 }
 0x2a8   : > { %3196 = vmatprep.subr.bf16.mxu0 %v8132_v28 }
 0x2aa   : > { %7721 = vmatpush3.bf16.msra.mxu1 %v9848_v39  ;;  %v8115_v39 = vld [vmem:[#allocation10 + $0x8] ss:$16 sps:$4 sm:$0xff]  }
 0x2ab   : > { %7722 = vmatprep.subr.bf16.mxu1 %v9868_v54  ;;  %3197 = vmatpush1.bf16.msra.mxu0 %v8130_v26 }
 0x2ac   : > { %3198 = vmatprep.subr.bf16.mxu0 %v8138_v29 }
 0x2ae   : > { %7723 = vmatpush3.bf16.msra.mxu1 %v9868_v54  ;;  %v8186_v54 = vld [vmem:[#allocation10 + $0x184] ss:$16 sps:$4 sm:$0xff]  }
 0x2af   : > { %7724 = vmatprep.subr.bf16.mxu1 %v9864_v53  ;;  %3199 = vmatpush1.bf16.msra.mxu0 %v8136_v25 }
 0x2b0   : > { %3200 = vmatprep.subr.bf16.mxu0 %v8144_v30 }
 0x2b2   : > { %7725 = vmatpush3.bf16.msra.mxu1 %v9864_v53  ;;  %v8178_v53 = vld [vmem:[#allocation10 + $0x160] ss:$16 sps:$4 sm:$0xff]  }
 0x2b3   : > { %7726 = vmatprep.subr.bf16.mxu1 %v9884_v4  ;;  %3201 = vmatpush1.bf16.msra.mxu0 %v8142_v31 }
 0x2b4   : > { %3202 = vmatprep.subr.bf16.mxu0 %v8150_v32 }
 0x2b6   : > { %7727 = vmatpush3.bf16.msra.mxu1 %v9884_v4  ;;  %v8165_v4 = vld [vmem:[#allocation10 + $0x10c] ss:$16 sps:$4 sm:$0xff]  }
 0x2b7   : > { %7728 = vmatprep.subr.bf16.mxu1 %v9880_v3  ;;  %3203 = vmatpush1.bf16.msra.mxu0 %v8148_v33 }
 0x2b8   : > { %3204 = vmatprep.subr.bf16.mxu0 %v8156_v34 }
 0x2ba   : > { %7729 = vmatpush3.bf16.msra.mxu1 %v9880_v3  ;;  %v8157_v3 = vld [vmem:[#allocation10 + $0xe8] ss:$16 sps:$4 sm:$0xff]  }
 0x2bb   : > { %3455 = vmatprep.subr.bf16.mxu1 %v8117_v35  ;;  %3205 = vmatpush1.bf16.msra.mxu0 %v8154_v36  ;;  %v8208_v35 = vld [vmem:[#allocation10 + $0x200] ss:$16 sps:$4 sm:$0xff]   ;;  %v8211_v36 = vld [vmem:[#allocation10 + $0x208] ss:$16 sps:$4 sm:$0xff]  }
 0x2bc   : > { %3206 = vmatprep.subr.bf16.mxu0 %v8162_v37  ;;  %v8216_v37 = vld [vmem:[#allocation10 + $0x224] ss:$16 sps:$4 sm:$0xff]  }
 0x2bd   : > { %7731 = vmatmul.mubr.bf16.vlgmr.msra.gmra.mrb[16].mxu1 %v8111_v38  ;;  %v8219_v38 = vld [vmem:[#allocation10 + $0x22c] ss:$16 sps:$4 sm:$0xff]  }
 0x2be   : > { %3456 = vmatpush1.bf16.msra.mxu1 %v8115_v39  ;;  %v8214_v39 = vld [vmem:[#allocation10 + $0x220] ss:$16 sps:$4 sm:$0xff]  }
 0x2bf   : > { %3457 = vmatprep.subr.bf16.mxu1 %v8123_v40  ;;  %3207 = vmatpush1.bf16.msra.mxu0 %v8160_v41  ;;  %v8217_v40 = vld [vmem:[#allocation10 + $0x228] ss:$16 sps:$4 sm:$0xff]   ;;  %v8222_v41 = vld [vmem:[#allocation10 + $0x244] ss:$16 sps:$4 sm:$0xff]  }
 0x2c0   : > { %3208 = vmatprep.subr.bf16.mxu0 %v8168_v42  ;;  %v8225_v42 = vld [vmem:[#allocation10 + $0x24c] ss:$16 sps:$4 sm:$0xff]  }
 0x2c2   : > { %3458 = vmatpush1.bf16.msra.mxu1 %v8121_v43  ;;  %v8220_v43 = vld [vmem:[#allocation10 + $0x240] ss:$16 sps:$4 sm:$0xff]  }
 0x2c3   : > { %3459 = vmatprep.subr.bf16.mxu1 %v8129_v44  ;;  %3209 = vmatpush1.bf16.msra.mxu0 %v8166_v45  ;;  %v8223_v44 = vld [vmem:[#allocation10 + $0x248] ss:$16 sps:$4 sm:$0xff]   ;;  %v8228_v45 = vld [vmem:[#allocation10 + $0x264] ss:$16 sps:$4 sm:$0xff]  }
 0x2c4   : > { %3210 = vmatprep.subr.bf16.mxu0 %v8174_v46  ;;  %v8231_v46 = vld [vmem:[#allocation10 + $0x26c] ss:$16 sps:$4 sm:$0xff]  }
 0x2c6   : > { %3460 = vmatpush1.bf16.msra.mxu1 %v8127_v47  ;;  %v8226_v47 = vld [vmem:[#allocation10 + $0x260] ss:$16 sps:$4 sm:$0xff]  }
 0x2c7   : > { %3461 = vmatprep.subr.bf16.mxu1 %v8135_v48  ;;  %3211 = vmatpush1.bf16.msra.mxu0 %v8172_v49  ;;  %v8229_v48 = vld [vmem:[#allocation10 + $0x268] ss:$16 sps:$4 sm:$0xff]   ;;  %v8234_v49 = vld [vmem:[#allocation10 + $0x284] ss:$16 sps:$4 sm:$0xff]  }
 0x2c8   : > { %3212 = vmatprep.subr.bf16.mxu0 %v8180_v50  ;;  %v8237_v50 = vld [vmem:[#allocation10 + $0x28c] ss:$16 sps:$4 sm:$0xff]  }
 0x2ca   : > { %3462 = vmatpush1.bf16.msra.mxu1 %v8133_v51  ;;  %v8232_v51 = vld [vmem:[#allocation10 + $0x280] ss:$16 sps:$4 sm:$0xff]  }
 0x2cb   : > { %3463 = vmatprep.subr.bf16.mxu1 %v8141_v52  ;;  %3213 = vmatpush1.bf16.msra.mxu0 %v8178_v53  ;;  %v8235_v52 = vld [vmem:[#allocation10 + $0x288] ss:$16 sps:$4 sm:$0xff]   ;;  %v8240_v53 = vld [vmem:[#allocation10 + $0x2a4] ss:$16 sps:$4 sm:$0xff]  }
 0x2cc   : > { %3214 = vmatprep.subr.bf16.mxu0 %v8186_v54  ;;  %v8243_v54 = vld [vmem:[#allocation10 + $0x2ac] ss:$16 sps:$4 sm:$0xff]  }
 0x2ce   : > { %3464 = vmatpush1.bf16.msra.mxu1 %v8139_v55  ;;  %v8238_v55 = vld [vmem:[#allocation10 + $0x2a0] ss:$16 sps:$4 sm:$0xff]  }
 0x2cf   : > { %3465 = vmatprep.subr.bf16.mxu1 %v8147_v56  ;;  %3215 = vmatpush1.bf16.msra.mxu0 %v8184_v57  ;;  %v8241_v56 = vld [vmem:[#allocation10 + $0x2a8] ss:$16 sps:$4 sm:$0xff]   ;;  %v8246_v57 = vld [vmem:[#allocation10 + $0x2c4] ss:$16 sps:$4 sm:$0xff]  }
 0x2d0   : > { %3216 = vmatprep.subr.bf16.mxu0 %v8192_v58  ;;  %v8249_v58 = vld [vmem:[#allocation10 + $0x2cc] ss:$16 sps:$4 sm:$0xff]  }
 0x2d2   : > { %3466 = vmatpush1.bf16.msra.mxu1 %v8145_v59  ;;  %v8244_v59 = vld [vmem:[#allocation10 + $0x2c0] ss:$16 sps:$4 sm:$0xff]  }
 0x2d3   : > { %3467 = vmatprep.subr.bf16.mxu1 %v8153_v60  ;;  %3217 = vmatpush1.bf16.msra.mxu0 %v8190_v61  ;;  %v8247_v60 = vld [vmem:[#allocation10 + $0x2c8] ss:$16 sps:$4 sm:$0xff]   ;;  %v8252_v61 = vld [vmem:[#allocation10 + $0x2e4] ss:$16 sps:$4 sm:$0xff]  }
 0x2d4   : > { %3218 = vmatprep.subr.bf16.mxu0 %v8198_v62  ;;  %v8255_v62 = vld [vmem:[#allocation10 + $0x2ec] ss:$16 sps:$4 sm:$0xff]  }
 0x2d6   : > { %3468 = vmatpush1.bf16.msra.mxu1 %v8151_v63  ;;  %v8250_v63 = vld [vmem:[#allocation10 + $0x2e0] ss:$16 sps:$4 sm:$0xff]  }
 0x2d7   : > { %3469 = vmatprep.subr.bf16.mxu1 %v8159_v0  ;;  %3219 = vmatpush1.bf16.msra.mxu0 %v8196_v1  ;;  %v8253_v0 = vld [vmem:[#allocation10 + $0x2e8] ss:$16 sps:$4 sm:$0xff]  }
 0x2d8   : > { %3220 = vmatprep.subr.bf16.mxu0 %v8204_v2 }
 0x2da   : > { %3470 = vmatpush1.bf16.msra.mxu1 %v8157_v3  ;;  %v8258_v3 = vld [vmem:[#allocation10 + $0x304] ss:$16 sps:$4 sm:$0xff]  }
 0x2db   : > { %3471 = vmatprep.subr.bf16.mxu1 %v8165_v4  ;;  %3221 = vmatpush1.bf16.msra.mxu0 %v8202_v5  ;;  %v8261_v4 = vld [vmem:[#allocation10 + $0x30c] ss:$16 sps:$4 sm:$0xff]  }
 0x2dc   : > { %3243 = vmatprep.subr.bf16.mxu0 %v8210_v6 }
 0x2de   : > { %3472 = vmatpush1.bf16.msra.mxu1 %v8163_v7 }
 0x2df   : > { %3473 = vmatprep.subr.bf16.mxu1 %v8171_v8 }
 0x2e2   : > { %3474 = vmatpush1.bf16.msra.mxu1 %v8169_v9 }
 0x2e3   : > { %3475 = vmatprep.subr.bf16.mxu1 %v8177_v10 }
 0x2e6   : > { %3476 = vmatpush1.bf16.msra.mxu1 %v8175_v11 }
 0x2e7   : > { %3477 = vmatprep.subr.bf16.mxu1 %v8183_v12 }
 0x2ea   : > { %3478 = vmatpush1.bf16.msra.mxu1 %v8181_v13  ;;  %v8256_v13 = vld [vmem:[#allocation10 + $0x300] ss:$16 sps:$4 sm:$0xff]  }
 0x2eb   : > { %3479 = vmatprep.subr.bf16.mxu1 %v8189_v14  ;;  %v8259_v14 = vld [vmem:[#allocation10 + $0x308] ss:$16 sps:$4 sm:$0xff]  }
 0x2ee   : > { %3480 = vmatpush1.bf16.msra.mxu1 %v8187_v15 }
 0x2ef   : > { %3481 = vmatprep.subr.bf16.mxu1 %v8195_v16 }
 0x2f2   : > { %3482 = vmatpush1.bf16.msra.mxu1 %v8193_v17  ;;  %v8264_v17 = vld [vmem:[#allocation10 + $0x324] ss:$16 sps:$4 sm:$0xff]  }
 0x2f3   : > { %3483 = vmatprep.subr.bf16.mxu1 %v8201_v18  ;;  %v8267_v18 = vld [vmem:[#allocation10 + $0x32c] ss:$16 sps:$4 sm:$0xff]  }
 0x2f6   : > { %3484 = vmatpush1.bf16.msra.mxu1 %v8199_v19  ;;  %v8262_v19 = vld [vmem:[#allocation10 + $0x320] ss:$16 sps:$4 sm:$0xff]  }
 0x2f7   : > { %3485 = vmatprep.subr.bf16.mxu1 %v8207_v20  ;;  %v8265_v20 = vld [vmem:[#allocation10 + $0x328] ss:$16 sps:$4 sm:$0xff]  }
 0x2fa   : > { %3486 = vmatpush1.bf16.msra.mxu1 %v8205_v21  ;;  %v8270_v21 = vld [vmem:[#allocation10 + $0x344] ss:$16 sps:$4 sm:$0xff]  }
 0x2fb   : > { %3508 = vmatprep.subr.bf16.mxu1 %v8213_v22  ;;  %v8273_v22 = vld [vmem:[#allocation10 + $0x34c] ss:$16 sps:$4 sm:$0xff]  }
 0x310   : > { %v7572_v23 = vpop.f32.mrb[0].mxu1  ;;  %v7592_v24 = vpop.f32.mrb[16].mxu0 }
 0x311   : > { %v843_v27 = vpop.f32.mrb[1].mxu1  ;;  %v913_v28 = vpop.f32.mrb[17].mxu0 }
 0x312   : > { %v7573_v26 = vpop.f32.mrb[2].mxu1  ;;  %v7593_v29 = vpop.f32.mrb[18].mxu0 }
 0x313   : > { %v859_v25 = vpack.c.bf16 %v7573_v26, %v7572_v23  ;;  %v929_v30 = vpack.c.bf16 %v7593_v29, %v7592_v24  ;;  %v846_v31 = vpop.f32.mrb[3].mxu1  ;;  %v916_v32 = vpop.f32.mrb[19].mxu0  ;;  %v8268_v23 = vld [vmem:[#allocation10 + $0x340] ss:$16 sps:$4 sm:$0xff]   ;;  %v8271_v24 = vld [vmem:[#allocation10 + $0x348] ss:$16 sps:$4 sm:$0xff]  }
 0x314   : > { %v858_v33 = vpack.c.bf16 %v846_v31, %v843_v27  ;;  %v928_v34 = vpack.c.bf16 %v916_v32, %v913_v28  ;;  %v8276_v27 = vld [vmem:[#allocation10 + $0x364] ss:$16 sps:$4 sm:$0xff]   ;;  %v8279_v28 = vld [vmem:[#allocation10 + $0x36c] ss:$16 sps:$4 sm:$0xff]   ;;  %v8274_v26 = vld [vmem:[#allocation10 + $0x360] ss:$16 sps:$4 sm:$0xff]  }
 0x315   : > { %v8277_v29 = vld [vmem:[#allocation10 + $0x368] ss:$16 sps:$4 sm:$0xff]   ;;  %v8280_v31 = vld [vmem:[#allocation10 + $0x380] ss:$16 sps:$4 sm:$0xff]  }
 0x316   : > { %3222 = vmatprep.mubr.bf16.mxu0 %v928_v34  ;;  %3487 = vmatprep.mubr.bf16.mxu1 %v928_v34  ;;  %v8283_v32 = vld [vmem:[#allocation10 + $0x388] ss:$16 sps:$4 sm:$0xff]   ;;  %v8291_v34 = vld [vmem:[#allocation10 + $0x3ac] ss:$16 sps:$4 sm:$0xff]  }
 0x317   : > { %3223 = vmatmul.mubr.bf16.vlgmr.msra.gmra.mrb[32].mxu0 %v858_v33  ;;  %3488 = vmatmul.mubr.bf16.vlgmr.msra.gmra.mrb[20].mxu1 %v858_v33  ;;  %v8288_v33 = vld [vmem:[#allocation10 + $0x3a4] ss:$16 sps:$4 sm:$0xff]  }
 0x318   : > { %3244 = vmatpush1.bf16.msra.mxu0 %v8208_v35  ;;  %3509 = vmatpush1.bf16.msra.mxu1 %v8211_v36  ;;  %v8286_v35 = vld [vmem:[#allocation10 + $0x3a0] ss:$16 sps:$4 sm:$0xff]   ;;  %v8289_v36 = vld [vmem:[#allocation10 + $0x3a8] ss:$16 sps:$4 sm:$0xff]  }
 0x319   : > { %3232 = vmatprep.mubr.bf16.mxu0 %v929_v30  ;;  %3497 = vmatprep.mubr.bf16.mxu1 %v929_v30  ;;  %v8285_v30 = vld [vmem:[#allocation10 + $0x38c] ss:$16 sps:$4 sm:$0xff]  }
 0x31a   : > { %3245 = vmatprep.subr.bf16.mxu0 %v8216_v37  ;;  %3510 = vmatprep.subr.bf16.mxu1 %v8219_v38  ;;  %v8294_v37 = vld [vmem:[#allocation10 + $0x3c4] ss:$16 sps:$4 sm:$0xff]   ;;  %v8297_v38 = vld [vmem:[#allocation10 + $0x3cc] ss:$16 sps:$4 sm:$0xff]  }
 0x31c   : > { %3246 = vmatpush1.bf16.msra.mxu0 %v8214_v39  ;;  %3511 = vmatpush1.bf16.msra.mxu1 %v8217_v40  ;;  %v8292_v39 = vld [vmem:[#allocation10 + $0x3c0] ss:$16 sps:$4 sm:$0xff]   ;;  %v8295_v40 = vld [vmem:[#allocation10 + $0x3c8] ss:$16 sps:$4 sm:$0xff]  }
 0x31d   : > { %3247 = vmatprep.subr.bf16.mxu0 %v8222_v41  ;;  %3512 = vmatprep.subr.bf16.mxu1 %v8225_v42  ;;  %v8300_v41 = vld [vmem:[#allocation10 + $0x3e4] ss:$16 sps:$4 sm:$0xff]   ;;  %v8303_v42 = vld [vmem:[#allocation10 + $0x3ec] ss:$16 sps:$4 sm:$0xff]  }
 0x31f   : > { %3233 = vmatmul.mubr.bf16.gmra.mrb[36].mxu0 %v859_v25  ;;  %3498 = vmatmul.mubr.bf16.gmra.mrb[24].mxu1 %v859_v25  ;;  %v8282_v25 = vld [vmem:[#allocation10 + $0x384] ss:$16 sps:$4 sm:$0xff]  }
 0x320   : > { %3248 = vmatpush1.bf16.msra.mxu0 %v8220_v43  ;;  %3513 = vmatpush1.bf16.msra.mxu1 %v8223_v44  ;;  %v8298_v43 = vld [vmem:[#allocation10 + $0x3e0] ss:$16 sps:$4 sm:$0xff]   ;;  %v8301_v44 = vld [vmem:[#allocation10 + $0x3e8] ss:$16 sps:$4 sm:$0xff]  }
 0x321   : > { %3249 = vmatprep.subr.bf16.mxu0 %v8228_v45  ;;  %3514 = vmatprep.subr.bf16.mxu1 %v8231_v46 }
 0x324   : > { %3250 = vmatpush1.bf16.msra.mxu0 %v8226_v47  ;;  %3515 = vmatpush1.bf16.msra.mxu1 %v8229_v48  ;;  %v8306_v47 = vld [vmem:[#allocation10 + $0x404] ss:$16 sps:$4 sm:$0xff]   ;;  %v8309_v48 = vld [vmem:[#allocation10 + $0x40c] ss:$16 sps:$4 sm:$0xff]  }
 0x325   : > { %3251 = vmatprep.subr.bf16.mxu0 %v8234_v49  ;;  %3516 = vmatprep.subr.bf16.mxu1 %v8237_v50 }
 0x328   : > { %3252 = vmatpush1.bf16.msra.mxu0 %v8232_v51  ;;  %3517 = vmatpush1.bf16.msra.mxu1 %v8235_v52 }
 0x329   : > { %3253 = vmatprep.subr.bf16.mxu0 %v8240_v53  ;;  %3518 = vmatprep.subr.bf16.mxu1 %v8243_v54 }
 0x32c   : > { %3254 = vmatpush1.bf16.msra.mxu0 %v8238_v55  ;;  %3519 = vmatpush1.bf16.msra.mxu1 %v8241_v56 }
 0x32d   : > { %3255 = vmatprep.subr.bf16.mxu0 %v8246_v57  ;;  %3520 = vmatprep.subr.bf16.mxu1 %v8249_v58  ;;  %v8304_v57 = vld [vmem:[#allocation10 + $0x400] ss:$16 sps:$4 sm:$0xff]  }
 0x330   : > { %3256 = vmatpush1.bf16.msra.mxu0 %v8244_v59  ;;  %3521 = vmatpush1.bf16.msra.mxu1 %v8247_v60  ;;  %v7612_v1 = vpop.f32.mrb[4].mxu1  ;;  %v7632_v2 = vpop.f32.mrb[20].mxu0  ;;  %v8307_v60 = vld [vmem:[#allocation10 + $0x408] ss:$16 sps:$4 sm:$0xff]  }
 0x331   : > { %3257 = vmatprep.subr.bf16.mxu0 %v8252_v61  ;;  %3522 = vmatprep.subr.bf16.mxu1 %v8255_v62  ;;  %v983_v5 = vpop.f32.mrb[5].mxu1  ;;  %v1053_v6 = vpop.f32.mrb[21].mxu0  ;;  %v8312_v61 = vld [vmem:[#allocation10 + $0x424] ss:$16 sps:$4 sm:$0xff]   ;;  %v8315_v62 = vld [vmem:[#allocation10 + $0x42c] ss:$16 sps:$4 sm:$0xff]  }
 0x332   : > { %v7613_v7 = vpop.f32.mrb[6].mxu1  ;;  %v7633_v8 = vpop.f32.mrb[22].mxu0 }
 0x333   : > { %v10006_v9 = vpack.c.bf16 %v7613_v7, %v7612_v1  ;;  %v986_v10 = vpop.f32.mrb[7].mxu1  ;;  %v10008_v11 = vpack.c.bf16 %v7633_v8, %v7632_v2  ;;  %v1056_v12 = vpop.f32.mrb[23].mxu0  ;;  %v8318_v1 = vld [vmem:[#allocation10 + $0x444] ss:$16 sps:$4 sm:$0xff]   ;;  %v8321_v2 = vld [vmem:[#allocation10 + $0x44c] ss:$16 sps:$4 sm:$0xff]  }
 0x334   : > { %3258 = vmatpush1.bf16.msra.mxu0 %v8250_v63  ;;  %3523 = vmatpush1.bf16.msra.mxu1 %v8253_v0  ;;  %v10010_v15 = vpack.c.bf16 %v986_v10, %v983_v5  ;;  %v1068_v16 = vpack.c.bf16 %v1056_v12, %v1053_v6  ;;  %v8310_v63 = vld [vmem:[#allocation10 + $0x420] ss:$16 sps:$4 sm:$0xff]   ;;  %v8313_v0 = vld [vmem:[#allocation10 + $0x428] ss:$16 sps:$4 sm:$0xff]   ;;  %v8324_v5 = vld [vmem:[#allocation10 + $0x464] ss:$16 sps:$4 sm:$0xff]  }
 0x335   : > { %3259 = vmatprep.subr.bf16.mxu0 %v8258_v3  ;;  %3524 = vmatprep.subr.bf16.mxu1 %v8261_v4  ;;  %v8316_v3 = vld [vmem:[#allocation10 + $0x440] ss:$16 sps:$4 sm:$0xff]   ;;  %v8319_v4 = vld [vmem:[#allocation10 + $0x448] ss:$16 sps:$4 sm:$0xff]   ;;  %v8327_v6 = vld [vmem:[#allocation10 + $0x46c] ss:$16 sps:$4 sm:$0xff]  }
 0x336   : > { %3275 = vmatprep.mubr.bf16.mxu0 %v1068_v16  ;;  %3540 = vmatprep.mubr.bf16.mxu1 %v1068_v16  ;;  %v8322_v7 = vld [vmem:[#allocation10 + $0x460] ss:$16 sps:$4 sm:$0xff]   ;;  %v8325_v8 = vld [vmem:[#allocation10 + $0x468] ss:$16 sps:$4 sm:$0xff]   ;;  %v8330_v10 = vld [vmem:[#allocation10 + $0x484] ss:$16 sps:$4 sm:$0xff]  }
 0x337   : > { %v8328_v12 = vld [vmem:[#allocation10 + $0x480] ss:$16 sps:$4 sm:$0xff]   ;;  %v8337_v16 = vld [vmem:[#allocation10 + $0x4a8] ss:$16 sps:$4 sm:$0xff]  }
 0x338   : > { %3260 = vmatpush1.bf16.msra.mxu0 %v8256_v13  ;;  %3525 = vmatpush1.bf16.msra.mxu1 %v8259_v14  ;;  %v8331_v13 = vld [vmem:[#allocation10 + $0x488] ss:$16 sps:$4 sm:$0xff]   ;;  %v8336_v14 = vld [vmem:[#allocation10 + $0x4a4] ss:$16 sps:$4 sm:$0xff]  }
 0x339   : > { %3261 = vmatprep.subr.bf16.mxu0 %v8264_v17  ;;  %3526 = vmatprep.subr.bf16.mxu1 %v8267_v18  ;;  %v8342_v17 = vld [vmem:[#allocation10 + $0x4c4] ss:$16 sps:$4 sm:$0xff]   ;;  %v8345_v18 = vld [vmem:[#allocation10 + $0x4cc] ss:$16 sps:$4 sm:$0xff]  }
 0x33c   : > { %3262 = vmatpush1.bf16.msra.mxu0 %v8262_v19  ;;  %3527 = vmatpush1.bf16.msra.mxu1 %v8265_v20  ;;  %v8340_v19 = vld [vmem:[#allocation10 + $0x4c0] ss:$16 sps:$4 sm:$0xff]   ;;  %v8343_v20 = vld [vmem:[#allocation10 + $0x4c8] ss:$16 sps:$4 sm:$0xff]  }
 0x33d   : > { %3263 = vmatprep.subr.bf16.mxu0 %v8270_v21  ;;  %3528 = vmatprep.subr.bf16.mxu1 %v8273_v22  ;;  %v8348_v21 = vld [vmem:[#allocation10 + $0x4e4] ss:$16 sps:$4 sm:$0xff]   ;;  %v8351_v22 = vld [vmem:[#allocation10 + $0x4ec] ss:$16 sps:$4 sm:$0xff]  }
 0x340   : > { %3264 = vmatpush1.bf16.msra.mxu0 %v8268_v23  ;;  %3529 = vmatpush1.bf16.msra.mxu1 %v8271_v24  ;;  %v8346_v23 = vld [vmem:[#allocation10 + $0x4e0] ss:$16 sps:$4 sm:$0xff]  }
 0x341   : > { %3265 = vmatprep.subr.bf16.mxu0 %v8276_v27  ;;  %3530 = vmatprep.subr.bf16.mxu1 %v8279_v28  ;;  %v8349_v28 = vld [vmem:[#allocation10 + $0x4e8] ss:$16 sps:$4 sm:$0xff]  }
 0x344   : > { %3266 = vmatpush1.bf16.msra.mxu0 %v8274_v26  ;;  %3531 = vmatpush1.bf16.msra.mxu1 %v8277_v29  ;;  %v8354_v26 = vld [vmem:[#allocation10 + $0x504] ss:$16 sps:$4 sm:$0xff]  }
 0x345   : > { %3267 = vmatprep.subr.bf16.mxu0 %v8282_v25  ;;  %3532 = vmatprep.subr.bf16.mxu1 %v8285_v30  ;;  %v8357_v30 = vld [vmem:[#allocation10 + $0x50c] ss:$16 sps:$4 sm:$0xff]  }
 0x348   : > { %3268 = vmatpush1.bf16.msra.mxu0 %v8280_v31  ;;  %3533 = vmatpush1.bf16.msra.mxu1 %v8283_v32 }
 0x349   : > { %3269 = vmatprep.subr.bf16.mxu0 %v8288_v33  ;;  %3534 = vmatprep.subr.bf16.mxu1 %v8291_v34 }
 0x34c   : > { %3270 = vmatpush1.bf16.msra.mxu0 %v8286_v35  ;;  %3535 = vmatpush1.bf16.msra.mxu1 %v8289_v36 }
 0x34d   : > { %3271 = vmatprep.subr.bf16.mxu0 %v8294_v37  ;;  %3536 = vmatprep.subr.bf16.mxu1 %v8297_v38  ;;  %v8352_v37 = vld [vmem:[#allocation10 + $0x500] ss:$16 sps:$4 sm:$0xff]  }
 0x350   : > { %3272 = vmatpush1.bf16.msra.mxu0 %v8292_v39  ;;  %3537 = vmatpush1.bf16.msra.mxu1 %v8295_v40  ;;  %v7652_v45 = vpop.f32.mrb[8].mxu1  ;;  %v7672_v46 = vpop.f32.mrb[24].mxu0  ;;  %v8355_v40 = vld [vmem:[#allocation10 + $0x508] ss:$16 sps:$4 sm:$0xff]  }
 0x351   : > { %3273 = vmatprep.subr.bf16.mxu0 %v8300_v41  ;;  %3538 = vmatprep.subr.bf16.mxu1 %v8303_v42  ;;  %v1123_v49 = vpop.f32.mrb[9].mxu1  ;;  %v1193_v50 = vpop.f32.mrb[25].mxu0  ;;  %v8360_v41 = vld [vmem:[#allocation10 + $0x524] ss:$16 sps:$4 sm:$0xff]   ;;  %v8363_v42 = vld [vmem:[#allocation10 + $0x52c] ss:$16 sps:$4 sm:$0xff]  }
 0x352   : > { %v7653_v51 = vpop.f32.mrb[10].mxu1  ;;  %v7673_v52 = vpop.f32.mrb[26].mxu0 }
 0x353   : > { %v10012_v53 = vpack.c.bf16 %v7653_v51, %v7652_v45  ;;  %v1126_v54 = vpop.f32.mrb[11].mxu1  ;;  %v10014_v55 = vpack.c.bf16 %v7673_v52, %v7672_v46  ;;  %v1196_v56 = vpop.f32.mrb[27].mxu0  ;;  %v8366_v45 = vld [vmem:[#allocation10 + $0x544] ss:$16 sps:$4 sm:$0xff]   ;;  %v8369_v46 = vld [vmem:[#allocation10 + $0x54c] ss:$16 sps:$4 sm:$0xff]  }
 0x354   : > { %3274 = vmatpush1.bf16.msra.mxu0 %v8298_v43  ;;  %3539 = vmatpush1.bf16.msra.mxu1 %v8301_v44  ;;  %v10016_v58 = vpack.c.bf16 %v1126_v54, %v1123_v49  ;;  %v1208_v59 = vpack.c.bf16 %v1196_v56, %v1193_v50  ;;  %v8358_v43 = vld [vmem:[#allocation10 + $0x520] ss:$16 sps:$4 sm:$0xff]   ;;  %v8361_v44 = vld [vmem:[#allocation10 + $0x528] ss:$16 sps:$4 sm:$0xff]   ;;  %v8372_v49 = vld [vmem:[#allocation10 + $0x564] ss:$16 sps:$4 sm:$0xff]  }
 0x355   : > { %3296 = vmatprep.subr.bf16.mxu0 %v8306_v47  ;;  %3561 = vmatprep.subr.bf16.mxu1 %v8309_v48  ;;  %v8364_v47 = vld [vmem:[#allocation10 + $0x540] ss:$16 sps:$4 sm:$0xff]   ;;  %v8367_v48 = vld [vmem:[#allocation10 + $0x548] ss:$16 sps:$4 sm:$0xff]   ;;  %v8375_v50 = vld [vmem:[#allocation10 + $0x56c] ss:$16 sps:$4 sm:$0xff]  }
 0x356   : > { %v8370_v51 = vld [vmem:[#allocation10 + $0x560] ss:$16 sps:$4 sm:$0xff]   ;;  %v8373_v52 = vld [vmem:[#allocation10 + $0x568] ss:$16 sps:$4 sm:$0xff]   ;;  %v8378_v54 = vld [vmem:[#allocation10 + $0x584] ss:$16 sps:$4 sm:$0xff]  }
 0x357   : > { %3276 = vmatmul.mubr.bf16.vlgmr.msra.gmra.mrb[32].mxu0 %v10010_v15  ;;  %3541 = vmatmul.mubr.bf16.vlgmr.msra.gmra.mrb[20].mxu1 %v10010_v15  ;;  %v8339_v15 = vld [vmem:[#allocation10 + $0x4ac] ss:$16 sps:$4 sm:$0xff]  }
 0x358   : > { %3285 = vmatprep.mubr.bf16.mxu0 %v10008_v11  ;;  %3297 = vmatpush1.bf16.msra.mxu0 %v8304_v57  ;;  %v8381_v56 = vld [vmem:[#allocation10 + $0x58c] ss:$16 sps:$4 sm:$0xff]   ;;  %v8376_v57 = vld [vmem:[#allocation10 + $0x580] ss:$16 sps:$4 sm:$0xff]  }
 0x359   : > { %3550 = vmatprep.mubr.bf16.mxu1 %v10008_v11  ;;  %3562 = vmatpush1.bf16.msra.mxu1 %v8307_v60  ;;  %v8333_v11 = vld [vmem:[#allocation10 + $0x48c] ss:$16 sps:$4 sm:$0xff]   ;;  %v8384_v60 = vld [vmem:[#allocation10 + $0x5a4] ss:$16 sps:$4 sm:$0xff]  }
 0x35a   : > { %3298 = vmatprep.subr.bf16.mxu0 %v8312_v61  ;;  %3563 = vmatprep.subr.bf16.mxu1 %v8315_v62  ;;  %v8387_v61 = vld [vmem:[#allocation10 + $0x5ac] ss:$16 sps:$4 sm:$0xff]   ;;  %v8382_v62 = vld [vmem:[#allocation10 + $0x5a0] ss:$16 sps:$4 sm:$0xff]  }
 0x35c   : > { %3299 = vmatpush1.bf16.msra.mxu0 %v8310_v63  ;;  %v8385_v63 = vld [vmem:[#allocation10 + $0x5a8] ss:$16 sps:$4 sm:$0xff]  }
 0x35d   : > { %3564 = vmatpush1.bf16.msra.mxu1 %v8313_v0  ;;  %3300 = vmatprep.subr.bf16.mxu0 %v8318_v1  ;;  %v8390_v0 = vld [vmem:[#allocation10 + $0x5c4] ss:$16 sps:$4 sm:$0xff]   ;;  %v8393_v1 = vld [vmem:[#allocation10 + $0x5cc] ss:$16 sps:$4 sm:$0xff]  }
 0x35e   : > { %3565 = vmatprep.subr.bf16.mxu1 %v8321_v2  ;;  %v8388_v2 = vld [vmem:[#allocation10 + $0x5c0] ss:$16 sps:$4 sm:$0xff]  }
 0x35f   : > { %3286 = vmatmul.mubr.bf16.gmra.mrb[36].mxu0 %v10006_v9  ;;  %3551 = vmatmul.mubr.bf16.gmra.mrb[24].mxu1 %v10006_v9  ;;  %v8334_v9 = vld [vmem:[#allocation10 + $0x4a0] ss:$16 sps:$4 sm:$0xff]  }
 0x360   : > { %3301 = vmatpush1.bf16.msra.mxu0 %v8316_v3  ;;  %3328 = vmatprep.mubr.bf16.mxu0 %v1208_v59  ;;  %v8391_v3 = vld [vmem:[#allocation10 + $0x5c8] ss:$16 sps:$4 sm:$0xff]  }
 0x361   : > { %3566 = vmatpush1.bf16.msra.mxu1 %v8319_v4  ;;  %3302 = vmatprep.subr.bf16.mxu0 %v8324_v5  ;;  %v8396_v4 = vld [vmem:[#allocation10 + $0x5e4] ss:$16 sps:$4 sm:$0xff]   ;;  %v8399_v5 = vld [vmem:[#allocation10 + $0x5ec] ss:$16 sps:$4 sm:$0xff]  }
 0x362   : > { %3567 = vmatprep.subr.bf16.mxu1 %v8327_v6  ;;  %3593 = vmatprep.mubr.bf16.mxu1 %v1208_v59  ;;  %v8379_v59 = vld [vmem:[#allocation10 + $0x588] ss:$16 sps:$4 sm:$0xff]   ;;  %v8394_v6 = vld [vmem:[#allocation10 + $0x5e0] ss:$16 sps:$4 sm:$0xff]  }
 0x364   : > { %3303 = vmatpush1.bf16.msra.mxu0 %v8322_v7 }
 0x365   : > { %3568 = vmatpush1.bf16.msra.mxu1 %v8325_v8  ;;  %3304 = vmatprep.subr.bf16.mxu0 %v8330_v10  ;;  %v8397_v8 = vld [vmem:[#allocation10 + $0x5e8] ss:$16 sps:$4 sm:$0xff]   ;;  %v8402_v10 = vld [vmem:[#allocation10 + $0x604] ss:$16 sps:$4 sm:$0xff]  }
 0x366   : > { %3569 = vmatprep.subr.bf16.mxu1 %v8333_v11 }
 0x368   : > { %3305 = vmatpush1.bf16.msra.mxu0 %v8328_v12  ;;  %v8405_v12 = vld [vmem:[#allocation10 + $0x60c] ss:$16 sps:$4 sm:$0xff]  }
 0x369   : > { %3570 = vmatpush1.bf16.msra.mxu1 %v8331_v13  ;;  %3306 = vmatprep.subr.bf16.mxu0 %v8336_v14 }
 0x36a   : > { %3571 = vmatprep.subr.bf16.mxu1 %v8339_v15 }
 0x36c   : > { %3307 = vmatpush1.bf16.msra.mxu0 %v8334_v9 }
 0x36d   : > { %3572 = vmatpush1.bf16.msra.mxu1 %v8337_v16  ;;  %3308 = vmatprep.subr.bf16.mxu0 %v8342_v17  ;;  %v8400_v16 = vld [vmem:[#allocation10 + $0x600] ss:$16 sps:$4 sm:$0xff]   ;;  %v8403_v17 = vld [vmem:[#allocation10 + $0x608] ss:$16 sps:$4 sm:$0xff]  }
 0x36e   : > { %3573 = vmatprep.subr.bf16.mxu1 %v8345_v18  ;;  %v8408_v18 = vld [vmem:[#allocation10 + $0x624] ss:$16 sps:$4 sm:$0xff]  }
 0x370   : > { %3309 = vmatpush1.bf16.msra.mxu0 %v8340_v19  ;;  %v7692_v24 = vpop.f32.mrb[12].mxu1  ;;  %v7712_v27 = vpop.f32.mrb[28].mxu0  ;;  %v8411_v19 = vld [vmem:[#allocation10 + $0x62c] ss:$16 sps:$4 sm:$0xff]  }
 0x371   : > { %3574 = vmatpush1.bf16.msra.mxu1 %v8343_v20  ;;  %3310 = vmatprep.subr.bf16.mxu0 %v8348_v21  ;;  %v1263_v29 = vpop.f32.mrb[13].mxu1  ;;  %v1333_v25 = vpop.f32.mrb[29].mxu0  ;;  %v8406_v20 = vld [vmem:[#allocation10 + $0x620] ss:$16 sps:$4 sm:$0xff]   ;;  %v8409_v21 = vld [vmem:[#allocation10 + $0x628] ss:$16 sps:$4 sm:$0xff]  }
 0x372   : > { %3575 = vmatprep.subr.bf16.mxu1 %v8351_v22  ;;  %v7693_v31 = vpop.f32.mrb[14].mxu1  ;;  %v7713_v32 = vpop.f32.mrb[30].mxu0  ;;  %v8414_v22 = vld [vmem:[#allocation10 + $0x644] ss:$16 sps:$4 sm:$0xff]  }
 0x373   : > { %v10024_v33 = vpack.c.bf16 %v7693_v31, %v7692_v24  ;;  %v1266_v34 = vpop.f32.mrb[15].mxu1  ;;  %v10026_v35 = vpack.c.bf16 %v7713_v32, %v7712_v27  ;;  %v1336_v36 = vpop.f32.mrb[31].mxu0  ;;  %v8412_v24 = vld [vmem:[#allocation10 + $0x640] ss:$16 sps:$4 sm:$0xff]   ;;  %v8415_v27 = vld [vmem:[#allocation10 + $0x648] ss:$16 sps:$4 sm:$0xff]  }
 0x374   : > { %3311 = vmatpush1.bf16.msra.mxu0 %v8346_v23  ;;  %v10028_v38 = vpack.c.bf16 %v1266_v34, %v1263_v29  ;;  %v10030_v39 = vpack.c.bf16 %v1336_v36, %v1333_v25  ;;  %v8417_v23 = vld [vmem:[#allocation10 + $0x64c] ss:$16 sps:$4 sm:$0xff]   ;;  %v8426_v29 = vld [vmem:[#allocation10 + $0x684] ss:$16 sps:$4 sm:$0xff]   ;;  %v8427_v31 = vld [vmem:[#allocation10 + $0x688] ss:$16 sps:$4 sm:$0xff]  }
 0x375   : > { %3576 = vmatpush1.bf16.msra.mxu1 %v8349_v28  ;;  %3312 = vmatprep.subr.bf16.mxu0 %v8354_v26  ;;  %v8420_v28 = vld [vmem:[#allocation10 + $0x664] ss:$16 sps:$4 sm:$0xff]   ;;  %v8421_v26 = vld [vmem:[#allocation10 + $0x668] ss:$16 sps:$4 sm:$0xff]   ;;  %v8429_v25 = vld [vmem:[#allocation10 + $0x68c] ss:$16 sps:$4 sm:$0xff]  }
 0x376   : > { %3577 = vmatprep.subr.bf16.mxu1 %v8357_v30  ;;  %v8424_v30 = vld [vmem:[#allocation10 + $0x680] ss:$16 sps:$4 sm:$0xff]   ;;  %v8432_v32 = vld [vmem:[#allocation10 + $0x6a4] ss:$16 sps:$4 sm:$0xff]   ;;  %v8433_v36 = vld [vmem:[#allocation10 + $0x6a8] ss:$16 sps:$4 sm:$0xff]  }
 0x377   : > { %v8430_v34 = vld [vmem:[#allocation10 + $0x6a0] ss:$16 sps:$4 sm:$0xff]  }
 0x378   : > { %3313 = vmatpush1.bf16.msra.mxu0 %v8352_v37  ;;  %v8438_v37 = vld [vmem:[#allocation10 + $0x6c4] ss:$16 sps:$4 sm:$0xff]  }
 0x379   : > { %3578 = vmatpush1.bf16.msra.mxu1 %v8355_v40  ;;  %3314 = vmatprep.subr.bf16.mxu0 %v8360_v41  ;;  %v8436_v40 = vld [vmem:[#allocation10 + $0x6c0] ss:$16 sps:$4 sm:$0xff]   ;;  %v8439_v41 = vld [vmem:[#allocation10 + $0x6c8] ss:$16 sps:$4 sm:$0xff]  }
 0x37a   : > { %3579 = vmatprep.subr.bf16.mxu1 %v8363_v42  ;;  %v8444_v42 = vld [vmem:[#allocation10 + $0x6e4] ss:$16 sps:$4 sm:$0xff]  }
 0x37c   : > { %3315 = vmatpush1.bf16.msra.mxu0 %v8358_v43  ;;  %v8447_v43 = vld [vmem:[#allocation10 + $0x6ec] ss:$16 sps:$4 sm:$0xff]  }
 0x37d   : > { %3580 = vmatpush1.bf16.msra.mxu1 %v8361_v44  ;;  %3316 = vmatprep.subr.bf16.mxu0 %v8366_v45  ;;  %v8442_v44 = vld [vmem:[#allocation10 + $0x6e0] ss:$16 sps:$4 sm:$0xff]   ;;  %v8445_v45 = vld [vmem:[#allocation10 + $0x6e8] ss:$16 sps:$4 sm:$0xff]  }
 0x37e   : > { %3581 = vmatprep.subr.bf16.mxu1 %v8369_v46  ;;  %v8450_v46 = vld [vmem:[#allocation10 + $0x704] ss:$16 sps:$4 sm:$0xff]  }
 0x380   : > { %3317 = vmatpush1.bf16.msra.mxu0 %v8364_v47  ;;  %v8453_v47 = vld [vmem:[#allocation10 + $0x70c] ss:$16 sps:$4 sm:$0xff]  }
 0x381   : > { %3582 = vmatpush1.bf16.msra.mxu1 %v8367_v48  ;;  %3318 = vmatprep.subr.bf16.mxu0 %v8372_v49  ;;  %v8448_v48 = vld [vmem:[#allocation10 + $0x700] ss:$16 sps:$4 sm:$0xff]   ;;  %v8451_v49 = vld [vmem:[#allocation10 + $0x708] ss:$16 sps:$4 sm:$0xff]  }
 0x382   : > { %3583 = vmatprep.subr.bf16.mxu1 %v8375_v50  ;;  %v8456_v50 = vld [vmem:[#allocation10 + $0x724] ss:$16 sps:$4 sm:$0xff]  }
 0x384   : > { %3319 = vmatpush1.bf16.msra.mxu0 %v8370_v51  ;;  %v8459_v51 = vld [vmem:[#allocation10 + $0x72c] ss:$16 sps:$4 sm:$0xff]  }
 0x385   : > { %3584 = vmatpush1.bf16.msra.mxu1 %v8373_v52  ;;  %3320 = vmatprep.subr.bf16.mxu0 %v8378_v54  ;;  %v8454_v52 = vld [vmem:[#allocation10 + $0x720] ss:$16 sps:$4 sm:$0xff]   ;;  %v8457_v54 = vld [vmem:[#allocation10 + $0x728] ss:$16 sps:$4 sm:$0xff]  }
 0x386   : > { %3585 = vmatprep.subr.bf16.mxu1 %v8381_v56  ;;  %v8462_v56 = vld [vmem:[#allocation10 + $0x744] ss:$16 sps:$4 sm:$0xff]  }
 0x388   : > { %3321 = vmatpush1.bf16.msra.mxu0 %v8376_v57  ;;  %v8465_v57 = vld [vmem:[#allocation10 + $0x74c] ss:$16 sps:$4 sm:$0xff]  }
 0x389   : > { %3586 = vmatpush1.bf16.msra.mxu1 %v8379_v59  ;;  %3322 = vmatprep.subr.bf16.mxu0 %v8384_v60  ;;  %v8460_v59 = vld [vmem:[#allocation10 + $0x740] ss:$16 sps:$4 sm:$0xff]   ;;  %v8463_v60 = vld [vmem:[#allocation10 + $0x748] ss:$16 sps:$4 sm:$0xff]  }
 0x38a   : > { %3587 = vmatprep.subr.bf16.mxu1 %v8387_v61  ;;  %v8468_v61 = vld [vmem:[#allocation10 + $0x764] ss:$16 sps:$4 sm:$0xff]  }
 0x38c   : > { %3323 = vmatpush1.bf16.msra.mxu0 %v8382_v62  ;;  %v8471_v62 = vld [vmem:[#allocation10 + $0x76c] ss:$16 sps:$4 sm:$0xff]  }
 0x38d   : > { %3588 = vmatpush1.bf16.msra.mxu1 %v8385_v63  ;;  %3324 = vmatprep.subr.bf16.mxu0 %v8390_v0  ;;  %v8466_v63 = vld [vmem:[#allocation10 + $0x760] ss:$16 sps:$4 sm:$0xff]   ;;  %v8469_v0 = vld [vmem:[#allocation10 + $0x768] ss:$16 sps:$4 sm:$0xff]  }
 0x38e   : > { %3589 = vmatprep.subr.bf16.mxu1 %v8393_v1  ;;  %v8474_v1 = vld [vmem:[#allocation10 + $0x784] ss:$16 sps:$4 sm:$0xff]  }
 0x390   : > { %3325 = vmatpush1.bf16.msra.mxu0 %v8388_v2  ;;  %v7732_v7 = vpop.f32.mrb[16].mxu1  ;;  %v8477_v2 = vld [vmem:[#allocation10 + $0x78c] ss:$16 sps:$4 sm:$0xff]  }
 0x391   : > { %3590 = vmatpush1.bf16.msra.mxu1 %v8391_v3  ;;  %3326 = vmatprep.subr.bf16.mxu0 %v8396_v4  ;;  %v1403_v11 = vpop.f32.mrb[17].mxu1  ;;  %v8472_v3 = vld [vmem:[#allocation10 + $0x780] ss:$16 sps:$4 sm:$0xff]   ;;  %v8475_v4 = vld [vmem:[#allocation10 + $0x788] ss:$16 sps:$4 sm:$0xff]  }
 0x392   : > { %3591 = vmatprep.subr.bf16.mxu1 %v8399_v5  ;;  %v7733_v13 = vpop.f32.mrb[18].mxu1  ;;  %v8480_v5 = vld [vmem:[#allocation10 + $0x7a4] ss:$16 sps:$4 sm:$0xff]  }
 0x393   : > { %v10032_v14 = vpack.c.bf16 %v7733_v13, %v7732_v7  ;;  %v1406_v15 = vpop.f32.mrb[19].mxu1  ;;  %v8478_v7 = vld [vmem:[#allocation10 + $0x7a0] ss:$16 sps:$4 sm:$0xff]   ;;  %v8487_v13 = vld [vmem:[#allocation10 + $0x7c8] ss:$16 sps:$4 sm:$0xff]  }
 0x394   : > { %3327 = vmatpush1.bf16.msra.mxu0 %v8394_v6  ;;  %v10034_v9 = vpack.c.bf16 %v1406_v15, %v1403_v11  ;;  %v8483_v6 = vld [vmem:[#allocation10 + $0x7ac] ss:$16 sps:$4 sm:$0xff]   ;;  %v8492_v15 = vld [vmem:[#allocation10 + $0x7e4] ss:$16 sps:$4 sm:$0xff]  }
 0x395   : > { %3592 = vmatpush1.bf16.msra.mxu1 %v8397_v8  ;;  %3349 = vmatprep.subr.bf16.mxu0 %v8402_v10  ;;  %v8481_v8 = vld [vmem:[#allocation10 + $0x7a8] ss:$16 sps:$4 sm:$0xff]   ;;  %v8486_v10 = vld [vmem:[#allocation10 + $0x7c4] ss:$16 sps:$4 sm:$0xff]   ;;  %v8489_v11 = vld [vmem:[#allocation10 + $0x7cc] ss:$16 sps:$4 sm:$0xff]  }
 0x396   : > { %3614 = vmatprep.subr.bf16.mxu1 %v8405_v12  ;;  %v8484_v12 = vld [vmem:[#allocation10 + $0x7c0] ss:$16 sps:$4 sm:$0xff]  }
 0x397   : > { %3329 = vmatmul.mubr.bf16.vlgmr.msra.gmra.mrb[32].mxu0 %v10016_v58 }
 0x398   : > { %3594 = vmatmul.mubr.bf16.vlgmr.msra.gmra.mrb[20].mxu1 %v10016_v58  ;;  %3338 = vmatprep.mubr.bf16.mxu0 %v10014_v55  ;;  %v8423_v58 = vld [vmem:[#allocation10 + $0x66c] ss:$16 sps:$4 sm:$0xff]  }
 0x399   : > { %3350 = vmatpush1.bf16.msra.mxu0 %v8400_v16  ;;  %3603 = vmatprep.mubr.bf16.mxu1 %v10014_v55  ;;  %v8418_v55 = vld [vmem:[#allocation10 + $0x660] ss:$16 sps:$4 sm:$0xff]   ;;  %v8495_v16 = vld [vmem:[#allocation10 + $0x7ec] ss:$16 sps:$4 sm:$0xff]  }
 0x39a   : > { %3615 = vmatpush1.bf16.msra.mxu1 %v8403_v17  ;;  %3351 = vmatprep.subr.bf16.mxu0 %v8408_v18  ;;  %v8490_v17 = vld [vmem:[#allocation10 + $0x7e0] ss:$16 sps:$4 sm:$0xff]   ;;  %v8493_v18 = vld [vmem:[#allocation10 + $0x7e8] ss:$16 sps:$4 sm:$0xff]  }
 0x39b   : > { %3616 = vmatprep.subr.bf16.mxu1 %v8411_v19  ;;  %v8498_v19 = vld [vmem:[#allocation10 + $0x804] ss:$16 sps:$4 sm:$0xff]  }
 0x39d   : > { %3352 = vmatpush1.bf16.msra.mxu0 %v8406_v20  ;;  %v8501_v20 = vld [vmem:[#allocation10 + $0x80c] ss:$16 sps:$4 sm:$0xff]  }
 0x39e   : > { %3617 = vmatpush1.bf16.msra.mxu1 %v8409_v21  ;;  %3353 = vmatprep.subr.bf16.mxu0 %v8414_v22  ;;  %v8496_v21 = vld [vmem:[#allocation10 + $0x800] ss:$16 sps:$4 sm:$0xff]   ;;  %v8499_v22 = vld [vmem:[#allocation10 + $0x808] ss:$16 sps:$4 sm:$0xff]  }
 0x39f   : > { %3339 = vmatmul.mubr.bf16.gmra.mrb[36].mxu0 %v10012_v53  ;;  %3618 = vmatprep.subr.bf16.mxu1 %v8417_v23  ;;  %v8504_v23 = vld [vmem:[#allocation10 + $0x824] ss:$16 sps:$4 sm:$0xff]  }
 0x3a0   : > { %3604 = vmatmul.mubr.bf16.gmra.mrb[24].mxu1 %v10012_v53  ;;  %3381 = vmatprep.mubr.bf16.mxu0 %v10030_v39  ;;  %v8435_v53 = vld [vmem:[#allocation10 + $0x6ac] ss:$16 sps:$4 sm:$0xff]  }
 0x3a1   : > { %3354 = vmatpush1.bf16.msra.mxu0 %v8412_v24  ;;  %3646 = vmatprep.mubr.bf16.mxu1 %v10030_v39  ;;  %v8441_v39 = vld [vmem:[#allocation10 + $0x6cc] ss:$16 sps:$4 sm:$0xff]  }
 0x3a2   : > { %3619 = vmatpush1.bf16.msra.mxu1 %v8415_v27  ;;  %3355 = vmatprep.subr.bf16.mxu0 %v8420_v28  ;;  %v8507_v24 = vld [vmem:[#allocation10 + $0x82c] ss:$16 sps:$4 sm:$0xff]   ;;  %v8502_v27 = vld [vmem:[#allocation10 + $0x820] ss:$16 sps:$4 sm:$0xff]   ;;  %v8505_v28 = vld [vmem:[#allocation10 + $0x828] ss:$16 sps:$4 sm:$0xff]  }
 0x3a3   : > { %3620 = vmatprep.subr.bf16.mxu1 %v8423_v58  ;;  %v8510_v58 = vld [vmem:[#allocation10 + $0x844] ss:$16 sps:$4 sm:$0xff]  }
 0x3a5   : > { %3356 = vmatpush1.bf16.msra.mxu0 %v8418_v55  ;;  %v8513_v55 = vld [vmem:[#allocation10 + $0x84c] ss:$16 sps:$4 sm:$0xff]  }
 0x3a6   : > { %3621 = vmatpush1.bf16.msra.mxu1 %v8421_v26  ;;  %3357 = vmatprep.subr.bf16.mxu0 %v8426_v29  ;;  %v8508_v26 = vld [vmem:[#allocation10 + $0x840] ss:$16 sps:$4 sm:$0xff]   ;;  %v8511_v29 = vld [vmem:[#allocation10 + $0x848] ss:$16 sps:$4 sm:$0xff]  }
 0x3a7   : > { %3622 = vmatprep.subr.bf16.mxu1 %v8429_v25  ;;  %v8516_v25 = vld [vmem:[#allocation10 + $0x864] ss:$16 sps:$4 sm:$0xff]  }
 0x3a9   : > { %3358 = vmatpush1.bf16.msra.mxu0 %v8424_v30  ;;  %v8514_v30 = vld [vmem:[#allocation10 + $0x860] ss:$16 sps:$4 sm:$0xff]  }
 0x3aa   : > { %3623 = vmatpush1.bf16.msra.mxu1 %v8427_v31  ;;  %3359 = vmatprep.subr.bf16.mxu0 %v8432_v32  ;;  %v8517_v31 = vld [vmem:[#allocation10 + $0x868] ss:$16 sps:$4 sm:$0xff]   ;;  %v8522_v32 = vld [vmem:[#allocation10 + $0x884] ss:$16 sps:$4 sm:$0xff]  }
 0x3ab   : > { %3624 = vmatprep.subr.bf16.mxu1 %v8435_v53  ;;  %v8525_v53 = vld [vmem:[#allocation10 + $0x88c] ss:$16 sps:$4 sm:$0xff]  }
 0x3ad   : > { %3360 = vmatpush1.bf16.msra.mxu0 %v8430_v34  ;;  %v8520_v34 = vld [vmem:[#allocation10 + $0x880] ss:$16 sps:$4 sm:$0xff]  }
 0x3ae   : > { %3625 = vmatpush1.bf16.msra.mxu1 %v8433_v36  ;;  %3361 = vmatprep.subr.bf16.mxu0 %v8438_v37  ;;  %v8523_v36 = vld [vmem:[#allocation10 + $0x888] ss:$16 sps:$4 sm:$0xff]   ;;  %v8528_v37 = vld [vmem:[#allocation10 + $0x8a4] ss:$16 sps:$4 sm:$0xff]  }
 0x3af   : > { %3626 = vmatprep.subr.bf16.mxu1 %v8441_v39  ;;  %v8531_v39 = vld [vmem:[#allocation10 + $0x8ac] ss:$16 sps:$4 sm:$0xff]  }
 0x3b1   : > { %3362 = vmatpush1.bf16.msra.mxu0 %v8436_v40  ;;  %v8529_v40 = vld [vmem:[#allocation10 + $0x8a8] ss:$16 sps:$4 sm:$0xff]  }
 0x3b2   : > { %3627 = vmatpush1.bf16.msra.mxu1 %v8439_v41  ;;  %3363 = vmatprep.subr.bf16.mxu0 %v8444_v42  ;;  %v8534_v41 = vld [vmem:[#allocation10 + $0x8c4] ss:$16 sps:$4 sm:$0xff]   ;;  %v8537_v42 = vld [vmem:[#allocation10 + $0x8cc] ss:$16 sps:$4 sm:$0xff]  }
 0x3b3   : > { %3628 = vmatprep.subr.bf16.mxu1 %v8447_v43  ;;  %v8532_v43 = vld [vmem:[#allocation10 + $0x8c0] ss:$16 sps:$4 sm:$0xff]  }
 0x3b5   : > { %3364 = vmatpush1.bf16.msra.mxu0 %v8442_v44  ;;  %v8535_v44 = vld [vmem:[#allocation10 + $0x8c8] ss:$16 sps:$4 sm:$0xff]  }
 0x3b6   : > { %3629 = vmatpush1.bf16.msra.mxu1 %v8445_v45  ;;  %3365 = vmatprep.subr.bf16.mxu0 %v8450_v46  ;;  %v8540_v45 = vld [vmem:[#allocation10 + $0x8e4] ss:$16 sps:$4 sm:$0xff]   ;;  %v8543_v46 = vld [vmem:[#allocation10 + $0x8ec] ss:$16 sps:$4 sm:$0xff]  }
 0x3b7   : > { %3630 = vmatprep.subr.bf16.mxu1 %v8453_v47  ;;  %v8538_v47 = vld [vmem:[#allocation10 + $0x8e0] ss:$16 sps:$4 sm:$0xff]  }
 0x3b9   : > { %3366 = vmatpush1.bf16.msra.mxu0 %v8448_v48  ;;  %v8541_v48 = vld [vmem:[#allocation10 + $0x8e8] ss:$16 sps:$4 sm:$0xff]  }
 0x3ba   : > { %3631 = vmatpush1.bf16.msra.mxu1 %v8451_v49  ;;  %3367 = vmatprep.subr.bf16.mxu0 %v8456_v50  ;;  %v1730_v49 = vlaneseq }
 0x3bb   : > { %3632 = vmatprep.subr.bf16.mxu1 %v8459_v51 }
 0x3bc   : > { %v1731_v50 = vshrl.u32 %v1730_v49, 7 }
 0x3bd   : > { %3368 = vmatpush1.bf16.msra.mxu0 %v8454_v52  ;;  %v1728_v52 = vld [vmem:[#allocation12] sm:$0xf] }
 0x3be   : > { %3633 = vmatpush1.bf16.msra.mxu1 %v8457_v54  ;;  %3369 = vmatprep.subr.bf16.mxu0 %v8462_v56  ;;  %v1732_v51 = vsub.s32 0, %v1731_v50  ;;  %v1740_v54 = vsub.s32 2, %v1731_v50  ;;  %v1736_v56 = vsub.s32 1, %v1731_v50 }
 0x3bf   : > { %3634 = vmatprep.subr.bf16.mxu1 %v8465_v57  ;;  %v1744_v57 = vsub.s32 3, %v1731_v50 }
 0x3c1   : > { %3370 = vmatpush1.bf16.msra.mxu0 %v8460_v59  ;;  %v1733_v59 = vrot.slane %v1728_v52, %v1732_v51 }
 0x3c2   : > { %3635 = vmatpush1.bf16.msra.mxu1 %v8463_v60  ;;  %3371 = vmatprep.subr.bf16.mxu0 %v8468_v61  ;;  %v1741_v60 = vrot.slane %v1728_v52, %v1740_v54  ;;  %v1737_v61 = vrot.slane %v1728_v52, %v1736_v56 }
 0x3c3   : > { %3636 = vmatprep.subr.bf16.mxu1 %v8471_v62  ;;  %v1745_v62 = vrot.slane %v1728_v52, %v1744_v57 }
 0x3c5   : > { %3372 = vmatpush1.bf16.msra.mxu0 %v8466_v63 }
 0x3c6   : > { %3637 = vmatpush1.bf16.msra.mxu1 %v8469_v0  ;;  %3373 = vmatprep.subr.bf16.mxu0 %v8474_v1 }
 0x3c7   : > { %3638 = vmatprep.subr.bf16.mxu1 %v8477_v2 }
 0x3c9   : > { %3374 = vmatpush1.bf16.msra.mxu0 %v8472_v3 }
 0x3ca   : > { %3639 = vmatpush1.bf16.msra.mxu1 %v8475_v4  ;;  %3375 = vmatprep.subr.bf16.mxu0 %v8480_v5 }
 0x3cb   : > { %3640 = vmatprep.subr.bf16.mxu1 %v8483_v6 }
 0x3cd   : > { %3376 = vmatpush1.bf16.msra.mxu0 %v8478_v7 }
 0x3ce   : > { %3641 = vmatpush1.bf16.msra.mxu1 %v8481_v8  ;;  %3377 = vmatprep.subr.bf16.mxu0 %v8486_v10 }
 0x3cf   : > { %3642 = vmatprep.subr.bf16.mxu1 %v8489_v11 }
 0x3d1   : > { %3378 = vmatpush1.bf16.msra.mxu0 %v8484_v12 }
 0x3d2   : > { %3643 = vmatpush1.bf16.msra.mxu1 %v8487_v13  ;;  %3379 = vmatprep.subr.bf16.mxu0 %v8492_v15 }
 0x3d3   : > { %3644 = vmatprep.subr.bf16.mxu1 %v8495_v16 }
 0x3d5   : > { %3380 = vmatpush1.bf16.msra.mxu0 %v8490_v17 }
 0x3d6   : > { %3645 = vmatpush1.bf16.msra.mxu1 %v8493_v18  ;;  %3402 = vmatprep.subr.bf16.mxu0 %v8498_v19 }
 0x3d7   : > { %3667 = vmatprep.subr.bf16.mxu1 %v8501_v20 }
 0x3d8   : > { %3382 = vmatmul.mubr.bf16.vlgmr.msra.gmra.mrb[32].mxu0 %v10028_v38 }
 0x3d9   : > { %3647 = vmatmul.mubr.bf16.vlgmr.msra.gmra.mrb[20].mxu1 %v10028_v38  ;;  %3391 = vmatprep.mubr.bf16.mxu0 %v10026_v35  ;;  %v8519_v38 = vld [vmem:[#allocation10 + $0x86c] ss:$16 sps:$4 sm:$0xff]  }
 0x3da   : > { %3403 = vmatpush1.bf16.msra.mxu0 %v8496_v21  ;;  %3656 = vmatprep.mubr.bf16.mxu1 %v10026_v35  ;;  %v9378_v35 = vmov 0  }
 0x3db   : > { %3668 = vmatpush1.bf16.msra.mxu1 %v8499_v22  ;;  %3404 = vmatprep.subr.bf16.mxu0 %v8504_v23 }
 0x3dc   : > { %3669 = vmatprep.subr.bf16.mxu1 %v8507_v24 }
 0x3de   : > { %3405 = vmatpush1.bf16.msra.mxu0 %v8502_v27 }
 0x3df   : > { %3670 = vmatpush1.bf16.msra.mxu1 %v8505_v28  ;;  %3406 = vmatprep.subr.bf16.mxu0 %v8510_v58 }
 0x3e0   : > { %3392 = vmatmul.mubr.bf16.gmra.mrb[36].mxu0 %v10024_v33  ;;  %3671 = vmatprep.subr.bf16.mxu1 %v8513_v55 }
 0x3e1   : > { %3657 = vmatmul.mubr.bf16.gmra.mrb[24].mxu1 %v10024_v33  ;;  %3434 = vmatprep.mubr.bf16.mxu0 %v9378_v35  ;;  %v8526_v33 = vld [vmem:[#allocation10 + $0x8a0] ss:$16 sps:$4 sm:$0xff]  }
 0x3e2   : > { %3407 = vmatpush1.bf16.msra.mxu0 %v8508_v26  ;;  %3699 = vmatprep.mubr.bf16.mxu1 %v9378_v35 }
 0x3e3   : > { %3672 = vmatpush1.bf16.msra.mxu1 %v8511_v29  ;;  %3408 = vmatprep.subr.bf16.mxu0 %v8516_v25 }
 0x3e4   : > { %3673 = vmatprep.subr.bf16.mxu1 %v8519_v38 }
 0x3e6   : > { %3409 = vmatpush1.bf16.msra.mxu0 %v8514_v30 }
 0x3e7   : > { %3674 = vmatpush1.bf16.msra.mxu1 %v8517_v31  ;;  %3410 = vmatprep.subr.bf16.mxu0 %v8522_v32 }
 0x3e8   : > { %3675 = vmatprep.subr.bf16.mxu1 %v8525_v53 }
 0x3ea   : > { %3411 = vmatpush1.bf16.msra.mxu0 %v8520_v34 }
 0x3eb   : > { %3676 = vmatpush1.bf16.msra.mxu1 %v8523_v36  ;;  %3412 = vmatprep.subr.bf16.mxu0 %v8528_v37 }
 0x3ec   : > { %3677 = vmatprep.subr.bf16.mxu1 %v8531_v39 }
 0x3ee   : > { %3413 = vmatpush1.bf16.msra.mxu0 %v8526_v33 }
 0x3ef   : > { %3678 = vmatpush1.bf16.msra.mxu1 %v8529_v40  ;;  %3414 = vmatprep.subr.bf16.mxu0 %v8534_v41 }
 0x3f0   : > { %3679 = vmatprep.subr.bf16.mxu1 %v8537_v42 }
 0x3f2   : > { %3415 = vmatpush1.bf16.msra.mxu0 %v8532_v43 }
 0x3f3   : > { %3680 = vmatpush1.bf16.msra.mxu1 %v8535_v44  ;;  %3416 = vmatprep.subr.bf16.mxu0 %v8540_v45 }
 0x3f4   : > { %3681 = vmatprep.subr.bf16.mxu1 %v8543_v46 }
 0x3f6   : > { %3417 = vmatpush1.bf16.msra.mxu0 %v8538_v47 }
 0x3f7   : > { %3682 = vmatpush1.bf16.msra.mxu1 %v8541_v48 }
 0x3f9   : > { %3435 = vmatmul.mubr.bf16.vlgmr.msra.gmra.mrb[32].mxu0 %v10034_v9 }
 0x3fa   : > { %3700 = vmatmul.mubr.bf16.vlgmr.msra.gmra.mrb[20].mxu1 %v10034_v9  ;;  %3444 = vmatprep.mubr.bf16.mxu0 %v9378_v35 }
 0x3fb   : > { %3709 = vmatprep.mubr.bf16.mxu1 %v9378_v35 }
 0x401   : > { %3445 = vmatmul.mubr.bf16.gmra.mrb[36].mxu0 %v10032_v14 }
 0x402   : > { %3710 = vmatmul.mubr.bf16.gmra.mrb[24].mxu1 %v10032_v14 }
 0x4cc   : > { %v3436_v63 = vpop.f32.mrb[32].mxu0 }
 0x4cd   : > { %v7830_v0 = vadd.f32 %v3436_v63, %v1733_v59  ;;  %v3701_v9 = vpop.f32.mrb[20].mxu1  ;;  %v3438_v1 = vpop.f32.mrb[33].mxu0 }
 0x4ce   : > { %v7838_v2 = vadd.f32 %v3701_v9, %v1741_v60  ;;  %v7831_v3 = vadd.f32 %v3438_v1, %v1737_v61  ;;  %v3703_v4 = vpop.f32.mrb[21].mxu1  ;;  %v3440_v5 = vpop.f32.mrb[34].mxu0 }
 0x4cf   : > { %v3720_v14 = vmax.f32 %v7830_v0, 0.0  ;;  %v7839_v6 = vadd.f32 %v3703_v4, %v1745_v62  ;;  %v7832_v7 = vadd.f32 %v3440_v5, %v1733_v59  ;;  %v3705_v8 = vpop.f32.mrb[22].mxu1  ;;  %v3442_v10 = vpop.f32.mrb[35].mxu0 }
 0x4d0   : > { %v3722_v11 = vmax.f32 %v7838_v2, 0.0  ;;  %v3721_v12 = vmax.f32 %v7831_v3, 0.0  ;;  %v7840_v13 = vadd.f32 %v3705_v8, %v1741_v60  ;;  %v7833_v15 = vadd.f32 %v3442_v10, %v1737_v61  ;;  %v3707_v16 = vpop.f32.mrb[23].mxu1 }
 0x4d1   : > { %3736 = vst [vmem:[#allocation3] sm:$0xff] %v3720_v14  ;;  %v3723_v17 = vmax.f32 %v7839_v6, 0.0  ;;  %v3724_v18 = vmax.f32 %v7832_v7, 0.0  ;;  %v7841_v19 = vadd.f32 %v3707_v16, %v1745_v62 }
 0x4d2   : > { %3738 = vst [vmem:[#allocation3 + $0x10] sm:$0xff] %v3722_v11  ;;  %3737 = vst [vmem:[#allocation3 + $0x8] sm:$0xff] %v3721_v12  ;;  %v3726_v20 = vmax.f32 %v7840_v13, 0.0  ;;  %v3725_v21 = vmax.f32 %v7833_v15, 0.0 }
 0x4d3   : > { %3739 = vst [vmem:[#allocation3 + $0x18] sm:$0xff] %v3723_v17  ;;  %3740 = vst [vmem:[#allocation3 + $0x20] sm:$0xff] %v3724_v18  ;;  %v3727_v22 = vmax.f32 %v7841_v19, 0.0 }
 0x4d4   : > { %3742 = vst [vmem:[#allocation3 + $0x30] sm:$0xff] %v3726_v20  ;;  %3741 = vst [vmem:[#allocation3 + $0x28] sm:$0xff] %v3725_v21  ;;  %v3446_v23 = vpop.f32.mrb[36].mxu0 }
 0x4d5   : > { %3743 = vst [vmem:[#allocation3 + $0x38] sm:$0xff] %v3727_v22  ;;  %v7834_v24 = vadd.f32 %v3446_v23, %v1733_v59  ;;  %v3711_v27 = vpop.f32.mrb[24].mxu1  ;;  %v3448_v28 = vpop.f32.mrb[37].mxu0 }
 0x4d6   : > { %v7842_v58 = vadd.f32 %v3711_v27, %v1741_v60  ;;  %v7835_v55 = vadd.f32 %v3448_v28, %v1737_v61  ;;  %v3713_v26 = vpop.f32.mrb[25].mxu1  ;;  %v3450_v29 = vpop.f32.mrb[38].mxu0 }
 0x4d7   : > { %v3728_v25 = vmax.f32 %v7834_v24, 0.0  ;;  %v7843_v38 = vadd.f32 %v3713_v26, %v1745_v62  ;;  %v7836_v35 = vadd.f32 %v3450_v29, %v1733_v59  ;;  %v3715_v30 = vpop.f32.mrb[26].mxu1  ;;  %v3452_v31 = vpop.f32.mrb[39].mxu0 }
 0x4d8   : > { %v3730_v32 = vmax.f32 %v7842_v58, 0.0  ;;  %v3729_v53 = vmax.f32 %v7835_v55, 0.0  ;;  %v7844_v34 = vadd.f32 %v3715_v30, %v1741_v60  ;;  %v7837_v36 = vadd.f32 %v3452_v31, %v1737_v61  ;;  %v3717_v37 = vpop.f32.mrb[27].mxu1 }
 0x4d9   : > { %3744 = vst [vmem:[#allocation3 + $0x40] sm:$0xff] %v3728_v25  ;;  %v3731_v39 = vmax.f32 %v7843_v38, 0.0  ;;  %v3732_v33 = vmax.f32 %v7836_v35, 0.0  ;;  %v7845_v40 = vadd.f32 %v3717_v37, %v1745_v62 }
 0x4da   : > { %3746 = vst [vmem:[#allocation3 + $0x50] sm:$0xff] %v3730_v32  ;;  %3745 = vst [vmem:[#allocation3 + $0x48] sm:$0xff] %v3729_v53  ;;  %v3734_v41 = vmax.f32 %v7844_v34, 0.0  ;;  %v3733_v42 = vmax.f32 %v7837_v36, 0.0 }
 0x4db   : > { %3747 = vst [vmem:[#allocation3 + $0x58] sm:$0xff] %v3731_v39  ;;  %3748 = vst [vmem:[#allocation3 + $0x60] sm:$0xff] %v3732_v33  ;;  %v3735_v43 = vmax.f32 %v7845_v40, 0.0 }
 0x4dc   : > { %3750 = vst [vmem:[#allocation3 + $0x70] sm:$0xff] %v3734_v41  ;;  %3749 = vst [vmem:[#allocation3 + $0x68] sm:$0xff] %v3733_v42 }
 0x4dd   : > { %3751 = vst [vmem:[#allocation3 + $0x78] sm:$0xff] %v3735_v43 }
 0x4de PF: > { %p7087_p6 = scmp.ge.s32.totalorder %s9465_s27, 5 }
 0x4df   : > { %v8544_v44 = vld [vmem:[%s9777_s14 + $0x4] ss:$16 sps:$4 sm:$0xff] (!%p7087_p6)   ;;  %v8546_v45 = vld [vmem:[%s9777_s14 + $0xc] ss:$16 sps:$4 sm:$0xff] (!%p7087_p6)   ;;  %v8548_v46 = vld [vmem:[%s9777_s14] ss:$16 sps:$4 sm:$0xff] (!%p7087_p6)  }
 0x4e0   : > { %3755 = sbr.rel (%p7087_p6) target bundleno = 1651 (0x673), region = 112  ;;  %4570 = vmatprep.subr.bf16.mxu0 (!%p7087_p6), %v8544_v44  ;;  %v8549_v47 = vld [vmem:[%s9777_s14 + $0x8] ss:$16 sps:$4 sm:$0xff] (!%p7087_p6)   ;;  %4676 = vmatprep.subr.bf16.mxu1 (!%p7087_p6), %v8546_v45  ;;  %v8550_v48 = vld [vmem:[%s9777_s14 + $0x24] ss:$16 sps:$4 sm:$0xff] (!%p7087_p6)   ;;  %s7216_s29 = sshll.u32 (!%p7087_p6), %s9465_s27, 5 }
 0x4e1   : > { %4571 = vmatpush1.bf16.msra.mxu0 (!%p7087_p6), %v8548_v46  ;;  %4677 = vmatpush1.bf16.msra.mxu1 (!%p7087_p6), %v8549_v47  ;;  %v8552_v49 = vld [vmem:[%s9777_s14 + $0x2c] ss:$16 sps:$4 sm:$0xff] (!%p7087_p6)   ;;  %v8554_v50 = vld [vmem:[%s9777_s14 + $0x20] ss:$16 sps:$4 sm:$0xff] (!%p7087_p6)   ;;  %v8555_v51 = vld [vmem:[%s9777_s14 + $0x28] ss:$16 sps:$4 sm:$0xff] (!%p7087_p6)  }
 0x4e2   : > { %4572 = vmatprep.subr.bf16.mxu0 (!%p7087_p6), %v8550_v48  ;;  %4678 = vmatprep.subr.bf16.mxu1 (!%p7087_p6), %v8552_v49  ;;  %v8556_v52 = vld [vmem:[%s9777_s14 + $0x44] ss:$16 sps:$4 sm:$0xff] (!%p7087_p6)   ;;  %v8558_v54 = vld [vmem:[%s9777_s14 + $0x4c] ss:$16 sps:$4 sm:$0xff] (!%p7087_p6)   ;;  %v8560_v56 = vld [vmem:[%s9777_s14 + $0x40] ss:$16 sps:$4 sm:$0xff] (!%p7087_p6)  }
 0x4e3   : > { %v8561_v57 = vld [vmem:[%s9777_s14 + $0x48] ss:$16 sps:$4 sm:$0xff] (!%p7087_p6)   ;;  %v8562_v59 = vld [vmem:[%s9777_s14 + $0x64] ss:$16 sps:$4 sm:$0xff] (!%p7087_p6)   ;;  %v8564_v60 = vld [vmem:[%s9777_s14 + $0x6c] ss:$16 sps:$4 sm:$0xff] (!%p7087_p6)  }
 0x4e4   : > { %v8566_v61 = vld [vmem:[%s9777_s14 + $0x60] ss:$16 sps:$4 sm:$0xff] (!%p7087_p6)   ;;  %v8567_v62 = vld [vmem:[%s9777_s14 + $0x68] ss:$16 sps:$4 sm:$0xff] (!%p7087_p6)   ;;  %v8568_v63 = vld [vmem:[%s9777_s14 + $0x84] ss:$16 sps:$4 sm:$0xff] (!%p7087_p6)  }
 0x4e5   : > { %4573 = vmatpush1.bf16.msra.mxu0 (!%p7087_p6), %v8554_v50  ;;  %4679 = vmatpush1.bf16.msra.mxu1 (!%p7087_p6), %v8555_v51  ;;  %v8570_v0 = vld [vmem:[%s9777_s14 + $0x8c] ss:$16 sps:$4 sm:$0xff] (!%p7087_p6)   ;;  %v8572_v9 = vld [vmem:[%s9777_s14 + $0x80] ss:$16 sps:$4 sm:$0xff] (!%p7087_p6)   ;;  %v8573_v1 = vld [vmem:[%s9777_s14 + $0x88] ss:$16 sps:$4 sm:$0xff] (!%p7087_p6)  }
 0x4e6   : > { %4574 = vmatprep.subr.bf16.mxu0 (!%p7087_p6), %v8556_v52  ;;  %4680 = vmatprep.subr.bf16.mxu1 (!%p7087_p6), %v8558_v54  ;;  %v8574_v2 = vld [vmem:[%s9777_s14 + $0xa4] ss:$16 sps:$4 sm:$0xff] (!%p7087_p6)   ;;  %v8576_v3 = vld [vmem:[%s9777_s14 + $0xac] ss:$16 sps:$4 sm:$0xff] (!%p7087_p6)   ;;  %v8578_v4 = vld [vmem:[%s9777_s14 + $0xa0] ss:$16 sps:$4 sm:$0xff] (!%p7087_p6)  }
 0x4e7   : > { %v8579_v5 = vld [vmem:[%s9777_s14 + $0xa8] ss:$16 sps:$4 sm:$0xff]   ;;  %v8580_v14 = vld [vmem:[%s9777_s14 + $0xc4] ss:$16 sps:$4 sm:$0xff]   ;;  %v8582_v6 = vld [vmem:[%s9777_s14 + $0xcc] ss:$16 sps:$4 sm:$0xff]  }
 0x4e8   : > { %v8584_v7 = vld [vmem:[%s9777_s14 + $0xc0] ss:$16 sps:$4 sm:$0xff]   ;;  %v8585_v8 = vld [vmem:[%s9777_s14 + $0xc8] ss:$16 sps:$4 sm:$0xff]   ;;  %v8586_v10 = vld [vmem:[%s9777_s14 + $0xe4] ss:$16 sps:$4 sm:$0xff]  }
 0x4e9   : > { %4575 = vmatpush1.bf16.msra.mxu0 %v8560_v56  ;;  %4681 = vmatpush1.bf16.msra.mxu1 %v8561_v57  ;;  %v8588_v11 = vld [vmem:[%s9777_s14 + $0xec] ss:$16 sps:$4 sm:$0xff]   ;;  %v8590_v12 = vld [vmem:[%s9777_s14 + $0xe0] ss:$16 sps:$4 sm:$0xff]   ;;  %v8591_v13 = vld [vmem:[%s9777_s14 + $0xe8] ss:$16 sps:$4 sm:$0xff]  }
 0x4ea   : > { %4576 = vmatprep.subr.bf16.mxu0 %v8562_v59  ;;  %4682 = vmatprep.subr.bf16.mxu1 %v8564_v60  ;;  %v8592_v15 = vld [vmem:[%s9777_s14 + $0x104] ss:$16 sps:$4 sm:$0xff]   ;;  %v8594_v16 = vld [vmem:[%s9777_s14 + $0x10c] ss:$16 sps:$4 sm:$0xff]   ;;  %v8596_v17 = vld [vmem:[%s9777_s14 + $0x100] ss:$16 sps:$4 sm:$0xff]  }
 0x4eb   : > { %v8597_v18 = vld [vmem:[%s9777_s14 + $0x108] ss:$16 sps:$4 sm:$0xff]   ;;  %v8598_v19 = vld [vmem:[%s9777_s14 + $0x124] ss:$16 sps:$4 sm:$0xff]   ;;  %v8600_v20 = vld [vmem:[%s9777_s14 + $0x12c] ss:$16 sps:$4 sm:$0xff]  }
 0x4ec   : > { %v8602_v21 = vld [vmem:[%s9777_s14 + $0x120] ss:$16 sps:$4 sm:$0xff]   ;;  %v8603_v22 = vld [vmem:[%s9777_s14 + $0x128] ss:$16 sps:$4 sm:$0xff]   ;;  %v8604_v23 = vld [vmem:[%s9777_s14 + $0x144] ss:$16 sps:$4 sm:$0xff]  }
 0x4ed   : > { %4577 = vmatpush1.bf16.msra.mxu0 %v8566_v61  ;;  %4683 = vmatpush1.bf16.msra.mxu1 %v8567_v62  ;;  %v8606_v24 = vld [vmem:[%s9777_s14 + $0x14c] ss:$16 sps:$4 sm:$0xff]   ;;  %v8608_v27 = vld [vmem:[%s9777_s14 + $0x140] ss:$16 sps:$4 sm:$0xff]   ;;  %v8609_v28 = vld [vmem:[%s9777_s14 + $0x148] ss:$16 sps:$4 sm:$0xff]  }
 0x4ee   : > { %4578 = vmatprep.subr.bf16.mxu0 %v8568_v63  ;;  %4684 = vmatprep.subr.bf16.mxu1 %v8570_v0  ;;  %v8610_v58 = vld [vmem:[%s9777_s14 + $0x164] ss:$16 sps:$4 sm:$0xff]   ;;  %v8612_v55 = vld [vmem:[%s9777_s14 + $0x16c] ss:$16 sps:$4 sm:$0xff]   ;;  %v8614_v25 = vld [vmem:[%s9777_s14 + $0x160] ss:$16 sps:$4 sm:$0xff]  }
 0x4ef   : > { %v10101_v26 = vld [vmem:[#allocation3 + $0x8] sm:$0xff]  ;;  %v8618_v31 = vld [vmem:[%s9777_s14 + $0x18c] ss:$16 sps:$4 sm:$0xff]   ;;  %s10252_s0 = sshra.s32 %s7216_s29, 3 }
 0x4f0   : > { %v10103_v29 = vld [vmem:[#allocation3 + $0x28] sm:$0xff]  ;;  %v8624_v36 = vld [vmem:[%s9777_s14 + $0x1ac] ss:$16 sps:$4 sm:$0xff]   ;;  %s7389_s12 = sshll.u32 %s10252_s0, 5 }
 0x4f1   : > { %4579 = vmatpush1.bf16.msra.mxu0 %v8572_v9  ;;  %4685 = vmatpush1.bf16.msra.mxu1 %v8573_v1  ;;  %v8615_v38 = vld [vmem:[%s9777_s14 + $0x168] ss:$16 sps:$4 sm:$0xff]   ;;  %v3773_v35 = vpack.c.bf16 %v10103_v29, %v10101_v26  ;;  %v8616_v30 = vld [vmem:[%s9777_s14 + $0x184] ss:$16 sps:$4 sm:$0xff]   ;;  %v8620_v32 = vld [vmem:[%s9777_s14 + $0x180] ss:$16 sps:$4 sm:$0xff]  }
 0x4f2   : > { %4580 = vmatprep.subr.bf16.mxu0 %v8574_v2  ;;  %4686 = vmatprep.subr.bf16.mxu1 %v8576_v3  ;;  %v8621_v53 = vld [vmem:[%s9777_s14 + $0x188] ss:$16 sps:$4 sm:$0xff]   ;;  %v8622_v34 = vld [vmem:[%s9777_s14 + $0x1a4] ss:$16 sps:$4 sm:$0xff]   ;;  %v8626_v37 = vld [vmem:[%s9777_s14 + $0x1a0] ss:$16 sps:$4 sm:$0xff]  }
 0x4f3   : > { %4602 = vmatprep.mubr.bf16.mxu0 %v3773_v35  ;;  %4708 = vmatprep.mubr.bf16.mxu1 %v3773_v35  ;;  %v8627_v39 = vld [vmem:[%s9777_s14 + $0x1a8] ss:$16 sps:$4 sm:$0xff]   ;;  %v8628_v33 = vld [vmem:[%s9777_s14 + $0x1c4] ss:$16 sps:$4 sm:$0xff]   ;;  %v8630_v40 = vld [vmem:[%s9777_s14 + $0x1cc] ss:$16 sps:$4 sm:$0xff]  }
 0x4f4   : > { %v8632_v41 = vld [vmem:[%s9777_s14 + $0x1c0] ss:$16 sps:$4 sm:$0xff]   ;;  %v8633_v42 = vld [vmem:[%s9777_s14 + $0x1c8] ss:$16 sps:$4 sm:$0xff]   ;;  %v8634_v43 = vld [vmem:[%s9777_s14 + $0x1e4] ss:$16 sps:$4 sm:$0xff]  }
 0x4f5   : > { %4581 = vmatpush1.bf16.msra.mxu0 %v8578_v4  ;;  %4687 = vmatpush1.bf16.msra.mxu1 %v8579_v5  ;;  %v8636_v44 = vld [vmem:[%s9777_s14 + $0x1ec] ss:$16 sps:$4 sm:$0xff]   ;;  %v8638_v45 = vld [vmem:[%s9777_s14 + $0x1e0] ss:$16 sps:$4 sm:$0xff]   ;;  %v8639_v46 = vld [vmem:[%s9777_s14 + $0x1e8] ss:$16 sps:$4 sm:$0xff]  }
 0x4f6   : > { %4582 = vmatprep.subr.bf16.mxu0 %v8580_v14  ;;  %4688 = vmatprep.subr.bf16.mxu1 %v8582_v6  ;;  %v8642_v47 = vld [vmem:[%s9777_s14 + $0x204] ss:$16 sps:$4 sm:$0xff]   ;;  %v10126_v48 = vld [vmem:[#allocation3] sm:$0xff]  ;;  %s10257_s25 = scalar_lea.vmem [#allocation4], %s7389_s12 }
 0x4f7   : > { %v10128_v49 = vld [vmem:[#allocation3 + $0x20] sm:$0xff]  ;;  %v8648_v56 = vld [vmem:[%s9777_s14 + $0x224] ss:$16 sps:$4 sm:$0xff]  }
 0x4f8   : > { %v8645_v50 = vld [vmem:[%s9777_s14 + $0x20c] ss:$16 sps:$4 sm:$0xff]   ;;  %v8640_v51 = vld [vmem:[%s9777_s14 + $0x200] ss:$16 sps:$4 sm:$0xff]   ;;  %v8643_v52 = vld [vmem:[%s9777_s14 + $0x208] ss:$16 sps:$4 sm:$0xff]   ;;  %v3772_v54 = vpack.c.bf16 %v10128_v49, %v10126_v48 }
 0x4f9   : > { %4583 = vmatpush1.bf16.msra.mxu0 %v8584_v7  ;;  %4689 = vmatpush1.bf16.msra.mxu1 %v8585_v8  ;;  %v8651_v57 = vld [vmem:[%s9777_s14 + $0x22c] ss:$16 sps:$4 sm:$0xff]   ;;  %v8646_v59 = vld [vmem:[%s9777_s14 + $0x220] ss:$16 sps:$4 sm:$0xff]   ;;  %v8649_v60 = vld [vmem:[%s9777_s14 + $0x228] ss:$16 sps:$4 sm:$0xff]  }
 0x4fa   : > { %4584 = vmatprep.subr.bf16.mxu0 %v8586_v10  ;;  %4690 = vmatprep.subr.bf16.mxu1 %v8588_v11  ;;  %v8654_v61 = vld [vmem:[%s9777_s14 + $0x244] ss:$16 sps:$4 sm:$0xff]   ;;  %v8657_v62 = vld [vmem:[%s9777_s14 + $0x24c] ss:$16 sps:$4 sm:$0xff]   ;;  %v8652_v63 = vld [vmem:[%s9777_s14 + $0x240] ss:$16 sps:$4 sm:$0xff]  }
 0x4fb   : > { %v8655_v0 = vld [vmem:[%s9777_s14 + $0x248] ss:$16 sps:$4 sm:$0xff]   ;;  %v8660_v9 = vld [vmem:[%s9777_s14 + $0x264] ss:$16 sps:$4 sm:$0xff]   ;;  %v8663_v1 = vld [vmem:[%s9777_s14 + $0x26c] ss:$16 sps:$4 sm:$0xff]  }
 0x4fc   : > { %v8658_v2 = vld [vmem:[%s9777_s14 + $0x260] ss:$16 sps:$4 sm:$0xff]   ;;  %v8661_v3 = vld [vmem:[%s9777_s14 + $0x268] ss:$16 sps:$4 sm:$0xff]   ;;  %v8666_v4 = vld [vmem:[%s9777_s14 + $0x284] ss:$16 sps:$4 sm:$0xff]  }
 0x4fd   : > { %4585 = vmatpush1.bf16.msra.mxu0 %v8590_v12  ;;  %4691 = vmatpush1.bf16.msra.mxu1 %v8591_v13  ;;  %v8669_v5 = vld [vmem:[%s9777_s14 + $0x28c] ss:$16 sps:$4 sm:$0xff]   ;;  %v8664_v14 = vld [vmem:[%s9777_s14 + $0x280] ss:$16 sps:$4 sm:$0xff]   ;;  %v8667_v6 = vld [vmem:[%s9777_s14 + $0x288] ss:$16 sps:$4 sm:$0xff]  }
 0x4fe   : > { %4586 = vmatprep.subr.bf16.mxu0 %v8592_v15  ;;  %4692 = vmatprep.subr.bf16.mxu1 %v8594_v16  ;;  %v8672_v7 = vld [vmem:[%s9777_s14 + $0x2a4] ss:$16 sps:$4 sm:$0xff]   ;;  %v8675_v8 = vld [vmem:[%s9777_s14 + $0x2ac] ss:$16 sps:$4 sm:$0xff]   ;;  %v8670_v16 = vld [vmem:[%s9777_s14 + $0x2a0] ss:$16 sps:$4 sm:$0xff]  }
 0x4ff   : > { %v10153_v10 = vld [vmem:[#allocation3 + $0x48] sm:$0xff]  ;;  %v10159_v13 = vld [vmem:[#allocation3 + $0x40] sm:$0xff] }
 0x500   : > { %v10155_v11 = vld [vmem:[#allocation3 + $0x68] sm:$0xff]  ;;  %v10161_v15 = vld [vmem:[#allocation3 + $0x60] sm:$0xff] }
 0x501   : > { %4587 = vmatpush1.bf16.msra.mxu0 %v8596_v17  ;;  %4693 = vmatpush1.bf16.msra.mxu1 %v8597_v18  ;;  %v3777_v12 = vpack.c.bf16 %v10155_v11, %v10153_v10  ;;  %v8673_v17 = vld [vmem:[%s9777_s14 + $0x2a8] ss:$16 sps:$4 sm:$0xff]   ;;  %v3776_v18 = vpack.c.bf16 %v10161_v15, %v10159_v13  ;;  %v8693_v35 = vld [vmem:[%s9777_s14 + $0x30c] ss:$16 sps:$4 sm:$0xff]  }
 0x502   : > { %4588 = vmatprep.subr.bf16.mxu0 %v8598_v19  ;;  %4694 = vmatprep.subr.bf16.mxu1 %v8600_v20  ;;  %v8678_v19 = vld [vmem:[%s9777_s14 + $0x2c4] ss:$16 sps:$4 sm:$0xff]   ;;  %v8681_v20 = vld [vmem:[%s9777_s14 + $0x2cc] ss:$16 sps:$4 sm:$0xff]  }
 0x505   : > { %4589 = vmatpush1.bf16.msra.mxu0 %v8602_v21  ;;  %4695 = vmatpush1.bf16.msra.mxu1 %v8603_v22  ;;  %v8676_v21 = vld [vmem:[%s9777_s14 + $0x2c0] ss:$16 sps:$4 sm:$0xff]   ;;  %v8679_v22 = vld [vmem:[%s9777_s14 + $0x2c8] ss:$16 sps:$4 sm:$0xff]  }
 0x506   : > { %4590 = vmatprep.subr.bf16.mxu0 %v8604_v23  ;;  %4696 = vmatprep.subr.bf16.mxu1 %v8606_v24  ;;  %v10171_v23 = vld [vmem:[#allocation3 + $0x18] sm:$0xff] }
 0x507   : > { %v10173_v24 = vld [vmem:[#allocation3 + $0x38] sm:$0xff] }
 0x509   : > { %4591 = vmatpush1.bf16.msra.mxu0 %v8608_v27  ;;  %4697 = vmatpush1.bf16.msra.mxu1 %v8609_v28  ;;  %v8684_v27 = vld [vmem:[%s9777_s14 + $0x2e4] ss:$16 sps:$4 sm:$0xff]   ;;  %v8687_v28 = vld [vmem:[%s9777_s14 + $0x2ec] ss:$16 sps:$4 sm:$0xff]  }
 0x50a   : > { %4592 = vmatprep.subr.bf16.mxu0 %v8610_v58  ;;  %4698 = vmatprep.subr.bf16.mxu1 %v8612_v55  ;;  %v3775_v58 = vpack.c.bf16 %v10173_v24, %v10171_v23  ;;  %v8682_v55 = vld [vmem:[%s9777_s14 + $0x2e0] ss:$16 sps:$4 sm:$0xff]  }
 0x50d   : > { %4593 = vmatpush1.bf16.msra.mxu0 %v8614_v25  ;;  %4699 = vmatpush1.bf16.msra.mxu1 %v8615_v38  ;;  %v8685_v25 = vld [vmem:[%s9777_s14 + $0x2e8] ss:$16 sps:$4 sm:$0xff]   ;;  %v8690_v38 = vld [vmem:[%s9777_s14 + $0x304] ss:$16 sps:$4 sm:$0xff]  }
 0x50e   : > { %4594 = vmatprep.subr.bf16.mxu0 %v8616_v30  ;;  %4700 = vmatprep.subr.bf16.mxu1 %v8618_v31  ;;  %v8688_v30 = vld [vmem:[%s9777_s14 + $0x300] ss:$16 sps:$4 sm:$0xff]   ;;  %v8691_v31 = vld [vmem:[%s9777_s14 + $0x308] ss:$16 sps:$4 sm:$0xff]  }
 0x511   : > { %4595 = vmatpush1.bf16.msra.mxu0 %v8620_v32  ;;  %4701 = vmatpush1.bf16.msra.mxu1 %v8621_v53  ;;  %v8696_v32 = vld [vmem:[%s9777_s14 + $0x324] ss:$16 sps:$4 sm:$0xff]   ;;  %v8699_v53 = vld [vmem:[%s9777_s14 + $0x32c] ss:$16 sps:$4 sm:$0xff]  }
 0x512   : > { %4596 = vmatprep.subr.bf16.mxu0 %v8622_v34  ;;  %4702 = vmatprep.subr.bf16.mxu1 %v8624_v36  ;;  %v8694_v34 = vld [vmem:[%s9777_s14 + $0x320] ss:$16 sps:$4 sm:$0xff]   ;;  %v8697_v36 = vld [vmem:[%s9777_s14 + $0x328] ss:$16 sps:$4 sm:$0xff]  }
 0x515   : > { %4597 = vmatpush1.bf16.msra.mxu0 %v8626_v37  ;;  %4703 = vmatpush1.bf16.msra.mxu1 %v8627_v39  ;;  %v8702_v37 = vld [vmem:[%s9777_s14 + $0x344] ss:$16 sps:$4 sm:$0xff]   ;;  %v8705_v39 = vld [vmem:[%s9777_s14 + $0x34c] ss:$16 sps:$4 sm:$0xff]  }
 0x516   : > { %4598 = vmatprep.subr.bf16.mxu0 %v8628_v33  ;;  %4704 = vmatprep.subr.bf16.mxu1 %v8630_v40  ;;  %v8700_v33 = vld [vmem:[%s9777_s14 + $0x340] ss:$16 sps:$4 sm:$0xff]   ;;  %v8703_v40 = vld [vmem:[%s9777_s14 + $0x348] ss:$16 sps:$4 sm:$0xff]  }
 0x519   : > { %4599 = vmatpush1.bf16.msra.mxu0 %v8632_v41  ;;  %4705 = vmatpush1.bf16.msra.mxu1 %v8633_v42  ;;  %v8708_v41 = vld [vmem:[%s9777_s14 + $0x364] ss:$16 sps:$4 sm:$0xff]   ;;  %v8711_v42 = vld [vmem:[%s9777_s14 + $0x36c] ss:$16 sps:$4 sm:$0xff]  }
 0x51a   : > { %4600 = vmatprep.subr.bf16.mxu0 %v8634_v43  ;;  %4706 = vmatprep.subr.bf16.mxu1 %v8636_v44  ;;  %v8706_v43 = vld [vmem:[%s9777_s14 + $0x360] ss:$16 sps:$4 sm:$0xff]   ;;  %v8709_v44 = vld [vmem:[%s9777_s14 + $0x368] ss:$16 sps:$4 sm:$0xff]  }
 0x51d   : > { %4601 = vmatpush1.bf16.msra.mxu0 %v8638_v45  ;;  %4707 = vmatpush1.bf16.msra.mxu1 %v8639_v46  ;;  %v8714_v45 = vld [vmem:[%s9777_s14 + $0x384] ss:$16 sps:$4 sm:$0xff]   ;;  %v8717_v46 = vld [vmem:[%s9777_s14 + $0x38c] ss:$16 sps:$4 sm:$0xff]  }
 0x51e   : > { %4623 = vmatprep.subr.bf16.mxu0 %v8642_v47  ;;  %4729 = vmatprep.subr.bf16.mxu1 %v8645_v50  ;;  %v8712_v47 = vld [vmem:[%s9777_s14 + $0x380] ss:$16 sps:$4 sm:$0xff]   ;;  %v8715_v50 = vld [vmem:[%s9777_s14 + $0x388] ss:$16 sps:$4 sm:$0xff]  }
 0x520   : > { %4603 = vmatmul.mubr.bf16.vlgmr.msra.gmra.mrb[0].mxu0 %v3772_v54  ;;  %4709 = vmatmul.mubr.bf16.vlgmr.msra.gmra.mrb[0].mxu1 %v3772_v54  ;;  %v8718_v54 = vld [vmem:[%s9777_s14 + $0x3a0] ss:$16 sps:$4 sm:$0xff]  }
 0x521   : > { %4624 = vmatpush1.bf16.msra.mxu0 %v8640_v51  ;;  %4730 = vmatpush1.bf16.msra.mxu1 %v8643_v52  ;;  %v8720_v51 = vld [vmem:[%s9777_s14 + $0x3a4] ss:$16 sps:$4 sm:$0xff]   ;;  %v8723_v52 = vld [vmem:[%s9777_s14 + $0x3ac] ss:$16 sps:$4 sm:$0xff]  }
 0x522   : > { %4625 = vmatprep.subr.bf16.mxu0 %v8648_v56  ;;  %4731 = vmatprep.subr.bf16.mxu1 %v8651_v57  ;;  %v8721_v56 = vld [vmem:[%s9777_s14 + $0x3a8] ss:$16 sps:$4 sm:$0xff]   ;;  %v8726_v57 = vld [vmem:[%s9777_s14 + $0x3c4] ss:$16 sps:$4 sm:$0xff]  }
 0x523   : > { %4612 = vmatprep.mubr.bf16.mxu0 %v3777_v12  ;;  %4718 = vmatprep.mubr.bf16.mxu1 %v3777_v12  ;;  %v3910_v12 = vlaneseq }
 0x525   : > { %4626 = vmatpush1.bf16.msra.mxu0 %v8646_v59  ;;  %4732 = vmatpush1.bf16.msra.mxu1 %v8649_v60  ;;  %v8729_v59 = vld [vmem:[%s9777_s14 + $0x3cc] ss:$16 sps:$4 sm:$0xff]   ;;  %v8724_v60 = vld [vmem:[%s9777_s14 + $0x3c0] ss:$16 sps:$4 sm:$0xff]  }
 0x526   : > { %4627 = vmatprep.subr.bf16.mxu0 %v8654_v61  ;;  %4733 = vmatprep.subr.bf16.mxu1 %v8657_v62  ;;  %v8727_v61 = vld [vmem:[%s9777_s14 + $0x3c8] ss:$16 sps:$4 sm:$0xff]   ;;  %v8732_v62 = vld [vmem:[%s9777_s14 + $0x3e4] ss:$16 sps:$4 sm:$0xff]  }
 0x528   : > { %4613 = vmatmul.mubr.bf16.gmra.mrb[4].mxu0 %v3776_v18  ;;  %4719 = vmatmul.mubr.bf16.gmra.mrb[4].mxu1 %v3776_v18 }
 0x529   : > { %4628 = vmatpush1.bf16.msra.mxu0 %v8652_v63  ;;  %4734 = vmatpush1.bf16.msra.mxu1 %v8655_v0  ;;  %v8735_v63 = vld [vmem:[%s9777_s14 + $0x3ec] ss:$16 sps:$4 sm:$0xff]   ;;  %v8730_v0 = vld [vmem:[%s9777_s14 + $0x3e0] ss:$16 sps:$4 sm:$0xff]  }
 0x52a   : > { %4629 = vmatprep.subr.bf16.mxu0 %v8660_v9  ;;  %4735 = vmatprep.subr.bf16.mxu1 %v8663_v1  ;;  %v8733_v9 = vld [vmem:[%s9777_s14 + $0x3e8] ss:$16 sps:$4 sm:$0xff]  }
 0x52b   : > { %4655 = vmatprep.mubr.bf16.mxu0 %v3775_v58  ;;  %4761 = vmatprep.mubr.bf16.mxu1 %v3775_v58  ;;  %v10213_v1 = vld [vmem:[#allocation3 + $0x10] sm:$0xff] }
 0x52d   : > { %4630 = vmatpush1.bf16.msra.mxu0 %v8658_v2  ;;  %4736 = vmatpush1.bf16.msra.mxu1 %v8661_v3  ;;  %v10215_v2 = vld [vmem:[#allocation3 + $0x30] sm:$0xff]  ;;  %v10217_v3 = vld [vmem:[#allocation3 + $0x58] sm:$0xff] }
 0x52e   : > { %4631 = vmatprep.subr.bf16.mxu0 %v8666_v4  ;;  %4737 = vmatprep.subr.bf16.mxu1 %v8669_v5  ;;  %v10219_v4 = vld [vmem:[#allocation3 + $0x78] sm:$0xff]  ;;  %v3774_v5 = vpack.c.bf16 %v10215_v2, %v10213_v1 }
 0x531   : > { %4632 = vmatpush1.bf16.msra.mxu0 %v8664_v14  ;;  %4738 = vmatpush1.bf16.msra.mxu1 %v8667_v6  ;;  %v3779_v14 = vpack.c.bf16 %v10219_v4, %v10217_v3  ;;  %v10225_v6 = vld [vmem:[#allocation3 + $0x50] sm:$0xff] }
 0x532   : > { %4633 = vmatprep.subr.bf16.mxu0 %v8672_v7  ;;  %4739 = vmatprep.subr.bf16.mxu1 %v8675_v8  ;;  %v10227_v7 = vld [vmem:[#allocation3 + $0x70] sm:$0xff] }
 0x533   : > { %v3778_v8 = vpack.c.bf16 %v10227_v7, %v10225_v6 }
 0x535   : > { %4634 = vmatpush1.bf16.msra.mxu0 %v8670_v16  ;;  %4740 = vmatpush1.bf16.msra.mxu1 %v8673_v17  ;;  %v3911_v16 = vshrl.u32 %v3910_v12, 7 }
 0x536   : > { %4635 = vmatprep.subr.bf16.mxu0 %v8678_v19  ;;  %4741 = vmatprep.subr.bf16.mxu1 %v8681_v20  ;;  %v3908_v19 = vld [vmem:[%s510_s4] sm:$0xf] }
 0x537   : > { %v3912_v17 = vsub.s32 0, %v3911_v16  ;;  %v3920_v18 = vsub.s32 2, %v3911_v16  ;;  %v3916_v20 = vsub.s32 1, %v3911_v16 }
 0x539   : > { %4636 = vmatpush1.bf16.msra.mxu0 %v8676_v21  ;;  %4742 = vmatpush1.bf16.msra.mxu1 %v8679_v22  ;;  %v3924_v21 = vsub.s32 3, %v3911_v16  ;;  %v3913_v22 = vrot.slane %v3908_v19, %v3912_v17 }
 0x53a   : > { %4637 = vmatprep.subr.bf16.mxu0 %v8684_v27  ;;  %4743 = vmatprep.subr.bf16.mxu1 %v8687_v28  ;;  %v10233_v27 = vrot.slane %v3908_v19, %v3920_v18  ;;  %v10235_v28 = vrot.slane %v3908_v19, %v3916_v20 }
 0x53b   : > { %v10237_v58 = vrot.slane %v3908_v19, %v3924_v21 }
 0x53d   : > { %4638 = vmatpush1.bf16.msra.mxu0 %v8682_v55  ;;  %4744 = vmatpush1.bf16.msra.mxu1 %v8685_v25 }
 0x53e   : > { %4639 = vmatprep.subr.bf16.mxu0 %v8690_v38  ;;  %4745 = vmatprep.subr.bf16.mxu1 %v8693_v35 }
 0x541   : > { %4640 = vmatpush1.bf16.msra.mxu0 %v8688_v30  ;;  %4746 = vmatpush1.bf16.msra.mxu1 %v8691_v31 }
 0x542   : > { %4641 = vmatprep.subr.bf16.mxu0 %v8696_v32  ;;  %4747 = vmatprep.subr.bf16.mxu1 %v8699_v53 }
 0x545   : > { %4642 = vmatpush1.bf16.msra.mxu0 %v8694_v34  ;;  %4748 = vmatpush1.bf16.msra.mxu1 %v8697_v36 }
 0x546   : > { %4643 = vmatprep.subr.bf16.mxu0 %v8702_v37  ;;  %4749 = vmatprep.subr.bf16.mxu1 %v8705_v39 }
 0x549   : > { %4644 = vmatpush1.bf16.msra.mxu0 %v8700_v33  ;;  %4750 = vmatpush1.bf16.msra.mxu1 %v8703_v40 }
 0x54a   : > { %4645 = vmatprep.subr.bf16.mxu0 %v8708_v41  ;;  %4751 = vmatprep.subr.bf16.mxu1 %v8711_v42 }
 0x54d   : > { %4646 = vmatpush1.bf16.msra.mxu0 %v8706_v43  ;;  %4752 = vmatpush1.bf16.msra.mxu1 %v8709_v44 }
 0x54e   : > { %4647 = vmatprep.subr.bf16.mxu0 %v8714_v45  ;;  %4753 = vmatprep.subr.bf16.mxu1 %v8717_v46 }
 0x551   : > { %4648 = vmatpush1.bf16.msra.mxu0 %v8712_v47  ;;  %4754 = vmatpush1.bf16.msra.mxu1 %v8715_v50 }
 0x552   : > { %4649 = vmatprep.subr.bf16.mxu0 %v8720_v51  ;;  %4755 = vmatprep.subr.bf16.mxu1 %v8723_v52 }
 0x555   : > { %4650 = vmatpush1.bf16.msra.mxu0 %v8718_v54  ;;  %4756 = vmatpush1.bf16.msra.mxu1 %v8721_v56 }
 0x556   : > { %4651 = vmatprep.subr.bf16.mxu0 %v8726_v57  ;;  %4757 = vmatprep.subr.bf16.mxu1 %v8729_v59 }
 0x559   : > { %4652 = vmatpush1.bf16.msra.mxu0 %v8724_v60  ;;  %4758 = vmatpush1.bf16.msra.mxu1 %v8727_v61 }
 0x55a   : > { %4653 = vmatprep.subr.bf16.mxu0 %v8732_v62  ;;  %4759 = vmatprep.subr.bf16.mxu1 %v8735_v63 }
 0x55d   : > { %4654 = vmatpush1.bf16.msra.mxu0 %v8730_v0  ;;  %4760 = vmatpush1.bf16.msra.mxu1 %v8733_v9 }
 0x560   : > { %4656 = vmatmul.mubr.bf16.vlgmr.msra.gmra.mrb[0].mxu0 %v3774_v5  ;;  %4762 = vmatmul.mubr.bf16.vlgmr.msra.gmra.mrb[0].mxu1 %v3774_v5 }
 0x561   : > { %4665 = vmatprep.mubr.bf16.mxu0 %v3779_v14  ;;  %4771 = vmatprep.mubr.bf16.mxu1 %v3779_v14 }
 0x568   : > { %4666 = vmatmul.mubr.bf16.gmra.mrb[4].mxu0 %v3778_v8  ;;  %4772 = vmatmul.mubr.bf16.gmra.mrb[4].mxu1 %v3778_v8 }
 0x633   : > { %v4657_v55 = vpop.f32.mrb[0].mxu0  ;;  %v4763_v25 = vpop.f32.mrb[0].mxu1 }
 0x634   : > { %v7910_v38 = vadd.f32 %v4657_v55, %v3913_v22  ;;  %v7918_v35 = vadd.f32 %v4763_v25, %v10233_v27  ;;  %v4659_v30 = vpop.f32.mrb[1].mxu0  ;;  %v4765_v31 = vpop.f32.mrb[1].mxu1 }
 0x635   : > { %v7911_v32 = vadd.f32 %v4659_v30, %v10235_v28  ;;  %v7919_v53 = vadd.f32 %v4765_v31, %v10237_v58  ;;  %v4661_v34 = vpop.f32.mrb[2].mxu0  ;;  %v4767_v36 = vpop.f32.mrb[2].mxu1 }
 0x636   : > { %v4782_v37 = vsub.f32 0.0, %v7910_v38  ;;  %v4784_v39 = vsub.f32 0.0, %v7918_v35  ;;  %v7912_v33 = vadd.f32 %v4661_v34, %v3913_v22  ;;  %v7920_v40 = vadd.f32 %v4767_v36, %v10233_v27  ;;  %v4663_v41 = vpop.f32.mrb[3].mxu0  ;;  %v4769_v42 = vpop.f32.mrb[3].mxu1 }
 0x637   : > { %v4783_v43 = vsub.f32 0.0, %v7911_v32  ;;  %v4785_v44 = vsub.f32 0.0, %v7919_v53  ;;  %v7913_v45 = vadd.f32 %v4663_v41, %v10235_v28  ;;  %v7921_v46 = vadd.f32 %v4769_v42, %v10237_v58 }
 0x638   : > { %v4798_v47 = vmul.f32 1.442695, %v4782_v37  ;;  %v4802_v50 = vmul.f32 1.442695, %v4784_v39  ;;  %v4786_v51 = vsub.f32 0.0, %v7912_v33  ;;  %v4788_v52 = vsub.f32 0.0, %v7920_v40 }
 0x639   : > { %v4800_v54 = vmul.f32 1.442695, %v4783_v43  ;;  %v4804_v56 = vmul.f32 1.442695, %v4785_v44  ;;  %v4787_v57 = vsub.f32 0.0, %v7913_v45  ;;  %v4789_v59 = vsub.f32 0.0, %v7921_v46 }
 0x63a   : > { %8736 = vpow2.f32 %v4798_v47  ;;  %v4806_v60 = vmul.f32 1.442695, %v4786_v51  ;;  %v4810_v61 = vmul.f32 1.442695, %v4788_v52 }
 0x63b   : > { %8738 = vpow2.f32 %v4802_v50  ;;  %v4667_v62 = vpop.f32.mrb[4].mxu0  ;;  %v4773_v63 = vpop.f32.mrb[4].mxu1  ;;  %v4808_v0 = vmul.f32 1.442695, %v4787_v57  ;;  %v4812_v12 = vmul.f32 1.442695, %v4789_v59 }
 0x63c   : > { %8740 = vpow2.f32 %v4800_v54  ;;  %v7914_v9 = vadd.f32 %v4667_v62, %v3913_v22  ;;  %v7922_v5 = vadd.f32 %v4773_v63, %v10233_v27  ;;  %v4669_v14 = vpop.f32.mrb[5].mxu0  ;;  %v4775_v8 = vpop.f32.mrb[5].mxu1 }
 0x63d   : > { %8742 = vpow2.f32 %v4804_v56  ;;  %v7915_v16 = vadd.f32 %v4669_v14, %v10235_v28  ;;  %v7923_v17 = vadd.f32 %v4775_v8, %v10237_v58  ;;  %v4671_v18 = vpop.f32.mrb[6].mxu0  ;;  %v4777_v19 = vpop.f32.mrb[6].mxu1 }
 0x63e   : > { %8744 = vpow2.f32 %v4806_v60  ;;  %v4790_v20 = vsub.f32 0.0, %v7914_v9  ;;  %v4792_v21 = vsub.f32 0.0, %v7922_v5  ;;  %v7916_v55 = vadd.f32 %v4671_v18, %v3913_v22  ;;  %v4673_v25 = vpop.f32.mrb[7].mxu0  ;;  %v4779_v38 = vpop.f32.mrb[7].mxu1 }
 0x63f   : > { %8746 = vpow2.f32 %v4810_v61  ;;  %v4791_v35 = vsub.f32 0.0, %v7915_v16  ;;  %v4793_v30 = vsub.f32 0.0, %v7923_v17  ;;  %v7924_v46 = vadd.f32 %v4777_v19, %v10233_v27 }
 0x640   : > { %8748 = vpow2.f32 %v4808_v0  ;;  %v4814_v31 = vmul.f32 1.442695, %v4790_v20  ;;  %v4818_v32 = vmul.f32 1.442695, %v4792_v21  ;;  %v4794_v53 = vsub.f32 0.0, %v7916_v55 }
 0x641   : > { %8750 = vpow2.f32 %v4812_v12  ;;  %v4816_v34 = vmul.f32 1.442695, %v4791_v35  ;;  %v4820_v36 = vmul.f32 1.442695, %v4793_v30  ;;  %v7917_v51 = vadd.f32 %v4673_v25, %v10235_v28 }
 0x642   : > { %8752 = vpow2.f32 %v4814_v31  ;;  %v4822_v37 = vmul.f32 1.442695, %v4794_v53  ;;  %v7925_v56 = vadd.f32 %v4779_v38, %v10237_v58  ;;  %v4796_v27 = vsub.f32 0.0, %v7924_v46 }
 0x643   : > { %8754 = vpow2.f32 %v4818_v32  ;;  %v4795_v0 = vsub.f32 0.0, %v7917_v51 }
 0x644   : > { %v8737_v39 = vpop.eup %8736  ;;  %8756 = vpow2.f32 %v4816_v34  ;;  %v4797_v5 = vsub.f32 0.0, %v7925_v56  ;;  %v4826_v16 = vmul.f32 1.442695, %v4796_v27 }
 0x645   : > { %v8739_v33 = vpop.eup %8738  ;;  %v4830_v22 = vadd.f32 1.0, %v8737_v39  ;;  %8758 = vpow2.f32 %v4820_v36  ;;  %v4824_v19 = vmul.f32 1.442695, %v4795_v0 }
 0x646   : > { %v8741_v40 = vpop.eup %8740  ;;  %v4832_v41 = vadd.f32 1.0, %v8739_v33  ;;  %8760 = vpow2.f32 %v4822_v37  ;;  %v4828_v25 = vmul.f32 1.442695, %v4797_v5 }
 0x647   : > { %v8743_v42 = vpop.eup %8742  ;;  %8762 = vrcp.f32 %v4830_v22  ;;  %v4831_v43 = vadd.f32 1.0, %v8741_v40 }
 0x648   : > { %v8745_v44 = vpop.eup %8744  ;;  %8764 = vrcp.f32 %v4832_v41  ;;  %v4833_v45 = vadd.f32 1.0, %v8743_v42 }
 0x649   : > { %v8747_v47 = vpop.eup %8746  ;;  %8766 = vrcp.f32 %v4831_v43  ;;  %v4834_v50 = vadd.f32 1.0, %v8745_v44 }
 0x64a   : > { %v8749_v52 = vpop.eup %8748  ;;  %8768 = vrcp.f32 %v4833_v45  ;;  %v4836_v54 = vadd.f32 1.0, %v8747_v47 }
 0x64b   : > { %v8751_v57 = vpop.eup %8750  ;;  %8770 = vrcp.f32 %v4834_v50  ;;  %v4835_v59 = vadd.f32 1.0, %v8749_v52 }
 0x64c   : > { %v8753_v60 = vpop.eup %8752  ;;  %8772 = vrcp.f32 %v4836_v54  ;;  %v4837_v61 = vadd.f32 1.0, %v8751_v57 }
 0x64d   : > { %v8755_v62 = vpop.eup %8754  ;;  %8774 = vrcp.f32 %v4835_v59  ;;  %v4838_v63 = vadd.f32 1.0, %v8753_v60 }
 0x64e   : > { %v8757_v28 = vpop.eup %8756  ;;  %8776 = vrcp.f32 %v4837_v61  ;;  %v4840_v9 = vadd.f32 1.0, %v8755_v62 }
 0x64f   : > { %v8759_v58 = vpop.eup %8758  ;;  %8778 = vrcp.f32 %v4838_v63  ;;  %v4839_v14 = vadd.f32 1.0, %v8757_v28 }
 0x650   : > { %v8761_v8 = vpop.eup %8760  ;;  %8780 = vrcp.f32 %v4840_v9  ;;  %v4841_v12 = vadd.f32 1.0, %v8759_v58 }
 0x651   : > { %v8763_v17 = vpop.eup %8762  ;;  %8782 = vrcp.f32 %v4839_v14  ;;  %v4842_v18 = vadd.f32 1.0, %v8761_v8 }
 0x652   : > { %v8765_v20 = vpop.eup %8764  ;;  %v4863_v21 = vmul.f32 %v8763_v17, %v10126_v48  ;;  %v4900_v55 = vsub.f32 1.0, %v8763_v17  ;;  %8784 = vrcp.f32 %v4841_v12 }
 0x653   : > { %v8767_v38 = vpop.eup %8766  ;;  %v4865_v35 = vmul.f32 %v8765_v20, %v10213_v1  ;;  %v4902_v30 = vsub.f32 1.0, %v8765_v20  ;;  %8786 = vrcp.f32 %v4842_v18 }
 0x654   : > { %v8769_v31 = vpop.eup %8768  ;;  %4884 = vst [vmem:[%s10257_s25] sm:$0xff] %v4863_v21  ;;  %v4916_v32 = vmul.f32 %v4900_v55, %v10126_v48  ;;  %v4864_v53 = vmul.f32 %v8767_v38, %v10101_v26  ;;  %v4901_v34 = vsub.f32 1.0, %v8767_v38  ;;  %8788 = vpow2.f32 %v4826_v16 }
 0x655   : > { %v8771_v36 = vpop.eup %8770  ;;  %4886 = vst [vmem:[%s10257_s25 + $0x10] sm:$0xff] %v4865_v35  ;;  %v4918_v37 = vmul.f32 %v4902_v30, %v10213_v1  ;;  %v4866_v39 = vmul.f32 %v8769_v31, %v10171_v23  ;;  %v4903_v33 = vsub.f32 1.0, %v8769_v31  ;;  %8790 = vpow2.f32 %v4824_v19 }
 0x656   : > { %v8773_v22 = vpop.eup %8772  ;;  %4932 = vst [vmem:[#allocation3] sm:$0xff] %v4916_v32  ;;  %4885 = vst [vmem:[%s10257_s25 + $0x8] sm:$0xff] %v4864_v53  ;;  %v4917_v40 = vmul.f32 %v4901_v34, %v10101_v26  ;;  %v4867_v48 = vmul.f32 %v8771_v36, %v10128_v49  ;;  %v4904_v41 = vsub.f32 1.0, %v8771_v36  ;;  %8792 = vpow2.f32 %v4828_v25 }
 0x657   : > { %v8775_v42 = vpop.eup %8774  ;;  %4934 = vst [vmem:[#allocation3 + $0x10] sm:$0xff] %v4918_v37  ;;  %4887 = vst [vmem:[%s10257_s25 + $0x18] sm:$0xff] %v4866_v39  ;;  %v4919_v1 = vmul.f32 %v4903_v33, %v10171_v23  ;;  %v4869_v43 = vmul.f32 %v8773_v22, %v10215_v2  ;;  %v4906_v44 = vsub.f32 1.0, %v8773_v22 }
 0x658   : > { %v8777_v45 = vpop.eup %8776  ;;  %4933 = vst [vmem:[#allocation3 + $0x8] sm:$0xff] %v4917_v40  ;;  %4888 = vst [vmem:[%s10257_s25 + $0x20] sm:$0xff] %v4867_v48  ;;  %v4920_v46 = vmul.f32 %v4904_v41, %v10128_v49  ;;  %v4868_v26 = vmul.f32 %v8775_v42, %v10103_v29  ;;  %v4905_v47 = vsub.f32 1.0, %v8775_v42 }
 0x659   : > { %v8779_v50 = vpop.eup %8778  ;;  %4935 = vst [vmem:[#allocation3 + $0x18] sm:$0xff] %v4919_v1  ;;  %4890 = vst [vmem:[%s10257_s25 + $0x30] sm:$0xff] %v4869_v43  ;;  %v4922_v51 = vmul.f32 %v4906_v44, %v10215_v2  ;;  %v4870_v23 = vmul.f32 %v8777_v45, %v10173_v24  ;;  %v4907_v52 = vsub.f32 1.0, %v8777_v45 }
 0x65a   : > { %v8781_v54 = vpop.eup %8780  ;;  %4936 = vst [vmem:[#allocation3 + $0x20] sm:$0xff] %v4920_v46  ;;  %4889 = vst [vmem:[%s10257_s25 + $0x28] sm:$0xff] %v4868_v26  ;;  %v4921_v56 = vmul.f32 %v4905_v47, %v10103_v29  ;;  %v4871_v49 = vmul.f32 %v8779_v50, %v10159_v13  ;;  %v4908_v57 = vsub.f32 1.0, %v8779_v50 }
 0x65b   : > { %v8783_v59 = vpop.eup %8782  ;;  %4938 = vst [vmem:[#allocation3 + $0x30] sm:$0xff] %v4922_v51  ;;  %4891 = vst [vmem:[%s10257_s25 + $0x38] sm:$0xff] %v4870_v23  ;;  %v4923_v60 = vmul.f32 %v4907_v52, %v10173_v24  ;;  %v4873_v2 = vmul.f32 %v8781_v54, %v10225_v6  ;;  %v4910_v61 = vsub.f32 1.0, %v8781_v54 }
 0x65c   : > { %v8785_v27 = vpop.eup %8784  ;;  %4937 = vst [vmem:[#allocation3 + $0x28] sm:$0xff] %v4921_v56  ;;  %4892 = vst [vmem:[%s10257_s25 + $0x40] sm:$0xff] %v4871_v49  ;;  %v4924_v62 = vmul.f32 %v4908_v57, %v10159_v13  ;;  %v4872_v29 = vmul.f32 %v8783_v59, %v10153_v10  ;;  %v4909_v63 = vsub.f32 1.0, %v8783_v59 }
 0x65d   : > { %v8787_v0 = vpop.eup %8786  ;;  %4939 = vst [vmem:[#allocation3 + $0x38] sm:$0xff] %v4923_v60  ;;  %4894 = vst [vmem:[%s10257_s25 + $0x50] sm:$0xff] %v4873_v2  ;;  %v4926_v28 = vmul.f32 %v4910_v61, %v10225_v6  ;;  %v4874_v24 = vmul.f32 %v8785_v27, %v10217_v3  ;;  %v4911_v9 = vsub.f32 1.0, %v8785_v27 }
 0x65e   : > { %v8789_v5 = vpop.eup %8788  ;;  %4940 = vst [vmem:[#allocation3 + $0x40] sm:$0xff] %v4924_v62  ;;  %4893 = vst [vmem:[%s10257_s25 + $0x48] sm:$0xff] %v4872_v29  ;;  %v4925_v58 = vmul.f32 %v4909_v63, %v10153_v10  ;;  %v4875_v13 = vmul.f32 %v8787_v0, %v10161_v15  ;;  %v4912_v14 = vsub.f32 1.0, %v8787_v0 }
 0x65f   : > { %v8791_v8 = vpop.eup %8790  ;;  %4942 = vst [vmem:[#allocation3 + $0x50] sm:$0xff] %v4926_v28  ;;  %4895 = vst [vmem:[%s10257_s25 + $0x58] sm:$0xff] %v4874_v24  ;;  %v4927_v12 = vmul.f32 %v4911_v9, %v10217_v3  ;;  %v4844_v16 = vadd.f32 1.0, %v8789_v5 }
 0x660   : > { %v8793_v17 = vpop.eup %8792  ;;  %4941 = vst [vmem:[#allocation3 + $0x48] sm:$0xff] %v4925_v58  ;;  %4896 = vst [vmem:[%s10257_s25 + $0x60] sm:$0xff] %v4875_v13  ;;  %v4928_v6 = vmul.f32 %v4912_v14, %v10161_v15  ;;  %v4843_v18 = vadd.f32 1.0, %v8791_v8 }
 0x661   : > { %4943 = vst [vmem:[#allocation3 + $0x58] sm:$0xff] %v4927_v12  ;;  %8794 = vrcp.f32 %v4844_v16  ;;  %v4845_v10 = vadd.f32 1.0, %v8793_v17 }
 0x662   : > { %4944 = vst [vmem:[#allocation3 + $0x60] sm:$0xff] %v4928_v6  ;;  %8796 = vrcp.f32 %v4843_v18 }
 0x663   : > { %8798 = vrcp.f32 %v4845_v10 }
 0x66b   : > { %v8795_v19 = vpop.eup %8794 }
 0x66c   : > { %v8797_v20 = vpop.eup %8796  ;;  %v4877_v3 = vmul.f32 %v8795_v19, %v10227_v7  ;;  %v4914_v21 = vsub.f32 1.0, %v8795_v19 }
 0x66d   : > { %v8799_v55 = vpop.eup %8798  ;;  %v4876_v25 = vmul.f32 %v8797_v20, %v10155_v11  ;;  %v4913_v38 = vsub.f32 1.0, %v8797_v20 }
 0x66e   : > { %4898 = vst [vmem:[%s10257_s25 + $0x70] sm:$0xff] %v4877_v3  ;;  %v4930_v15 = vmul.f32 %v4914_v21, %v10227_v7  ;;  %v4878_v35 = vmul.f32 %v8799_v55, %v10219_v4  ;;  %v4915_v30 = vsub.f32 1.0, %v8799_v55 }
 0x66f   : > { %4897 = vst [vmem:[%s10257_s25 + $0x68] sm:$0xff] %v4876_v25  ;;  %v4929_v31 = vmul.f32 %v4913_v38, %v10155_v11 }
 0x670   : > { %4946 = vst [vmem:[#allocation3 + $0x70] sm:$0xff] %v4930_v15  ;;  %4899 = vst [vmem:[%s10257_s25 + $0x78] sm:$0xff] %v4878_v35  ;;  %v4931_v32 = vmul.f32 %v4915_v30, %v10219_v4 }
 0x671   : > { %4945 = vst [vmem:[#allocation3 + $0x68] sm:$0xff] %v4929_v31 }
 0x672   : > { %4947 = vst [vmem:[#allocation3 + $0x78] sm:$0xff] %v4931_v32 }
 0x673 PF: > { %p7219_p7 = scmp.ne.s32.totalorder %s9465_s27, 5 }
 0x674   : > { %v10306_v2 = vld [vmem:[#allocation3 + $0x8] sm:$0xff] (!%p7219_p7)  ;;  %v10310_v27 = vld [vmem:[#allocation3] sm:$0xff] (!%p7219_p7)  ;;  %vm5084_vm1 = vcmask (!%p7219_p7), 523264   ;;  %v4985_v13 = vld [vmem:[#allocation16 + $0x8] sm:$0xff] (!%p7219_p7)  ;;  %s10644_s13 = sld [smem:[#allocation35_spill]] (!%p7219_p7)  ;;  %s10645_s0 = sld [smem:[#allocation36_spill]] (!%p7219_p7) }
 0x675   : > { %4951 = sbr.rel (%p7219_p7) target bundleno = 2434 (0x982), region = 116  ;;  %v10308_v61 = vld [vmem:[#allocation3 + $0x28] sm:$0xff] (!%p7219_p7)  ;;  %v10312_v62 = vld [vmem:[#allocation3 + $0x20] sm:$0xff] (!%p7219_p7)  ;;  %7220 = vmatprep.mubr.msk.f32.mxu0 (!%p7219_p7), %vm5084_vm1, %v4985_v13  ;;  %7222 = vmatprep.mubr.msk.f32.mxu1 (!%p7219_p7), %vm5084_vm1, %v4985_v13  ;;  %v10328_v13 = vld [vmem:[#allocation3 + $0x10] sm:$0xff] (!%p7219_p7) }
 0x676   : > { %v10314_v29 = vld [vmem:[#allocation3 + $0x48] sm:$0xff] (!%p7219_p7)  ;;  %v10318_v28 = vld [vmem:[#allocation3 + $0x40] sm:$0xff] (!%p7219_p7) }
 0x677   : > { %v4989_v53 = vld [vmem:[#allocation4 + $0x8] sm:$0xff] (!%p7219_p7)  ;;  %v4988_v36 = vld [vmem:[#allocation4] sm:$0xff] (!%p7219_p7)  ;;  %v4991_v12 = vld [vmem:[#allocation4 + $0x18] sm:$0xff] (!%p7219_p7) }
 0x678   : > { %v4993_v34 = vld [vmem:[#allocation4 + $0x28] sm:$0xff] (!%p7219_p7)  ;;  %v4992_v37 = vld [vmem:[#allocation4 + $0x20] sm:$0xff] (!%p7219_p7)  ;;  %v4995_v16 = vld [vmem:[#allocation4 + $0x38] sm:$0xff] (!%p7219_p7) }
 0x679   : > { %v7734_v7 = vpack.c.bf16 (!%p7219_p7), %v4993_v34, %v4989_v53  ;;  %v4997_v39 = vld [vmem:[#allocation4 + $0x48] sm:$0xff] (!%p7219_p7)  ;;  %v7736_v22 = vpack.c.bf16 (!%p7219_p7), %v4992_v37, %v4988_v36  ;;  %v4996_v11 = vld [vmem:[#allocation4 + $0x40] sm:$0xff] (!%p7219_p7)  ;;  %v7782_v17 = vpack.c.bf16 (!%p7219_p7), %v4995_v16, %v4991_v12  ;;  %v4990_v6 = vld [vmem:[#allocation4 + $0x10] sm:$0xff] (!%p7219_p7) }
 0x67a   : > { %v5001_v33 = vld [vmem:[#allocation4 + $0x68] sm:$0xff] (!%p7219_p7)  ;;  %v5000_v48 = vld [vmem:[#allocation4 + $0x60] sm:$0xff] (!%p7219_p7)  ;;  %v4994_v18 = vld [vmem:[#allocation4 + $0x30] sm:$0xff] (!%p7219_p7) }
 0x67b   : > { %v7738_v40 = vpack.c.bf16 (!%p7219_p7), %v5001_v33, %v4997_v39  ;;  %v5005_v41 = vld [vmem:[#allocation4 + $0x88] sm:$0xff] (!%p7219_p7)  ;;  %7735 = vmatprep.subr.bf16.mxu0 (!%p7219_p7), %v7734_v7  ;;  %v7740_v42 = vpack.c.bf16 (!%p7219_p7), %v5000_v48, %v4996_v11  ;;  %v5004_v43 = vld [vmem:[#allocation4 + $0x80] sm:$0xff] (!%p7219_p7)  ;;  %v4999_v10 = vld [vmem:[#allocation4 + $0x58] sm:$0xff] (!%p7219_p7)  ;;  %v7784_v19 = vpack.c.bf16 (!%p7219_p7), %v4994_v18, %v4990_v6  ;;  %7783 = vmatprep.subr.bf16.mxu1 (!%p7219_p7), %v7782_v17 }
 0x67c   : > { %v5009_v4 = vld [vmem:[#allocation4 + $0xa8] sm:$0xff]  ;;  %7737 = vmatpush1.bf16.msra.mxu0 %v7736_v22  ;;  %v5008_v44 = vld [vmem:[#allocation4 + $0xa0] sm:$0xff]  ;;  %v5003_v20 = vld [vmem:[#allocation4 + $0x78] sm:$0xff] }
 0x67d   : > { %7739 = vmatprep.subr.bf16.mxu0 %v7738_v40  ;;  %v7742_v1 = vpack.c.bf16 %v5009_v4, %v5005_v41  ;;  %v5013_v45 = vld [vmem:[#allocation4 + $0xc8] sm:$0xff]  ;;  %v7744_v26 = vpack.c.bf16 %v5008_v44, %v5004_v43  ;;  %v5012_v50 = vld [vmem:[#allocation4 + $0xc0] sm:$0xff]  ;;  %v4998_v3 = vld [vmem:[#allocation4 + $0x50] sm:$0xff]  ;;  %v7786_v25 = vpack.c.bf16 %v5003_v20, %v4999_v10  ;;  %7785 = vmatpush1.bf16.msra.mxu1 %v7784_v19 }
 0x67e   : > { %v5017_v46 = vld [vmem:[#allocation4 + $0xe8] sm:$0xff]  ;;  %v5016_v51 = vld [vmem:[#allocation4 + $0xe0] sm:$0xff]  ;;  %v5002_v21 = vld [vmem:[#allocation4 + $0x70] sm:$0xff] }
 0x67f   : > { %v7746_v47 = vpack.c.bf16 %v5017_v46, %v5013_v45  ;;  %v5021_v23 = vld [vmem:[#allocation4 + $0x108] sm:$0xff]  ;;  %v7748_v54 = vpack.c.bf16 %v5016_v51, %v5012_v50  ;;  %v5020_v56 = vld [vmem:[#allocation4 + $0x100] sm:$0xff]  ;;  %v5007_v38 = vld [vmem:[#allocation4 + $0x98] sm:$0xff]  ;;  %v7788_v53 = vpack.c.bf16 %v5002_v21, %v4998_v3  ;;  %7787 = vmatprep.subr.bf16.mxu1 %v7786_v25 }
 0x680   : > { %7741 = vmatpush1.bf16.msra.mxu0 %v7740_v42  ;;  %v5025_v52 = vld [vmem:[#allocation4 + $0x128] sm:$0xff]  ;;  %v5024_v49 = vld [vmem:[#allocation4 + $0x120] sm:$0xff]  ;;  %v5011_v15 = vld [vmem:[#allocation4 + $0xb8] sm:$0xff] }
 0x681   : > { %7743 = vmatprep.subr.bf16.mxu0 %v7742_v1  ;;  %v5029_v57 = vld [vmem:[#allocation4 + $0x148] sm:$0xff]  ;;  %v7750_v59 = vpack.c.bf16 %v5025_v52, %v5021_v23  ;;  %v5028_v63 = vld [vmem:[#allocation4 + $0x140] sm:$0xff]  ;;  %v7752_v9 = vpack.c.bf16 %v5024_v49, %v5020_v56  ;;  %v7790_v36 = vpack.c.bf16 %v5011_v15, %v5007_v38  ;;  %v5006_v7 = vld [vmem:[#allocation4 + $0x90] sm:$0xff]  ;;  %7789 = vmatpush1.bf16.msra.mxu1 %v7788_v53 }
 0x682   : > { %v5033_v60 = vld [vmem:[#allocation4 + $0x168] sm:$0xff]  ;;  %v10320_v24 = vld [vmem:[#allocation3 + $0x60] sm:$0xff]  ;;  %v5010_v37 = vld [vmem:[#allocation4 + $0xb0] sm:$0xff]  ;;  %v7774_v38 = vpack.c.bf16 %v10308_v61, %v10306_v2 }
 0x683   : > { %v10316_v0 = vld [vmem:[#allocation3 + $0x68] sm:$0xff]  ;;  %v5032_v5 = vld [vmem:[#allocation4 + $0x160] sm:$0xff]  ;;  %v7754_v14 = vpack.c.bf16 %v5033_v60, %v5029_v57  ;;  %v5015_v39 = vld [vmem:[#allocation4 + $0xd8] sm:$0xff]  ;;  %v7792_v4 = vpack.c.bf16 %v5010_v37, %v5006_v7  ;;  %7791 = vmatprep.subr.bf16.mxu1 %v7790_v36 }
 0x684   : > { %7745 = vmatpush1.bf16.msra.mxu0 %v7744_v26  ;;  %v5037_v58 = vld [vmem:[#allocation4 + $0x188] sm:$0xff]  ;;  %v7756_v55 = vpack.c.bf16 %v5032_v5, %v5028_v63  ;;  %v5036_v30 = vld [vmem:[#allocation4 + $0x180] sm:$0xff]  ;;  %v5019_v33 = vld [vmem:[#allocation4 + $0xf8] sm:$0xff]  ;;  %v7778_v36 = vpack.c.bf16 %v10316_v0, %v10314_v29 }
 0x685   : > { %7747 = vmatprep.subr.bf16.mxu0 %v7746_v47  ;;  %v5041_v8 = vld [vmem:[#allocation4 + $0x1a8] sm:$0xff]  ;;  %v5040_v31 = vld [vmem:[#allocation4 + $0x1a0] sm:$0xff]  ;;  %v7794_v1 = vpack.c.bf16 %v5019_v33, %v5015_v39  ;;  %v5014_v43 = vld [vmem:[#allocation4 + $0xd0] sm:$0xff]  ;;  %7793 = vmatpush1.bf16.msra.mxu1 %v7792_v4 }
 0x686   : > { %v7758_v35 = vpack.c.bf16 %v5041_v8, %v5037_v58  ;;  %v5045_v32 = vld [vmem:[#allocation4 + $0x1c8] sm:$0xff]  ;;  %v7760_v22 = vpack.c.bf16 %v5040_v31, %v5036_v30  ;;  %v5044_v11 = vld [vmem:[#allocation4 + $0x1c0] sm:$0xff]  ;;  %v5018_v44 = vld [vmem:[#allocation4 + $0xf0] sm:$0xff] }
 0x687   : > { %v5049_v34 = vld [vmem:[#allocation4 + $0x1e8] sm:$0xff]  ;;  %v5048_v48 = vld [vmem:[#allocation4 + $0x1e0] sm:$0xff]  ;;  %v5023_v45 = vld [vmem:[#allocation4 + $0x118] sm:$0xff]  ;;  %7795 = vmatprep.subr.bf16.mxu1 %v7794_v1 }
 0x688   : > { %7749 = vmatpush1.bf16.msra.mxu0 %v7748_v54  ;;  %v7762_v40 = vpack.c.bf16 %v5049_v34, %v5045_v32  ;;  %v5053_v41 = vld [vmem:[#allocation4 + $0x208] sm:$0xff]  ;;  %v5027_v46 = vld [vmem:[#allocation4 + $0x138] sm:$0xff]  ;;  %v7764_v26 = vpack.c.bf16 %v5048_v48, %v5044_v11  ;;  %v5052_v47 = vld [vmem:[#allocation4 + $0x200] sm:$0xff]  ;;  %v7796_v54 = vpack.c.bf16 %v5018_v44, %v5014_v43  ;;  %v7776_v34 = vpack.c.bf16 %v10312_v62, %v10310_v27 }
 0x689   : > { %7751 = vmatprep.subr.bf16.mxu0 %v7750_v59  ;;  %v5057_v42 = vld [vmem:[#allocation4 + $0x228] sm:$0xff]  ;;  %v5056_v50 = vld [vmem:[#allocation4 + $0x220] sm:$0xff]  ;;  %v5022_v56 = vld [vmem:[#allocation4 + $0x110] sm:$0xff]  ;;  %v7798_v57 = vpack.c.bf16 %v5027_v46, %v5023_v45 }
 0x68a   : > { %v5061_v51 = vld [vmem:[#allocation4 + $0x248] sm:$0xff]  ;;  %v7766_v23 = vpack.c.bf16 %v5057_v42, %v5053_v41  ;;  %v5026_v49 = vld [vmem:[#allocation4 + $0x130] sm:$0xff]  ;;  %v5031_v59 = vld [vmem:[#allocation4 + $0x158] sm:$0xff]  ;;  %v7768_v8 = vpack.c.bf16 %v5056_v50, %v5052_v47  ;;  %7797 = vmatpush1.bf16.msra.mxu1 %v7796_v54 }
 0x68b   : > { %v5065_v52 = vld [vmem:[#allocation4 + $0x268] sm:$0xff]  ;;  %v5035_v60 = vld [vmem:[#allocation4 + $0x178] sm:$0xff]  ;;  %v5064_v5 = vld [vmem:[#allocation4 + $0x260] sm:$0xff]  ;;  %v7800_v18 = vpack.c.bf16 %v5026_v49, %v5022_v56  ;;  %7799 = vmatprep.subr.bf16.mxu1 %v7798_v57 }
 0x68c   : > { %7753 = vmatpush1.bf16.msra.mxu0 %v7752_v9  ;;  %v10324_v63 = vld [vmem:[#allocation3 + $0x18] sm:$0xff]  ;;  %v5060_v9 = vld [vmem:[#allocation4 + $0x240] sm:$0xff]  ;;  %v10336_v17 = vld [vmem:[#allocation3 + $0x50] sm:$0xff]  ;;  %v7770_v6 = vpack.c.bf16 %v5065_v52, %v5061_v51  ;;  %v7802_v19 = vpack.c.bf16 %v5035_v60, %v5031_v59 }
 0x68d   : > { %7755 = vmatprep.subr.bf16.mxu0 %v7754_v14  ;;  %v10326_v58 = vld [vmem:[#allocation3 + $0x38] sm:$0xff]  ;;  %v10330_v14 = vld [vmem:[#allocation3 + $0x30] sm:$0xff]  ;;  %v7772_v25 = vpack.c.bf16 %v5064_v5, %v5060_v9  ;;  %v4987_v48 = vld [vmem:[#allocation16 + $0x18] sm:$0xf] }
 0x68e   : > { %v10332_v12 = vld [vmem:[#allocation3 + $0x58] sm:$0xff]  ;;  %v10338_v10 = vld [vmem:[#allocation3 + $0x70] sm:$0xff]  ;;  %7801 = vmatpush1.bf16.msra.mxu1 %v7800_v18  ;;  %v7822_v50 = vpack.c.bf16 %v10326_v58, %v10324_v63 }
 0x68f   : > { %v10334_v16 = vld [vmem:[#allocation3 + $0x78] sm:$0xff]  ;;  %v5030_v20 = vld [vmem:[#allocation4 + $0x150] sm:$0xff]  ;;  %7803 = vmatprep.subr.bf16.mxu1 %v7802_v19  ;;  %v7828_v49 = vpack.c.bf16 %v10338_v10, %v10336_v17 }
 0x690   : > { %7757 = vmatpush1.bf16.msra.mxu0 %v7756_v55  ;;  %v5034_v3 = vld [vmem:[#allocation4 + $0x170] sm:$0xff]  ;;  %v5039_v21 = vld [vmem:[#allocation4 + $0x198] sm:$0xff]  ;;  %v7826_v54 = vpack.c.bf16 %v10334_v16, %v10332_v12 }
 0x691   : > { %7759 = vmatprep.subr.bf16.mxu0 %v7758_v35  ;;  %v5043_v55 = vld [vmem:[#allocation4 + $0x1b8] sm:$0xff]  ;;  %v7804_v15 = vpack.c.bf16 %v5034_v3, %v5030_v20  ;;  %v5038_v30 = vld [vmem:[#allocation4 + $0x190] sm:$0xff] }
 0x692   : > { %v7806_v35 = vpack.c.bf16 %v5043_v55, %v5039_v21  ;;  %v5042_v31 = vld [vmem:[#allocation4 + $0x1b0] sm:$0xff]  ;;  %v5047_v32 = vld [vmem:[#allocation4 + $0x1d8] sm:$0xff] }
 0x693   : > { %v5051_v53 = vld [vmem:[#allocation4 + $0x1f8] sm:$0xff]  ;;  %7805 = vmatpush1.bf16.msra.mxu1 %v7804_v15  ;;  %v7808_v7 = vpack.c.bf16 %v5042_v31, %v5038_v30  ;;  %v5046_v61 = vld [vmem:[#allocation4 + $0x1d0] sm:$0xff] }
 0x694   : > { %7761 = vmatpush1.bf16.msra.mxu0 %v7760_v22  ;;  %7807 = vmatprep.subr.bf16.mxu1 %v7806_v35  ;;  %v7810_v2 = vpack.c.bf16 %v5051_v53, %v5047_v32  ;;  %v5050_v37 = vld [vmem:[#allocation4 + $0x1f0] sm:$0xff]  ;;  %v5055_v39 = vld [vmem:[#allocation4 + $0x218] sm:$0xff]  ;;  %v7780_v22 = vpack.c.bf16 %v10320_v24, %v10318_v28 }
 0x695   : > { %7763 = vmatprep.subr.bf16.mxu0 %v7762_v40  ;;  %v5059_v33 = vld [vmem:[#allocation4 + $0x238] sm:$0xff]  ;;  %v7812_v27 = vpack.c.bf16 %v5050_v37, %v5046_v61  ;;  %v4984_v40 = vld [vmem:[#allocation16] sm:$0xff] }
 0x696   : > { %v8802_v62 = vld [vmem:[%s9777_s14 + $0x4] ss:$16 sps:$4 sm:$0xff]   ;;  %v7814_v29 = vpack.c.bf16 %v5059_v33, %v5055_v39  ;;  %v5054_v0 = vld [vmem:[#allocation4 + $0x210] sm:$0xff]  ;;  %v4986_v45 = vld [vmem:[#allocation16 + $0x10] sm:$0xf] }
 0x697   : > { %7809 = vmatpush1.bf16.msra.mxu1 %v7808_v7  ;;  %v5058_v11 = vld [vmem:[#allocation4 + $0x230] sm:$0xff]  ;;  %v5063_v41 = vld [vmem:[#allocation4 + $0x258] sm:$0xff] }
 0x698   : > { %7765 = vmatpush1.bf16.msra.mxu0 %v7764_v26  ;;  %7811 = vmatprep.subr.bf16.mxu1 %v7810_v2  ;;  %v5067_v4 = vld [vmem:[#allocation4 + $0x278] sm:$0xff]  ;;  %v7816_v1 = vpack.c.bf16 %v5058_v11, %v5054_v0  ;;  %v5062_v43 = vld [vmem:[#allocation4 + $0x250] sm:$0xff] }
 0x699   : > { %7767 = vmatprep.subr.bf16.mxu0 %v7766_v23  ;;  %v8800_v42 = vld [vmem:[%s9777_s14] ss:$16 sps:$4 sm:$0xff]   ;;  %v8808_v28 = vld [vmem:[%s9777_s14 + $0x24] ss:$16 sps:$4 sm:$0xff]   ;;  %v7818_v24 = vpack.c.bf16 %v5067_v4, %v5063_v41  ;;  %v7824_v23 = vpack.c.bf16 %v10330_v14, %v10328_v13  ;;  %v8805_v59 = vld [vmem:[%s9777_s14 + $0xc] ss:$16 sps:$4 sm:$0xff]  }
 0x69a   : > { %v5066_v44 = vld [vmem:[#allocation4 + $0x270] sm:$0xff]  ;;  %v8814_v47 = vld [vmem:[%s9777_s14 + $0x44] ss:$16 sps:$4 sm:$0xff]  }
 0x69b   : > { %7813 = vmatpush1.bf16.msra.mxu1 %v7812_v27  ;;  %v8806_v46 = vld [vmem:[%s9777_s14 + $0x20] ss:$16 sps:$4 sm:$0xff]   ;;  %v7820_v26 = vpack.c.bf16 %v5066_v44, %v5062_v43  ;;  %v8820_v52 = vld [vmem:[%s9777_s14 + $0x64] ss:$16 sps:$4 sm:$0xff]   ;;  %v8803_v63 = vld [vmem:[%s9777_s14 + $0x8] ss:$16 sps:$4 sm:$0xff]  }
 0x69c   : > { %7769 = vmatpush1.bf16.msra.mxu0 %v7768_v8  ;;  %7815 = vmatprep.subr.bf16.mxu1 %v7814_v29  ;;  %v8812_v51 = vld [vmem:[%s9777_s14 + $0x40] ss:$16 sps:$4 sm:$0xff]   ;;  %v8826_v57 = vld [vmem:[%s9777_s14 + $0x84] ss:$16 sps:$4 sm:$0xff]   ;;  %v8811_v9 = vld [vmem:[%s9777_s14 + $0x2c] ss:$16 sps:$4 sm:$0xff]  }
 0x69d   : > { %7771 = vmatprep.subr.bf16.mxu0 %v7770_v6  ;;  %v8818_v56 = vld [vmem:[%s9777_s14 + $0x60] ss:$16 sps:$4 sm:$0xff]   ;;  %v8832_v5 = vld [vmem:[%s9777_s14 + $0xa4] ss:$16 sps:$4 sm:$0xff]   ;;  %v8809_v58 = vld [vmem:[%s9777_s14 + $0x28] ss:$16 sps:$4 sm:$0xff]  }
 0x69e   : > { %v8824_v60 = vld [vmem:[%s9777_s14 + $0x80] ss:$16 sps:$4 sm:$0xff]   ;;  %v8838_v14 = vld [vmem:[%s9777_s14 + $0xc4] ss:$16 sps:$4 sm:$0xff]   ;;  %v8817_v8 = vld [vmem:[%s9777_s14 + $0x4c] ss:$16 sps:$4 sm:$0xff]  }
 0x69f   : > { %7817 = vmatpush1.bf16.msra.mxu1 %v7816_v1  ;;  %v8830_v13 = vld [vmem:[%s9777_s14 + $0xa0] ss:$16 sps:$4 sm:$0xff]   ;;  %v8815_v16 = vld [vmem:[%s9777_s14 + $0x48] ss:$16 sps:$4 sm:$0xff]   ;;  %v8844_v17 = vld [vmem:[%s9777_s14 + $0xe4] ss:$16 sps:$4 sm:$0xff]  }
 0x6a0   : > { %7773 = vmatpush1.bf16.msra.mxu0 %v7772_v25  ;;  %7819 = vmatprep.subr.bf16.mxu1 %v7818_v24  ;;  %v8836_v12 = vld [vmem:[%s9777_s14 + $0xc0] ss:$16 sps:$4 sm:$0xff]   ;;  %v8823_v6 = vld [vmem:[%s9777_s14 + $0x6c] ss:$16 sps:$4 sm:$0xff]   ;;  %v8821_v10 = vld [vmem:[%s9777_s14 + $0x68] ss:$16 sps:$4 sm:$0xff]  }
 0x6a1   : > { %7775 = vmatprep.subr.bf16.mxu0 %v7774_v38  ;;  %v8842_v18 = vld [vmem:[%s9777_s14 + $0xe0] ss:$16 sps:$4 sm:$0xff]   ;;  %v8850_v19 = vld [vmem:[%s9777_s14 + $0x104] ss:$16 sps:$4 sm:$0xff]   ;;  %v8829_v20 = vld [vmem:[%s9777_s14 + $0x8c] ss:$16 sps:$4 sm:$0xff]  }
 0x6a2   : > { %v8848_v3 = vld [vmem:[%s9777_s14 + $0x100] ss:$16 sps:$4 sm:$0xff]   ;;  %v8827_v21 = vld [vmem:[%s9777_s14 + $0x88] ss:$16 sps:$4 sm:$0xff]   ;;  %v8856_v55 = vld [vmem:[%s9777_s14 + $0x124] ss:$16 sps:$4 sm:$0xff]  }
 0x6a3   : > { %7821 = vmatpush1.bf16.msra.mxu1 %v7820_v26  ;;  %v8835_v25 = vld [vmem:[%s9777_s14 + $0xac] ss:$16 sps:$4 sm:$0xff]   ;;  %v8854_v38 = vld [vmem:[%s9777_s14 + $0x120] ss:$16 sps:$4 sm:$0xff]   ;;  %v8833_v15 = vld [vmem:[%s9777_s14 + $0xa8] ss:$16 sps:$4 sm:$0xff]  }
 0x6a4   : > { %7777 = vmatpush1.bf16.msra.mxu0 %v7776_v34  ;;  %7823 = vmatprep.subr.bf16.mxu1 %v7822_v50  ;;  %v8862_v35 = vld [vmem:[%s9777_s14 + $0x144] ss:$16 sps:$4 sm:$0xff]   ;;  %v8841_v30 = vld [vmem:[%s9777_s14 + $0xcc] ss:$16 sps:$4 sm:$0xff]   ;;  %v8860_v31 = vld [vmem:[%s9777_s14 + $0x140] ss:$16 sps:$4 sm:$0xff]  }
 0x6a5   : > { %7779 = vmatprep.subr.bf16.mxu0 %v7778_v36  ;;  %v8839_v32 = vld [vmem:[%s9777_s14 + $0xc8] ss:$16 sps:$4 sm:$0xff]   ;;  %v8868_v53 = vld [vmem:[%s9777_s14 + $0x164] ss:$16 sps:$4 sm:$0xff]   ;;  %v8847_v34 = vld [vmem:[%s9777_s14 + $0xec] ss:$16 sps:$4 sm:$0xff]  }
 0x6a6   : > { %v8866_v36 = vld [vmem:[%s9777_s14 + $0x160] ss:$16 sps:$4 sm:$0xff]   ;;  %v8845_v7 = vld [vmem:[%s9777_s14 + $0xe8] ss:$16 sps:$4 sm:$0xff]   ;;  %v8874_v2 = vld [vmem:[%s9777_s14 + $0x184] ss:$16 sps:$4 sm:$0xff]  }
 0x6a7   : > { %7825 = vmatpush1.bf16.msra.mxu1 %v7824_v23  ;;  %v8853_v61 = vld [vmem:[%s9777_s14 + $0x10c] ss:$16 sps:$4 sm:$0xff]   ;;  %v8872_v37 = vld [vmem:[%s9777_s14 + $0x180] ss:$16 sps:$4 sm:$0xff]   ;;  %v8851_v39 = vld [vmem:[%s9777_s14 + $0x108] ss:$16 sps:$4 sm:$0xff]  }
 0x6a8   : > { %7781 = vmatpush1.bf16.msra.mxu0 %v7780_v22  ;;  %7827 = vmatprep.subr.bf16.mxu1 %v7826_v54  ;;  %v8880_v33 = vld [vmem:[%s9777_s14 + $0x1a4] ss:$16 sps:$4 sm:$0xff]   ;;  %v8859_v22 = vld [vmem:[%s9777_s14 + $0x12c] ss:$16 sps:$4 sm:$0xff]   ;;  %v8878_v27 = vld [vmem:[%s9777_s14 + $0x1a0] ss:$16 sps:$4 sm:$0xff]  }
 0x6a9   : > { %6039 = vmatprep.subr.bf16.mxu0 %v8802_v62  ;;  %v8857_v62 = vld [vmem:[%s9777_s14 + $0x128] ss:$16 sps:$4 sm:$0xff]   ;;  %v8871_v0 = vld [vmem:[%s9777_s14 + $0x16c] ss:$16 sps:$4 sm:$0xff]   ;;  %v8886_v1 = vld [vmem:[%s9777_s14 + $0x1c4] ss:$16 sps:$4 sm:$0xff]  }
 0x6aa   : > { %v8863_v29 = vld [vmem:[%s9777_s14 + $0x148] ss:$16 sps:$4 sm:$0xff]   ;;  %v8883_v4 = vld [vmem:[%s9777_s14 + $0x1ac] ss:$16 sps:$4 sm:$0xff]   ;;  %v8884_v24 = vld [vmem:[%s9777_s14 + $0x1c0] ss:$16 sps:$4 sm:$0xff]  }
 0x6ab   : > { %5156 = vmatmul.mubr.f32.vlgmr.msra.gmra.mrb[0].mxu0 %v4984_v40  ;;  %7829 = vmatpush1.bf16.msra.mxu1 %v7828_v49  ;;  %v8869_v11 = vld [vmem:[%s9777_s14 + $0x168] ss:$16 sps:$4 sm:$0xff]   ;;  %v8892_v44 = vld [vmem:[%s9777_s14 + $0x1e4] ss:$16 sps:$4 sm:$0xff]   ;;  %v8901_v50 = vld [vmem:[%s9777_s14 + $0x20c] ss:$16 sps:$4 sm:$0xff]  }
 0x6ac   : > { %7221 = vmatprep.mubr.msk.f32.mxu0 %vm5084_vm1, %v4987_v48  ;;  %6040 = vmatpush1.bf16.msra.mxu0 %v8800_v42  ;;  %v8875_v41 = vld [vmem:[%s9777_s14 + $0x188] ss:$16 sps:$4 sm:$0xff]  }
 0x6ad   : > { %6041 = vmatprep.subr.bf16.mxu0 %v8808_v28  ;;  %6125 = vmatprep.subr.bf16.mxu1 %v8805_v59  ;;  %v8881_v42 = vld [vmem:[%s9777_s14 + $0x1a8] ss:$16 sps:$4 sm:$0xff]   ;;  %v8889_v28 = vld [vmem:[%s9777_s14 + $0x1cc] ss:$16 sps:$4 sm:$0xff]  }
 0x6ae   : > { %5233 = vmatmul.mubr.f32.vlgmr.msra.gmra.mrb[0].mxu1 %v4984_v40  ;;  %v8865_v40 = vld [vmem:[%s9777_s14 + $0x14c] ss:$16 sps:$4 sm:$0xff]   ;;  %v8887_v43 = vld [vmem:[%s9777_s14 + $0x1c8] ss:$16 sps:$4 sm:$0xff]  }
 0x6af   : > { %5162 = vmatmul.mubr.f32.gmra.mrb[2].mxu0 %v4986_v45  ;;  %7223 = vmatprep.mubr.msk.f32.mxu1 %vm5084_vm1, %v4987_v48  ;;  %v8877_v48 = vld [vmem:[%s9777_s14 + $0x18c] ss:$16 sps:$4 sm:$0xff]   ;;  %v8893_v26 = vld [vmem:[%s9777_s14 + $0x1e8] ss:$16 sps:$4 sm:$0xff]  }
 0x6b0   : > { %6042 = vmatpush1.bf16.msra.mxu0 %v8806_v46  ;;  %6126 = vmatpush1.bf16.msra.mxu1 %v8803_v63  ;;  %v8890_v46 = vld [vmem:[%s9777_s14 + $0x1e0] ss:$16 sps:$4 sm:$0xff]   ;;  %v8899_v59 = vld [vmem:[%s9777_s14 + $0x208] ss:$16 sps:$4 sm:$0xff]   ;;  %v8907_v63 = vld [vmem:[%s9777_s14 + $0x22c] ss:$16 sps:$4 sm:$0xff]  }
 0x6b1   : > { %6043 = vmatprep.subr.bf16.mxu0 %v8814_v47  ;;  %6127 = vmatprep.subr.bf16.mxu1 %v8811_v9  ;;  %v8898_v47 = vld [vmem:[%s9777_s14 + $0x204] ss:$16 sps:$4 sm:$0xff]   ;;  %v8902_v9 = vld [vmem:[%s9777_s14 + $0x220] ss:$16 sps:$4 sm:$0xff]  }
 0x6b2   : > { %5239 = vmatmul.mubr.f32.gmra.mrb[2].mxu1 %v4986_v45  ;;  %v8895_v45 = vld [vmem:[%s9777_s14 + $0x1ec] ss:$16 sps:$4 sm:$0xff]  }
 0x6b4   : > { %6044 = vmatpush1.bf16.msra.mxu0 %v8812_v51  ;;  %6128 = vmatpush1.bf16.msra.mxu1 %v8809_v58  ;;  %v8910_v58 = vld [vmem:[%s9777_s14 + $0x244] ss:$16 sps:$4 sm:$0xff]  }
 0x6b5   : > { %6045 = vmatprep.subr.bf16.mxu0 %v8820_v52  ;;  %6129 = vmatprep.subr.bf16.mxu1 %v8817_v8  ;;  %v8911_v8 = vld [vmem:[%s9777_s14 + $0x248] ss:$16 sps:$4 sm:$0xff]  }
 0x6b8   : > { %6046 = vmatpush1.bf16.msra.mxu0 %v8818_v56  ;;  %6130 = vmatpush1.bf16.msra.mxu1 %v8815_v16  ;;  %v8919_v16 = vld [vmem:[%s9777_s14 + $0x26c] ss:$16 sps:$4 sm:$0xff]  }
 0x6b9   : > { %6047 = vmatprep.subr.bf16.mxu0 %v8826_v57  ;;  %6131 = vmatprep.subr.bf16.mxu1 %v8823_v6  ;;  %v8896_v57 = vld [vmem:[%s9777_s14 + $0x200] ss:$16 sps:$4 sm:$0xff]  }
 0x6ba   : > { %v8914_v6 = vld [vmem:[%s9777_s14 + $0x260] ss:$16 sps:$4 sm:$0xff]  }
 0x6bc   : > { %6048 = vmatpush1.bf16.msra.mxu0 %v8824_v60  ;;  %6132 = vmatpush1.bf16.msra.mxu1 %v8821_v10  ;;  %v8904_v60 = vld [vmem:[%s9777_s14 + $0x224] ss:$16 sps:$4 sm:$0xff]  }
 0x6bd   : > { %6049 = vmatprep.subr.bf16.mxu0 %v8832_v5  ;;  %6133 = vmatprep.subr.bf16.mxu1 %v8829_v20  ;;  %v8905_v5 = vld [vmem:[%s9777_s14 + $0x228] ss:$16 sps:$4 sm:$0xff]   ;;  %v8925_v20 = vld [vmem:[%s9777_s14 + $0x28c] ss:$16 sps:$4 sm:$0xff]  }
 0x6c0   : > { %6050 = vmatpush1.bf16.msra.mxu0 %v8830_v13  ;;  %6134 = vmatpush1.bf16.msra.mxu1 %v8827_v21  ;;  %v8913_v13 = vld [vmem:[%s9777_s14 + $0x24c] ss:$16 sps:$4 sm:$0xff]   ;;  %v8920_v21 = vld [vmem:[%s9777_s14 + $0x280] ss:$16 sps:$4 sm:$0xff]  }
 0x6c1   : > { %6051 = vmatprep.subr.bf16.mxu0 %v8838_v14  ;;  %6135 = vmatprep.subr.bf16.mxu1 %v8835_v25  ;;  %v8908_v14 = vld [vmem:[%s9777_s14 + $0x240] ss:$16 sps:$4 sm:$0xff]  }
 0x6c4   : > { %6052 = vmatpush1.bf16.msra.mxu0 %v8836_v12  ;;  %6136 = vmatpush1.bf16.msra.mxu1 %v8833_v15  ;;  %v8916_v12 = vld [vmem:[%s9777_s14 + $0x264] ss:$16 sps:$4 sm:$0xff]  }
 0x6c5   : > { %6053 = vmatprep.subr.bf16.mxu0 %v8844_v17  ;;  %6137 = vmatprep.subr.bf16.mxu1 %v8841_v30  ;;  %v8928_v15 = vld [vmem:[%s9777_s14 + $0x2a4] ss:$16 sps:$4 sm:$0xff]  }
 0x6c8   : > { %6054 = vmatpush1.bf16.msra.mxu0 %v8842_v18  ;;  %6138 = vmatpush1.bf16.msra.mxu1 %v8839_v32  ;;  %v8917_v18 = vld [vmem:[%s9777_s14 + $0x268] ss:$16 sps:$4 sm:$0xff]  }
 0x6c9   : > { %6055 = vmatprep.subr.bf16.mxu0 %v8850_v19  ;;  %6139 = vmatprep.subr.bf16.mxu1 %v8847_v34  ;;  %v8922_v19 = vld [vmem:[%s9777_s14 + $0x284] ss:$16 sps:$4 sm:$0xff]   ;;  %v8929_v32 = vld [vmem:[%s9777_s14 + $0x2a8] ss:$16 sps:$4 sm:$0xff]   ;;  %v8937_v34 = vld [vmem:[%s9777_s14 + $0x2cc] ss:$16 sps:$4 sm:$0xff]  }
 0x6cc   : > { %6056 = vmatpush1.bf16.msra.mxu0 %v8848_v3  ;;  %6140 = vmatpush1.bf16.msra.mxu1 %v8845_v7  ;;  %v8935_v7 = vld [vmem:[%s9777_s14 + $0x2c8] ss:$16 sps:$4 sm:$0xff]  }
 0x6cd   : > { %6057 = vmatprep.subr.bf16.mxu0 %v8856_v55  ;;  %6141 = vmatprep.subr.bf16.mxu1 %v8853_v61  ;;  %v8923_v55 = vld [vmem:[%s9777_s14 + $0x288] ss:$16 sps:$4 sm:$0xff]   ;;  %v8943_v61 = vld [vmem:[%s9777_s14 + $0x2ec] ss:$16 sps:$4 sm:$0xff]  }
 0x6d0   : > { %6058 = vmatpush1.bf16.msra.mxu0 %v8854_v38  ;;  %6142 = vmatpush1.bf16.msra.mxu1 %v8851_v39  ;;  %v8941_v39 = vld [vmem:[%s9777_s14 + $0x2e8] ss:$16 sps:$4 sm:$0xff]  }
 0x6d1   : > { %6059 = vmatprep.subr.bf16.mxu0 %v8862_v35  ;;  %6143 = vmatprep.subr.bf16.mxu1 %v8859_v22  ;;  %v8931_v35 = vld [vmem:[%s9777_s14 + $0x2ac] ss:$16 sps:$4 sm:$0xff]  }
 0x6d2   : > { %v8949_v22 = vld [vmem:[%s9777_s14 + $0x30c] ss:$16 sps:$4 sm:$0xff]  }
 0x6d4   : > { %6060 = vmatpush1.bf16.msra.mxu0 %v8860_v31  ;;  %6144 = vmatpush1.bf16.msra.mxu1 %v8857_v62  ;;  %v8926_v31 = vld [vmem:[%s9777_s14 + $0x2a0] ss:$16 sps:$4 sm:$0xff]   ;;  %v8947_v62 = vld [vmem:[%s9777_s14 + $0x308] ss:$16 sps:$4 sm:$0xff]  }
 0x6d5   : > { %6061 = vmatprep.subr.bf16.mxu0 %v8868_v53  ;;  %6145 = vmatprep.subr.bf16.mxu1 %v8865_v40  ;;  %v8934_v53 = vld [vmem:[%s9777_s14 + $0x2c4] ss:$16 sps:$4 sm:$0xff]  }
 0x6d6   : > { %v8952_v40 = vld [vmem:[%s9777_s14 + $0x324] ss:$16 sps:$4 sm:$0xff]  }
 0x6d8   : > { %6062 = vmatpush1.bf16.msra.mxu0 %v8866_v36  ;;  %6146 = vmatpush1.bf16.msra.mxu1 %v8863_v29  ;;  %v8932_v36 = vld [vmem:[%s9777_s14 + $0x2c0] ss:$16 sps:$4 sm:$0xff]   ;;  %v8955_v29 = vld [vmem:[%s9777_s14 + $0x32c] ss:$16 sps:$4 sm:$0xff]  }
 0x6d9   : > { %6063 = vmatprep.subr.bf16.mxu0 %v8874_v2  ;;  %6147 = vmatprep.subr.bf16.mxu1 %v8871_v0  ;;  %v8940_v2 = vld [vmem:[%s9777_s14 + $0x2e4] ss:$16 sps:$4 sm:$0xff]   ;;  %v8950_v0 = vld [vmem:[%s9777_s14 + $0x320] ss:$16 sps:$4 sm:$0xff]  }
 0x6dc   : > { %6064 = vmatpush1.bf16.msra.mxu0 %v8872_v37  ;;  %6148 = vmatpush1.bf16.msra.mxu1 %v8869_v11  ;;  %v8938_v37 = vld [vmem:[%s9777_s14 + $0x2e0] ss:$16 sps:$4 sm:$0xff]   ;;  %v8953_v11 = vld [vmem:[%s9777_s14 + $0x328] ss:$16 sps:$4 sm:$0xff]  }
 0x6dd   : > { %6065 = vmatprep.subr.bf16.mxu0 %v8880_v33  ;;  %6149 = vmatprep.subr.bf16.mxu1 %v8877_v48  ;;  %v8946_v33 = vld [vmem:[%s9777_s14 + $0x304] ss:$16 sps:$4 sm:$0xff]  }
 0x6de   : > { %v8958_v48 = vld [vmem:[%s9777_s14 + $0x344] ss:$16 sps:$4 sm:$0xff]  }
 0x6e0   : > { %6066 = vmatpush1.bf16.msra.mxu0 %v8878_v27  ;;  %6150 = vmatpush1.bf16.msra.mxu1 %v8875_v41  ;;  %v8944_v27 = vld [vmem:[%s9777_s14 + $0x300] ss:$16 sps:$4 sm:$0xff]   ;;  %v8961_v41 = vld [vmem:[%s9777_s14 + $0x34c] ss:$16 sps:$4 sm:$0xff]  }
 0x6e1   : > { %6151 = vmatprep.subr.bf16.mxu1 %v8883_v4  ;;  %6067 = vmatprep.subr.bf16.mxu0 %v8886_v1  ;;  %v8956_v4 = vld [vmem:[%s9777_s14 + $0x340] ss:$16 sps:$4 sm:$0xff]   ;;  %v8964_v1 = vld [vmem:[%s9777_s14 + $0x364] ss:$16 sps:$4 sm:$0xff]  }
 0x6e4   : > { %6152 = vmatpush1.bf16.msra.mxu1 %v8881_v42  ;;  %6068 = vmatpush1.bf16.msra.mxu0 %v8884_v24  ;;  %v8959_v42 = vld [vmem:[%s9777_s14 + $0x348] ss:$16 sps:$4 sm:$0xff]   ;;  %v8962_v24 = vld [vmem:[%s9777_s14 + $0x360] ss:$16 sps:$4 sm:$0xff]  }
 0x6e5   : > { %6153 = vmatprep.subr.bf16.mxu1 %v8889_v28  ;;  %6069 = vmatprep.subr.bf16.mxu0 %v8892_v44  ;;  %v8967_v28 = vld [vmem:[%s9777_s14 + $0x36c] ss:$16 sps:$4 sm:$0xff]   ;;  %v8970_v44 = vld [vmem:[%s9777_s14 + $0x384] ss:$16 sps:$4 sm:$0xff]  }
 0x6e8   : > { %6154 = vmatpush1.bf16.msra.mxu1 %v8887_v43  ;;  %6070 = vmatpush1.bf16.msra.mxu0 %v8890_v46  ;;  %v8965_v43 = vld [vmem:[%s9777_s14 + $0x368] ss:$16 sps:$4 sm:$0xff]   ;;  %v8968_v46 = vld [vmem:[%s9777_s14 + $0x380] ss:$16 sps:$4 sm:$0xff]  }
 0x6e9   : > { %6155 = vmatprep.subr.bf16.mxu1 %v8895_v45  ;;  %6082 = vmatprep.subr.bf16.mxu0 %v8898_v47  ;;  %v8973_v45 = vld [vmem:[%s9777_s14 + $0x38c] ss:$16 sps:$4 sm:$0xff]   ;;  %v8976_v47 = vld [vmem:[%s9777_s14 + $0x3a4] ss:$16 sps:$4 sm:$0xff]  }
 0x6ec   : > { %6156 = vmatpush1.bf16.msra.mxu1 %v8893_v26  ;;  %v8971_v26 = vld [vmem:[%s9777_s14 + $0x388] ss:$16 sps:$4 sm:$0xff]  }
 0x6ed   : > { %6168 = vmatprep.subr.bf16.mxu1 %v8901_v50  ;;  %v8979_v50 = vld [vmem:[%s9777_s14 + $0x3ac] ss:$16 sps:$4 sm:$0xff]  }
 0x77e   : > { %v10424_v51 = vpop.f32.mrb[0].mxu0 }
 0x77f   : > { %6228 = vst [vmem:[%s10644_s13] sm:$0xff] %v10424_v51  ;;  %v10430_v23 = vpop.f32.mrb[1].mxu0 }
 0x780   : > { %6229 = vst [vmem:[%s10644_s13 + $0x8] sm:$0xff] %v10430_v23 }
 0x781   : > { %v10456_v17 = vpop.f32.mrb[0].mxu1 }
 0x782   : > { %v10436_v52 = vpop.f32.mrb[2].mxu0  ;;  %6230 = vst [vmem:[%s10644_s13 + $0x10] sm:$0xff] %v10456_v17  ;;  %v10464_v10 = vpop.f32.mrb[1].mxu1 }
 0x783   : > { %v5245_v54 = vpack.c.bf16 %v10436_v52, %v10424_v51  ;;  %v10440_v56 = vpop.f32.mrb[3].mxu0  ;;  %6231 = vst [vmem:[%s10644_s13 + $0x18] sm:$0xff] %v10464_v10 }
 0x784   : > { %v5246_v49 = vpack.c.bf16 %v10440_v56, %v10430_v23 }
 0x785   : > { %v10472_v3 = vpop.f32.mrb[2].mxu1 }
 0x786   : > { %6071 = vmatprep.mubr.bf16.mxu0 %v5246_v49  ;;  %6157 = vmatprep.mubr.bf16.mxu1 %v5246_v49  ;;  %v10478_v25 = vpack.c.bf16 %v10472_v3, %v10456_v17  ;;  %v10480_v38 = vpop.f32.mrb[3].mxu1  ;;  %v8977_v49 = vld [vmem:[%s9777_s14 + $0x3a8] ss:$16 sps:$4 sm:$0xff]  }
 0x787   : > { %6072 = vmatmul.mubr.bf16.vlgmr.msra.gmra.mrb[4].mxu0 %v5245_v54  ;;  %6158 = vmatmul.mubr.bf16.vlgmr.msra.gmra.mrb[4].mxu1 %v5245_v54  ;;  %v5248_v30 = vpack.c.bf16 %v10480_v38, %v10464_v10  ;;  %v8974_v54 = vld [vmem:[%s9777_s14 + $0x3a0] ss:$16 sps:$4 sm:$0xff]  }
 0x788   : > { %6083 = vmatpush1.bf16.msra.mxu0 %v8896_v57  ;;  %6169 = vmatpush1.bf16.msra.mxu1 %v8899_v59  ;;  %v8982_v57 = vld [vmem:[%s9777_s14 + $0x3c4] ss:$16 sps:$4 sm:$0xff]   ;;  %v8985_v59 = vld [vmem:[%s9777_s14 + $0x3cc] ss:$16 sps:$4 sm:$0xff]  }
 0x789   : > { %6084 = vmatprep.subr.bf16.mxu0 %v8904_v60  ;;  %6170 = vmatprep.subr.bf16.mxu1 %v8907_v63  ;;  %v8980_v60 = vld [vmem:[%s9777_s14 + $0x3c0] ss:$16 sps:$4 sm:$0xff]   ;;  %v8983_v63 = vld [vmem:[%s9777_s14 + $0x3c8] ss:$16 sps:$4 sm:$0xff]  }
 0x78a   : > { %6114 = vmatprep.mubr.bf16.mxu0 %v5248_v30  ;;  %6200 = vmatprep.mubr.bf16.mxu1 %v5248_v30  ;;  %v9004_v30 = vld [vmem:[#allocation18 + $0x58] sm:$0xff]  }
 0x78c   : > { %6085 = vmatpush1.bf16.msra.mxu0 %v8902_v9  ;;  %6171 = vmatpush1.bf16.msra.mxu1 %v8905_v5  ;;  %v8988_v9 = vld [vmem:[%s9777_s14 + $0x3e4] ss:$16 sps:$4 sm:$0xff]   ;;  %v8991_v5 = vld [vmem:[%s9777_s14 + $0x3ec] ss:$16 sps:$4 sm:$0xff]  }
 0x78d   : > { %6086 = vmatprep.subr.bf16.mxu0 %v8910_v58  ;;  %6172 = vmatprep.subr.bf16.mxu1 %v8913_v13  ;;  %v8986_v58 = vld [vmem:[%s9777_s14 + $0x3e0] ss:$16 sps:$4 sm:$0xff]   ;;  %v8989_v13 = vld [vmem:[%s9777_s14 + $0x3e8] ss:$16 sps:$4 sm:$0xff]  }
 0x790   : > { %6087 = vmatpush1.bf16.msra.mxu0 %v8908_v14  ;;  %6173 = vmatpush1.bf16.msra.mxu1 %v8911_v8  ;;  %v8992_v14 = vld [vmem:[#allocation18 + $0x40] sm:$0xff]  }
 0x791   : > { %6088 = vmatprep.subr.bf16.mxu0 %v8916_v12  ;;  %6174 = vmatprep.subr.bf16.mxu1 %v8919_v16  ;;  %v8993_v8 = vld [vmem:[#allocation18 + $0xc0] sm:$0xff]  }
 0x792   : > { %v8994_v12 = vld [vmem:[#allocation18] sm:$0xff]  }
 0x793   : > { %v8995_v16 = vld [vmem:[#allocation18 + $0x80] sm:$0xff]  }
 0x794   : > { %6089 = vmatpush1.bf16.msra.mxu0 %v8914_v6  ;;  %6175 = vmatpush1.bf16.msra.mxu1 %v8917_v18  ;;  %v8996_v6 = vld [vmem:[#allocation18 + $0x48] sm:$0xff]  }
 0x795   : > { %6090 = vmatprep.subr.bf16.mxu0 %v8922_v19  ;;  %6176 = vmatprep.subr.bf16.mxu1 %v8925_v20  ;;  %v8997_v18 = vld [vmem:[#allocation18 + $0xc8] sm:$0xff]  }
 0x796   : > { %v8998_v19 = vld [vmem:[#allocation18 + $0x8] sm:$0xff]  }
 0x797   : > { %v8999_v20 = vld [vmem:[#allocation18 + $0x88] sm:$0xff]  }
 0x798   : > { %6091 = vmatpush1.bf16.msra.mxu0 %v8920_v21  ;;  %6177 = vmatpush1.bf16.msra.mxu1 %v8923_v55  ;;  %v9000_v21 = vld [vmem:[#allocation18 + $0x50] sm:$0xff]  }
 0x799   : > { %6092 = vmatprep.subr.bf16.mxu0 %v8928_v15  ;;  %6178 = vmatprep.subr.bf16.mxu1 %v8931_v35  ;;  %v9001_v55 = vld [vmem:[#allocation18 + $0xd0] sm:$0xff]  }
 0x79a   : > { %v9002_v15 = vld [vmem:[#allocation18 + $0x10] sm:$0xff]  }
 0x79b   : > { %v9003_v35 = vld [vmem:[#allocation18 + $0x90] sm:$0xff]  }
 0x79c   : > { %6093 = vmatpush1.bf16.msra.mxu0 %v8926_v31  ;;  %6179 = vmatpush1.bf16.msra.mxu1 %v8929_v32  ;;  %v9005_v31 = vld [vmem:[#allocation18 + $0xd8] sm:$0xff]  }
 0x79d   : > { %6094 = vmatprep.subr.bf16.mxu0 %v8934_v53  ;;  %6180 = vmatprep.subr.bf16.mxu1 %v8937_v34  ;;  %v9006_v32 = vld [vmem:[#allocation18 + $0x18] sm:$0xff]   ;;  %v9008_v53 = vld [vmem:[#allocation18 + $0x60] sm:$0xff]  }
 0x79e   : > { %v9009_v34 = vld [vmem:[#allocation18 + $0xe0] sm:$0xff]  }
 0x7a0   : > { %6095 = vmatpush1.bf16.msra.mxu0 %v8932_v36  ;;  %6181 = vmatpush1.bf16.msra.mxu1 %v8935_v7  ;;  %v9010_v36 = vld [vmem:[#allocation18 + $0x20] sm:$0xff]  }
 0x7a1   : > { %6096 = vmatprep.subr.bf16.mxu0 %v8940_v2  ;;  %6182 = vmatprep.subr.bf16.mxu1 %v8943_v61  ;;  %v9011_v7 = vld [vmem:[#allocation18 + $0xa0] sm:$0xff]   ;;  %v9012_v2 = vld [vmem:[#allocation18 + $0x68] sm:$0xff]  }
 0x7a2   : > { %v9013_v61 = vld [vmem:[#allocation18 + $0xe8] sm:$0xff]  }
 0x7a4   : > { %6097 = vmatpush1.bf16.msra.mxu0 %v8938_v37  ;;  %6183 = vmatpush1.bf16.msra.mxu1 %v8941_v39  ;;  %v9014_v37 = vld [vmem:[#allocation18 + $0x28] sm:$0xff]  }
 0x7a5   : > { %6098 = vmatprep.subr.bf16.mxu0 %v8946_v33  ;;  %6184 = vmatprep.subr.bf16.mxu1 %v8949_v22  ;;  %v9015_v39 = vld [vmem:[#allocation18 + $0xa8] sm:$0xff]   ;;  %v9016_v33 = vld [vmem:[#allocation18 + $0x70] sm:$0xff]  }
 0x7a6   : > { %v9017_v22 = vld [vmem:[#allocation18 + $0xf0] sm:$0xff]  }
 0x7a8   : > { %6099 = vmatpush1.bf16.msra.mxu0 %v8944_v27  ;;  %6185 = vmatpush1.bf16.msra.mxu1 %v8947_v62  ;;  %v9018_v27 = vld [vmem:[#allocation18 + $0x30] sm:$0xff]  }
 0x7a9   : > { %6100 = vmatprep.subr.bf16.mxu0 %v8952_v40  ;;  %6186 = vmatprep.subr.bf16.mxu1 %v8955_v29  ;;  %v9019_v62 = vld [vmem:[#allocation18 + $0xb0] sm:$0xff]   ;;  %v9020_v40 = vld [vmem:[#allocation18 + $0x78] sm:$0xff]  }
 0x7aa   : > { %v9021_v29 = vld [vmem:[#allocation18 + $0xf8] sm:$0xff]  }
 0x7ac   : > { %6101 = vmatpush1.bf16.msra.mxu0 %v8950_v0  ;;  %6187 = vmatpush1.bf16.msra.mxu1 %v8953_v11  ;;  %v9022_v0 = vld [vmem:[#allocation18 + $0x38] sm:$0xff]  }
 0x7ad   : > { %6102 = vmatprep.subr.bf16.mxu0 %v8958_v48  ;;  %6188 = vmatprep.subr.bf16.mxu1 %v8961_v41  ;;  %v9023_v11 = vld [vmem:[#allocation18 + $0xb8] sm:$0xff]   ;;  %v5379_v48 = vlaneseq }
 0x7af   : > { %v5380_v41 = vshrl.u32 %v5379_v48, 7 }
 0x7b0   : > { %6103 = vmatpush1.bf16.msra.mxu0 %v8956_v4  ;;  %6189 = vmatpush1.bf16.msra.mxu1 %v8959_v42 }
 0x7b1   : > { %6104 = vmatprep.subr.bf16.mxu0 %v8964_v1  ;;  %6190 = vmatprep.subr.bf16.mxu1 %v8967_v28  ;;  %v5381_v4 = vsub.s32 0, %v5380_v41  ;;  %v5389_v42 = vsub.s32 2, %v5380_v41  ;;  %v5377_v1 = vld [vmem:[%s510_s4] sm:$0xf]  ;;  %v5385_v28 = vsub.s32 1, %v5380_v41 }
 0x7b4   : > { %6105 = vmatpush1.bf16.msra.mxu0 %v8962_v24  ;;  %6191 = vmatpush1.bf16.msra.mxu1 %v8965_v43  ;;  %v5393_v24 = vsub.s32 3, %v5380_v41  ;;  %v6213_v43 = vadd.s32 8, %v5380_v41 }
 0x7b5   : > { %6106 = vmatprep.subr.bf16.mxu0 %v8970_v44  ;;  %6192 = vmatprep.subr.bf16.mxu1 %v8973_v45  ;;  %v5382_v44 = vrot.slane %v5377_v1, %v5381_v4  ;;  %v5390_v45 = vrot.slane %v5377_v1, %v5389_v42 }
 0x7b6   : > { %vm6215_vm2 = vcmp.ge.s32.totalorder %v6213_v43, 10 }
 0x7b8   : > { %6107 = vmatpush1.bf16.msra.mxu0 %v8968_v46  ;;  %6193 = vmatpush1.bf16.msra.mxu1 %v8971_v26 }
 0x7b9   : > { %6108 = vmatprep.subr.bf16.mxu0 %v8976_v47  ;;  %6194 = vmatprep.subr.bf16.mxu1 %v8979_v50  ;;  %v5386_v47 = vrot.slane %v5377_v1, %v5385_v28  ;;  %v5394_v50 = vrot.slane %v5377_v1, %v5393_v24 }
 0x7bc   : > { %6109 = vmatpush1.bf16.msra.mxu0 %v8974_v54  ;;  %6195 = vmatpush1.bf16.msra.mxu1 %v8977_v49 }
 0x7bd   : > { %6110 = vmatprep.subr.bf16.mxu0 %v8982_v57  ;;  %6196 = vmatprep.subr.bf16.mxu1 %v8985_v59 }
 0x7c0   : > { %6111 = vmatpush1.bf16.msra.mxu0 %v8980_v60  ;;  %6197 = vmatpush1.bf16.msra.mxu1 %v8983_v63 }
 0x7c1   : > { %6112 = vmatprep.subr.bf16.mxu0 %v8988_v9  ;;  %6198 = vmatprep.subr.bf16.mxu1 %v8991_v5 }
 0x7c4   : > { %6113 = vmatpush1.bf16.msra.mxu0 %v8986_v58  ;;  %6199 = vmatpush1.bf16.msra.mxu1 %v8989_v13 }
 0x7c5   : > { %7490 = vmatprep.subr.bf16.mxu0 %v8992_v14  ;;  %7512 = vmatprep.subr.bf16.mxu1 %v8993_v8 }
 0x7c7   : > { %6115 = vmatmul.mubr.bf16.vlgmr.msra.gmra.mrb[4].mxu0 %v10478_v25  ;;  %6201 = vmatmul.mubr.bf16.vlgmr.msra.gmra.mrb[4].mxu1 %v10478_v25  ;;  %v9007_v25 = vld [vmem:[#allocation18 + $0x98] sm:$0xff]  }
 0x7c8   : > { %7491 = vmatpush3.bf16.msra.mxu0 %v8994_v12  ;;  %7513 = vmatpush3.bf16.msra.mxu1 %v8995_v16 }
 0x7c9   : > { %7492 = vmatprep.subr.bf16.mxu0 %v8996_v6  ;;  %7514 = vmatprep.subr.bf16.mxu1 %v8997_v18 }
 0x7cc   : > { %7493 = vmatpush3.bf16.msra.mxu0 %v8998_v19  ;;  %7515 = vmatpush3.bf16.msra.mxu1 %v8999_v20 }
 0x7cd   : > { %7494 = vmatprep.subr.bf16.mxu0 %v9000_v21  ;;  %7516 = vmatprep.subr.bf16.mxu1 %v9001_v55 }
 0x7d0   : > { %7495 = vmatpush3.bf16.msra.mxu0 %v9002_v15  ;;  %7517 = vmatpush3.bf16.msra.mxu1 %v9003_v35 }
 0x7d1   : > { %7496 = vmatprep.subr.bf16.mxu0 %v9004_v30  ;;  %7518 = vmatprep.subr.bf16.mxu1 %v9005_v31 }
 0x7d4   : > { %7497 = vmatpush3.bf16.msra.mxu0 %v9006_v32  ;;  %7519 = vmatpush3.bf16.msra.mxu1 %v9007_v25 }
 0x7d5   : > { %7498 = vmatprep.subr.bf16.mxu0 %v9008_v53  ;;  %7520 = vmatprep.subr.bf16.mxu1 %v9009_v34 }
 0x7d8   : > { %7499 = vmatpush3.bf16.msra.mxu0 %v9010_v36  ;;  %7521 = vmatpush3.bf16.msra.mxu1 %v9011_v7 }
 0x7d9   : > { %7500 = vmatprep.subr.bf16.mxu0 %v9012_v2  ;;  %7522 = vmatprep.subr.bf16.mxu1 %v9013_v61 }
 0x7dc   : > { %7501 = vmatpush3.bf16.msra.mxu0 %v9014_v37  ;;  %7523 = vmatpush3.bf16.msra.mxu1 %v9015_v39 }
 0x7dd   : > { %7502 = vmatprep.subr.bf16.mxu0 %v9016_v33  ;;  %7524 = vmatprep.subr.bf16.mxu1 %v9017_v22 }
 0x7e0   : > { %7503 = vmatpush3.bf16.msra.mxu0 %v9018_v27  ;;  %7525 = vmatpush3.bf16.msra.mxu1 %v9019_v62 }
 0x7e1   : > { %7504 = vmatprep.subr.bf16.mxu0 %v9020_v40  ;;  %7526 = vmatprep.subr.bf16.mxu1 %v9021_v29 }
 0x7e4   : > { %7505 = vmatpush3.bf16.msra.mxu0 %v9022_v0  ;;  %7527 = vmatpush3.bf16.msra.mxu1 %v9023_v11 }
 0x89a   : > { %v6116_v46 = vpop.f32.mrb[4].mxu0  ;;  %v6202_v26 = vpop.f32.mrb[4].mxu1 }
 0x89b   : > { %v6118_v54 = vpop.f32.mrb[5].mxu0  ;;  %v6204_v49 = vpop.f32.mrb[5].mxu1 }
 0x89c   : > { %v6120_v57 = vpop.f32.mrb[6].mxu0  ;;  %v6206_v59 = vpop.f32.mrb[6].mxu1 }
 0x89d   : > { %v7942_v60 = vadd.f32 %v6120_v57, %v5382_v44  ;;  %v7944_v63 = vadd.f32 %v6206_v59, %v5390_v45  ;;  %v6122_v9 = vpop.f32.mrb[7].mxu0  ;;  %v6208_v5 = vpop.f32.mrb[7].mxu1 }
 0x89e   : > { %v7943_v58 = vadd.f32 %v6122_v9, %v5386_v47  ;;  %v7945_v13 = vadd.f32 %v6208_v5, %v5394_v50 }
 0x89f   : > { %v6224_v14 = vsel %vm6215_vm2, %v7942_v60, %v10436_v52  ;;  %v6226_v8 = vsel %vm6215_vm2, %v7944_v63, %v10472_v3  ;;  %v7352_v3 = vld [vmem:[#allocation19] ss:$0 sm:$0xff] }
 0x8a0   : > { %6232 = vst [vmem:[%s10644_s13 + $0x20] sm:$0xf] %v6224_v14  ;;  %v6236_v12 = vpack.c.bf16 %v6224_v14, %v10424_v51  ;;  %6234 = vst [vmem:[%s10644_s13 + $0x30] sm:$0xf] %v6226_v8  ;;  %v6238_v16 = vpack.c.bf16 %v6226_v8, %v10456_v17  ;;  %v6225_v6 = vsel %vm6215_vm2, %v7943_v58, %v10440_v56 }
 0x8a1   : > { %v6227_v18 = vsel %vm6215_vm2, %v7945_v13, %v10480_v38  ;;  %6233 = vst [vmem:[%s10644_s13 + $0x28] sm:$0xf] %v6225_v6  ;;  %v6237_v52 = vpack.c.bf16 %v6225_v6, %v10430_v23 }
 0x8a2   : > { %6235 = vst [vmem:[%s10644_s13 + $0x38] sm:$0xf] %v6227_v18  ;;  %v6239_v51 = vpack.c.bf16 %v6227_v18, %v10464_v10 }
 0x8a3   : > { %6535 = vmatprep.mubr.bf16.mxu0 %v6237_v52 }
 0x8a4   : > { %6576 = vmatprep.mubr.bf16.mxu1 %v6239_v51  ;;  %6536 = vmatmul.mubr.bf16.vlgmr.msra.gmra.mrb[8].mxu0 %v6236_v12 }
 0x8a5   : > { %6577 = vmatmul.mubr.bf16.vlgmr.msra.gmra.mrb[8].mxu1 %v6238_v16 }
 0x977   : > { %v7506_v17 = vpop.f32.mrb[8].mxu0 }
 0x978   : > { %v7528_v56 = vpop.f32.mrb[8].mxu1  ;;  %v7507_v38 = vpop.f32.mrb[9].mxu0 }
 0x979   : > { %v7529_v19 = vpop.f32.mrb[9].mxu1  ;;  %v7508_v20 = vadd.f32 %v7507_v38, %v7506_v17  ;;  %v7509_v55 = vpop.f32.mrb[10].mxu0 }
 0x97a   : > { %v7530_v21 = vadd.f32 %v7529_v19, %v7528_v56  ;;  %v7531_v15 = vpop.f32.mrb[10].mxu1  ;;  %v7510_v23 = vpop.f32.mrb[11].mxu0 }
 0x97b   : > { %v7532_v35 = vpop.f32.mrb[11].mxu1  ;;  %v6538_v30 = vadd.f32 %v7508_v20, %v7352_v3  ;;  %v7511_v31 = vadd.f32 %v7510_v23, %v7509_v55 }
 0x97c   : > { %v7533_v32 = vadd.f32 %v7532_v35, %v7531_v15 }
 0x97d   : > { %v6579_v25 = vadd.f32 %v7530_v21, %v6538_v30  ;;  %v6541_v10 = vadd.f32 %v7511_v31, %v7352_v3 }
 0x97f   : > { %6585 = vst [vmem:[%s10645_s0] sm:$0xff] %v6579_v25  ;;  %v6582_v53 = vadd.f32 %v7533_v32, %v6541_v10 }
 0x981   : > { %6586 = vst [vmem:[%s10645_s0 + $0x8] sm:$0xf] %v6582_v53 }
 0x982 PF: > { %s10646_s24 = sld [smem:[#allocation27_spill]]  ;;  %s10647_s27 = sld [smem:[#allocation28_spill]] }
 0x983   : > { %s10648_s21 = smov %s9354_s22  ;;  %s10649_s22 = smov %s9358_s23 }
 0x988   : > { %p28_p10 = scmp.ge.s32.totalorder %s10646_s24, 8   ;;  %s10650_s23 = smov %s10647_s27 }
 0x98a   :  { %30 = sbr.rel (!%p28_p10) target bundleno = 16 (0x10), region = 173 }
 0x991   :  { %6604 = vsyncpa [#allocation6], 1 }
 0x992   :  { %6606 = vsyncpa [#allocation6 + $0x1], 1 }
 0x993   :  { %6607 = vsyncpa [#allocation8], 1 }
 0x994   :  { %6608 = vsyncpa [#allocation11], 1 }
 0x995   :  { %6609 = vsyncpa [#allocation14], 1 }
 0x996   :  { %6611 = vsyncpa [#allocation14 + $0x1], 1 }
 0x997   :  { %6612 = vsyncpa [#allocation17], 1 }
 0x998   :  { %6613 = vsyncpa [#allocation20], 1 }

</bundles_post_ra>
